<compile_context>
chip_gen: v7x
topology: tpu7x:2x2x1
jax: 0.10.0
libtpu: 0.0.40
codegen_flags: <defaults>
</compile_context>

<pallas_src>
import jax
import jax.numpy as jnp
from jax.experimental import pallas as pl
from jax.experimental.pallas import tpu as pltpu

C_IN, C_OUT, KH, KW = 3, 5, 3, 3


def conv2d_kernel(w_ref, b_ref, x_ref, o_ref):
    # w_ref: SMEM (C_OUT*C_IN*KH*KW,) float32, flattened OIHW weights
    # b_ref: SMEM (C_OUT,) float32 bias
    # x_ref: VMEM (IMG_PER_STEP, C_IN, H, W)
    # o_ref: VMEM (IMG_PER_STEP, C_OUT, H_OUT, W_OUT)
    n_img = o_ref.shape[0]
    h_out = o_ref.shape[2]
    w_out = o_ref.shape[3]

    # ---- hoisted, image-invariant work (done once per grid step) -----------------
    # Read all 135 weight scalars from SMEM once; Mosaic does not CSE repeated scalar
    # loads across the unrolled image loop, so without this sld count scales with
    # images_per_step.
    w_s = [w_ref[i] for i in range(C_OUT * C_IN * KH * KW)]
    # Build the 5 bias planes once; each image's accumulators start from these.
    bias_planes = [
        jnp.full((h_out, w_out), b_ref[co], dtype=jnp.float32)
        for co in range(C_OUT)
    ]

    # images_per_step is capped at 4 in the wrapper, so a static Python loop stays
    # small; per-image stores below bound the live ranges to a single image.
    for b in range(n_img):
        accs = [bias_planes[co] for co in range(C_OUT)]
        for ci in range(C_IN):
            # ONE plane load per (image, channel); up-cast once.
            plane = x_ref[b, ci, :, :].astype(jnp.float32)
            for kh in range(KH):
                for kw in range(KW):
                    # Tap = register slice of the resident plane (shift work on XLU,
                    # no extra vld).  Reused across all 5 output channels; only one
                    # tap is live at a time.
                    tap = plane[kh:kh + h_out, kw:kw + w_out]
                    t = kh * KW + kw
                    for co in range(C_OUT):
                        w_sc = w_s[(co * C_IN + ci) * KH * KW + t]
                        accs[co] = accs[co] + w_sc * tap
        # Store this image as soon as it is done: no cross-image stacking, no
        # whole-block VMEM temp, vreg pressure independent of images_per_step.
        o_ref[b] = jnp.stack(accs, axis=0).astype(o_ref.dtype)


def _pick_images_per_step(n):
    # Pack a few images per grid step to amortize the ~0.35 us per-step overhead, but
    # keep >= 4 grid steps when possible (>= 2 per v7x TensorCore so the BlockSpec
    # pipeline has something to overlap on each core) and cap the block at 4 images
    # so the unrolled image loop and the double-buffered input block stay small.
    min_steps = min(n, 4)
    best = 1
    for cand in range(1, min(n, 4) + 1):
        if n % cand == 0 and n // cand >= min_steps:
            best = cand
    return best


def conv2d_pallas(x, w, b, images_per_step=None):
    n, c_in, h, wdt = x.shape
    assert c_in == C_IN and w.shape == (C_OUT, C_IN, KH, KW) and b.shape == (C_OUT,)
    h_out = h - KH + 1
    w_out = wdt - KW + 1

    if images_per_step is None:
        images_per_step = _pick_images_per_step(n)
    assert n % images_per_step == 0, "batch must divide evenly into grid steps"
    n_steps = n // images_per_step

    w_flat = w.reshape(-1).astype(jnp.float32)
    b_f32 = b.astype(jnp.float32)

    return pl.pallas_call(
        conv2d_kernel,
        out_shape=jax.ShapeDtypeStruct((n, C_OUT, h_out, w_out), x.dtype),
        grid_spec=pltpu.PrefetchScalarGridSpec(
            num_scalar_prefetch=0,
            grid=(n_steps,),
            in_specs=[
                pl.BlockSpec(memory_space=pltpu.MemorySpace.SMEM),   # flat weights
                pl.BlockSpec(memory_space=pltpu.MemorySpace.SMEM),   # bias
                pl.BlockSpec(
                    (images_per_step, c_in, h, wdt), lambda i: (i, 0, 0, 0)
                ),
            ],
            out_specs=pl.BlockSpec(
                (images_per_step, C_OUT, h_out, w_out), lambda i: (i, 0, 0, 0)
            ),
        ),
        compiler_params=pltpu.CompilerParams(dimension_semantics=("parallel",)),
    )(w_flat, b_f32, x)


if __name__ == "__main__":
    key = jax.random.PRNGKey(0)
    kx, kw, kb = jax.random.split(key, 3)

    # small shapes consistent with Conv2d(3, 5, 3, 1): batch=2, C_in=3, 16x16 spatial
    x = jax.random.normal(kx, (2, C_IN, 16, 16), dtype=jnp.float32)

    # deterministic parameter init (matching nn.Conv2d's uniform(-1/sqrt(fan_in), +))
    fan_in = C_IN * KH * KW
    bound = 1.0 / (fan_in ** 0.5)
    w = jax.random.uniform(kw, (C_OUT, C_IN, KH, KW), jnp.float32, -bound, bound)
    b = jax.random.uniform(kb, (C_OUT,), jnp.float32, -bound, bound)

    out = conv2d_pallas(x, w, b)
    out = jax.block_until_ready(out)

    # pure-JAX reference for correctness
    ref = jax.lax.conv_general_dilated(
        x, w, window_strides=(1, 1), padding="VALID",
        dimension_numbers=("NCHW", "OIHW", "NCHW"),
    ) + b[None, :, None, None]

    assert out.shape == (2, C_OUT, 14, 14), out.shape
    assert jnp.allclose(out, ref, atol=1e-4, rtol=1e-4), "mismatch vs JAX conv reference"
    print("KERNEL_OK")
</pallas_src>

<mosaic_0001>
module attributes {stable_mosaic.version = 11 : i64} {
  func.func @conv2d_kernel(%arg0: i32, %arg1: memref<135xf32, #tpu.memory_space<smem>>, %arg2: memref<5xf32, #tpu.memory_space<smem>>, %arg3: memref<1x3x16x16xf32, #tpu.memory_space<vmem>>, %arg4: memref<1x5x14x14xf32, #tpu.memory_space<vmem>>) attributes {dimension_semantics = [#tpu.dimension_semantics<parallel>], iteration_bounds = array<i64: 2>, scalar_prefetch = 0 : i64, scratch_operands = 0 : i64, tpu.core_type = #tpu.core_type<tc>, window_params = [{transform_indices = @transform_0, window_bounds = array<i64: 135>}, {transform_indices = @transform_1, window_bounds = array<i64: 5>}, {transform_indices = @transform_2, window_bounds = array<i64: 1, 3, 16, 16>}, {transform_indices = @transform_3, window_bounds = array<i64: 1, 5, 14, 14>}]} {
    %c0 = arith.constant 0 : index
    %0 = memref.load %arg1[%c0] : memref<135xf32, #tpu.memory_space<smem>>
    %c1 = arith.constant 1 : index
    %1 = memref.load %arg1[%c1] : memref<135xf32, #tpu.memory_space<smem>>
    %c2 = arith.constant 2 : index
    %2 = memref.load %arg1[%c2] : memref<135xf32, #tpu.memory_space<smem>>
    %c3 = arith.constant 3 : index
    %3 = memref.load %arg1[%c3] : memref<135xf32, #tpu.memory_space<smem>>
    %c4 = arith.constant 4 : index
    %4 = memref.load %arg1[%c4] : memref<135xf32, #tpu.memory_space<smem>>
    %c5 = arith.constant 5 : index
    %5 = memref.load %arg1[%c5] : memref<135xf32, #tpu.memory_space<smem>>
    %c6 = arith.constant 6 : index
    %6 = memref.load %arg1[%c6] : memref<135xf32, #tpu.memory_space<smem>>
    %c7 = arith.constant 7 : index
    %7 = memref.load %arg1[%c7] : memref<135xf32, #tpu.memory_space<smem>>
    %c8 = arith.constant 8 : index
    %8 = memref.load %arg1[%c8] : memref<135xf32, #tpu.memory_space<smem>>
    %c9 = arith.constant 9 : index
    %9 = memref.load %arg1[%c9] : memref<135xf32, #tpu.memory_space<smem>>
    %c10 = arith.constant 10 : index
    %10 = memref.load %arg1[%c10] : memref<135xf32, #tpu.memory_space<smem>>
    %c11 = arith.constant 11 : index
    %11 = memref.load %arg1[%c11] : memref<135xf32, #tpu.memory_space<smem>>
    %c12 = arith.constant 12 : index
    %12 = memref.load %arg1[%c12] : memref<135xf32, #tpu.memory_space<smem>>
    %c13 = arith.constant 13 : index
    %13 = memref.load %arg1[%c13] : memref<135xf32, #tpu.memory_space<smem>>
    %c14 = arith.constant 14 : index
    %14 = memref.load %arg1[%c14] : memref<135xf32, #tpu.memory_space<smem>>
    %c15 = arith.constant 15 : index
    %15 = memref.load %arg1[%c15] : memref<135xf32, #tpu.memory_space<smem>>
    %c16 = arith.constant 16 : index
    %16 = memref.load %arg1[%c16] : memref<135xf32, #tpu.memory_space<smem>>
    %c17 = arith.constant 17 : index
    %17 = memref.load %arg1[%c17] : memref<135xf32, #tpu.memory_space<smem>>
    %c18 = arith.constant 18 : index
    %18 = memref.load %arg1[%c18] : memref<135xf32, #tpu.memory_space<smem>>
    %c19 = arith.constant 19 : index
    %19 = memref.load %arg1[%c19] : memref<135xf32, #tpu.memory_space<smem>>
    %c20 = arith.constant 20 : index
    %20 = memref.load %arg1[%c20] : memref<135xf32, #tpu.memory_space<smem>>
    %c21 = arith.constant 21 : index
    %21 = memref.load %arg1[%c21] : memref<135xf32, #tpu.memory_space<smem>>
    %c22 = arith.constant 22 : index
    %22 = memref.load %arg1[%c22] : memref<135xf32, #tpu.memory_space<smem>>
    %c23 = arith.constant 23 : index
    %23 = memref.load %arg1[%c23] : memref<135xf32, #tpu.memory_space<smem>>
    %c24 = arith.constant 24 : index
    %24 = memref.load %arg1[%c24] : memref<135xf32, #tpu.memory_space<smem>>
    %c25 = arith.constant 25 : index
    %25 = memref.load %arg1[%c25] : memref<135xf32, #tpu.memory_space<smem>>
    %c26 = arith.constant 26 : index
    %26 = memref.load %arg1[%c26] : memref<135xf32, #tpu.memory_space<smem>>
    %c27 = arith.constant 27 : index
    %27 = memref.load %arg1[%c27] : memref<135xf32, #tpu.memory_space<smem>>
    %c28 = arith.constant 28 : index
    %28 = memref.load %arg1[%c28] : memref<135xf32, #tpu.memory_space<smem>>
    %c29 = arith.constant 29 : index
    %29 = memref.load %arg1[%c29] : memref<135xf32, #tpu.memory_space<smem>>
    %c30 = arith.constant 30 : index
    %30 = memref.load %arg1[%c30] : memref<135xf32, #tpu.memory_space<smem>>
    %c31 = arith.constant 31 : index
    %31 = memref.load %arg1[%c31] : memref<135xf32, #tpu.memory_space<smem>>
    %c32 = arith.constant 32 : index
    %32 = memref.load %arg1[%c32] : memref<135xf32, #tpu.memory_space<smem>>
    %c33 = arith.constant 33 : index
    %33 = memref.load %arg1[%c33] : memref<135xf32, #tpu.memory_space<smem>>
    %c34 = arith.constant 34 : index
    %34 = memref.load %arg1[%c34] : memref<135xf32, #tpu.memory_space<smem>>
    %c35 = arith.constant 35 : index
    %35 = memref.load %arg1[%c35] : memref<135xf32, #tpu.memory_space<smem>>
    %c36 = arith.constant 36 : index
    %36 = memref.load %arg1[%c36] : memref<135xf32, #tpu.memory_space<smem>>
    %c37 = arith.constant 37 : index
    %37 = memref.load %arg1[%c37] : memref<135xf32, #tpu.memory_space<smem>>
    %c38 = arith.constant 38 : index
    %38 = memref.load %arg1[%c38] : memref<135xf32, #tpu.memory_space<smem>>
    %c39 = arith.constant 39 : index
    %39 = memref.load %arg1[%c39] : memref<135xf32, #tpu.memory_space<smem>>
    %c40 = arith.constant 40 : index
    %40 = memref.load %arg1[%c40] : memref<135xf32, #tpu.memory_space<smem>>
    %c41 = arith.constant 41 : index
    %41 = memref.load %arg1[%c41] : memref<135xf32, #tpu.memory_space<smem>>
    %c42 = arith.constant 42 : index
    %42 = memref.load %arg1[%c42] : memref<135xf32, #tpu.memory_space<smem>>
    %c43 = arith.constant 43 : index
    %43 = memref.load %arg1[%c43] : memref<135xf32, #tpu.memory_space<smem>>
    %c44 = arith.constant 44 : index
    %44 = memref.load %arg1[%c44] : memref<135xf32, #tpu.memory_space<smem>>
    %c45 = arith.constant 45 : index
    %45 = memref.load %arg1[%c45] : memref<135xf32, #tpu.memory_space<smem>>
    %c46 = arith.constant 46 : index
    %46 = memref.load %arg1[%c46] : memref<135xf32, #tpu.memory_space<smem>>
    %c47 = arith.constant 47 : index
    %47 = memref.load %arg1[%c47] : memref<135xf32, #tpu.memory_space<smem>>
    %c48 = arith.constant 48 : index
    %48 = memref.load %arg1[%c48] : memref<135xf32, #tpu.memory_space<smem>>
    %c49 = arith.constant 49 : index
    %49 = memref.load %arg1[%c49] : memref<135xf32, #tpu.memory_space<smem>>
    %c50 = arith.constant 50 : index
    %50 = memref.load %arg1[%c50] : memref<135xf32, #tpu.memory_space<smem>>
    %c51 = arith.constant 51 : index
    %51 = memref.load %arg1[%c51] : memref<135xf32, #tpu.memory_space<smem>>
    %c52 = arith.constant 52 : index
    %52 = memref.load %arg1[%c52] : memref<135xf32, #tpu.memory_space<smem>>
    %c53 = arith.constant 53 : index
    %53 = memref.load %arg1[%c53] : memref<135xf32, #tpu.memory_space<smem>>
    %c54 = arith.constant 54 : index
    %54 = memref.load %arg1[%c54] : memref<135xf32, #tpu.memory_space<smem>>
    %c55 = arith.constant 55 : index
    %55 = memref.load %arg1[%c55] : memref<135xf32, #tpu.memory_space<smem>>
    %c56 = arith.constant 56 : index
    %56 = memref.load %arg1[%c56] : memref<135xf32, #tpu.memory_space<smem>>
    %c57 = arith.constant 57 : index
    %57 = memref.load %arg1[%c57] : memref<135xf32, #tpu.memory_space<smem>>
    %c58 = arith.constant 58 : index
    %58 = memref.load %arg1[%c58] : memref<135xf32, #tpu.memory_space<smem>>
    %c59 = arith.constant 59 : index
    %59 = memref.load %arg1[%c59] : memref<135xf32, #tpu.memory_space<smem>>
    %c60 = arith.constant 60 : index
    %60 = memref.load %arg1[%c60] : memref<135xf32, #tpu.memory_space<smem>>
    %c61 = arith.constant 61 : index
    %61 = memref.load %arg1[%c61] : memref<135xf32, #tpu.memory_space<smem>>
    %c62 = arith.constant 62 : index
    %62 = memref.load %arg1[%c62] : memref<135xf32, #tpu.memory_space<smem>>
    %c63 = arith.constant 63 : index
    %63 = memref.load %arg1[%c63] : memref<135xf32, #tpu.memory_space<smem>>
    %c64 = arith.constant 64 : index
    %64 = memref.load %arg1[%c64] : memref<135xf32, #tpu.memory_space<smem>>
    %c65 = arith.constant 65 : index
    %65 = memref.load %arg1[%c65] : memref<135xf32, #tpu.memory_space<smem>>
    %c66 = arith.constant 66 : index
    %66 = memref.load %arg1[%c66] : memref<135xf32, #tpu.memory_space<smem>>
    %c67 = arith.constant 67 : index
    %67 = memref.load %arg1[%c67] : memref<135xf32, #tpu.memory_space<smem>>
    %c68 = arith.constant 68 : index
    %68 = memref.load %arg1[%c68] : memref<135xf32, #tpu.memory_space<smem>>
    %c69 = arith.constant 69 : index
    %69 = memref.load %arg1[%c69] : memref<135xf32, #tpu.memory_space<smem>>
    %c70 = arith.constant 70 : index
    %70 = memref.load %arg1[%c70] : memref<135xf32, #tpu.memory_space<smem>>
    %c71 = arith.constant 71 : index
    %71 = memref.load %arg1[%c71] : memref<135xf32, #tpu.memory_space<smem>>
    %c72 = arith.constant 72 : index
    %72 = memref.load %arg1[%c72] : memref<135xf32, #tpu.memory_space<smem>>
    %c73 = arith.constant 73 : index
    %73 = memref.load %arg1[%c73] : memref<135xf32, #tpu.memory_space<smem>>
    %c74 = arith.constant 74 : index
    %74 = memref.load %arg1[%c74] : memref<135xf32, #tpu.memory_space<smem>>
    %c75 = arith.constant 75 : index
    %75 = memref.load %arg1[%c75] : memref<135xf32, #tpu.memory_space<smem>>
    %c76 = arith.constant 76 : index
    %76 = memref.load %arg1[%c76] : memref<135xf32, #tpu.memory_space<smem>>
    %c77 = arith.constant 77 : index
    %77 = memref.load %arg1[%c77] : memref<135xf32, #tpu.memory_space<smem>>
    %c78 = arith.constant 78 : index
    %78 = memref.load %arg1[%c78] : memref<135xf32, #tpu.memory_space<smem>>
    %c79 = arith.constant 79 : index
    %79 = memref.load %arg1[%c79] : memref<135xf32, #tpu.memory_space<smem>>
    %c80 = arith.constant 80 : index
    %80 = memref.load %arg1[%c80] : memref<135xf32, #tpu.memory_space<smem>>
    %c81 = arith.constant 81 : index
    %81 = memref.load %arg1[%c81] : memref<135xf32, #tpu.memory_space<smem>>
    %c82 = arith.constant 82 : index
    %82 = memref.load %arg1[%c82] : memref<135xf32, #tpu.memory_space<smem>>
    %c83 = arith.constant 83 : index
    %83 = memref.load %arg1[%c83] : memref<135xf32, #tpu.memory_space<smem>>
    %c84 = arith.constant 84 : index
    %84 = memref.load %arg1[%c84] : memref<135xf32, #tpu.memory_space<smem>>
    %c85 = arith.constant 85 : index
    %85 = memref.load %arg1[%c85] : memref<135xf32, #tpu.memory_space<smem>>
    %c86 = arith.constant 86 : index
    %86 = memref.load %arg1[%c86] : memref<135xf32, #tpu.memory_space<smem>>
    %c87 = arith.constant 87 : index
    %87 = memref.load %arg1[%c87] : memref<135xf32, #tpu.memory_space<smem>>
    %c88 = arith.constant 88 : index
    %88 = memref.load %arg1[%c88] : memref<135xf32, #tpu.memory_space<smem>>
    %c89 = arith.constant 89 : index
    %89 = memref.load %arg1[%c89] : memref<135xf32, #tpu.memory_space<smem>>
    %c90 = arith.constant 90 : index
    %90 = memref.load %arg1[%c90] : memref<135xf32, #tpu.memory_space<smem>>
    %c91 = arith.constant 91 : index
    %91 = memref.load %arg1[%c91] : memref<135xf32, #tpu.memory_space<smem>>
    %c92 = arith.constant 92 : index
    %92 = memref.load %arg1[%c92] : memref<135xf32, #tpu.memory_space<smem>>
    %c93 = arith.constant 93 : index
    %93 = memref.load %arg1[%c93] : memref<135xf32, #tpu.memory_space<smem>>
    %c94 = arith.constant 94 : index
    %94 = memref.load %arg1[%c94] : memref<135xf32, #tpu.memory_space<smem>>
    %c95 = arith.constant 95 : index
    %95 = memref.load %arg1[%c95] : memref<135xf32, #tpu.memory_space<smem>>
    %c96 = arith.constant 96 : index
    %96 = memref.load %arg1[%c96] : memref<135xf32, #tpu.memory_space<smem>>
    %c97 = arith.constant 97 : index
    %97 = memref.load %arg1[%c97] : memref<135xf32, #tpu.memory_space<smem>>
    %c98 = arith.constant 98 : index
    %98 = memref.load %arg1[%c98] : memref<135xf32, #tpu.memory_space<smem>>
    %c99 = arith.constant 99 : index
    %99 = memref.load %arg1[%c99] : memref<135xf32, #tpu.memory_space<smem>>
    %c100 = arith.constant 100 : index
    %100 = memref.load %arg1[%c100] : memref<135xf32, #tpu.memory_space<smem>>
    %c101 = arith.constant 101 : index
    %101 = memref.load %arg1[%c101] : memref<135xf32, #tpu.memory_space<smem>>
    %c102 = arith.constant 102 : index
    %102 = memref.load %arg1[%c102] : memref<135xf32, #tpu.memory_space<smem>>
    %c103 = arith.constant 103 : index
    %103 = memref.load %arg1[%c103] : memref<135xf32, #tpu.memory_space<smem>>
    %c104 = arith.constant 104 : index
    %104 = memref.load %arg1[%c104] : memref<135xf32, #tpu.memory_space<smem>>
    %c105 = arith.constant 105 : index
    %105 = memref.load %arg1[%c105] : memref<135xf32, #tpu.memory_space<smem>>
    %c106 = arith.constant 106 : index
    %106 = memref.load %arg1[%c106] : memref<135xf32, #tpu.memory_space<smem>>
    %c107 = arith.constant 107 : index
    %107 = memref.load %arg1[%c107] : memref<135xf32, #tpu.memory_space<smem>>
    %c108 = arith.constant 108 : index
    %108 = memref.load %arg1[%c108] : memref<135xf32, #tpu.memory_space<smem>>
    %c109 = arith.constant 109 : index
    %109 = memref.load %arg1[%c109] : memref<135xf32, #tpu.memory_space<smem>>
    %c110 = arith.constant 110 : index
    %110 = memref.load %arg1[%c110] : memref<135xf32, #tpu.memory_space<smem>>
    %c111 = arith.constant 111 : index
    %111 = memref.load %arg1[%c111] : memref<135xf32, #tpu.memory_space<smem>>
    %c112 = arith.constant 112 : index
    %112 = memref.load %arg1[%c112] : memref<135xf32, #tpu.memory_space<smem>>
    %c113 = arith.constant 113 : index
    %113 = memref.load %arg1[%c113] : memref<135xf32, #tpu.memory_space<smem>>
    %c114 = arith.constant 114 : index
    %114 = memref.load %arg1[%c114] : memref<135xf32, #tpu.memory_space<smem>>
    %c115 = arith.constant 115 : index
    %115 = memref.load %arg1[%c115] : memref<135xf32, #tpu.memory_space<smem>>
    %c116 = arith.constant 116 : index
    %116 = memref.load %arg1[%c116] : memref<135xf32, #tpu.memory_space<smem>>
    %c117 = arith.constant 117 : index
    %117 = memref.load %arg1[%c117] : memref<135xf32, #tpu.memory_space<smem>>
    %c118 = arith.constant 118 : index
    %118 = memref.load %arg1[%c118] : memref<135xf32, #tpu.memory_space<smem>>
    %c119 = arith.constant 119 : index
    %119 = memref.load %arg1[%c119] : memref<135xf32, #tpu.memory_space<smem>>
    %c120 = arith.constant 120 : index
    %120 = memref.load %arg1[%c120] : memref<135xf32, #tpu.memory_space<smem>>
    %c121 = arith.constant 121 : index
    %121 = memref.load %arg1[%c121] : memref<135xf32, #tpu.memory_space<smem>>
    %c122 = arith.constant 122 : index
    %122 = memref.load %arg1[%c122] : memref<135xf32, #tpu.memory_space<smem>>
    %c123 = arith.constant 123 : index
    %123 = memref.load %arg1[%c123] : memref<135xf32, #tpu.memory_space<smem>>
    %c124 = arith.constant 124 : index
    %124 = memref.load %arg1[%c124] : memref<135xf32, #tpu.memory_space<smem>>
    %c125 = arith.constant 125 : index
    %125 = memref.load %arg1[%c125] : memref<135xf32, #tpu.memory_space<smem>>
    %c126 = arith.constant 126 : index
    %126 = memref.load %arg1[%c126] : memref<135xf32, #tpu.memory_space<smem>>
    %c127 = arith.constant 127 : index
    %127 = memref.load %arg1[%c127] : memref<135xf32, #tpu.memory_space<smem>>
    %c128 = arith.constant 128 : index
    %128 = memref.load %arg1[%c128] : memref<135xf32, #tpu.memory_space<smem>>
    %c129 = arith.constant 129 : index
    %129 = memref.load %arg1[%c129] : memref<135xf32, #tpu.memory_space<smem>>
    %c130 = arith.constant 130 : index
    %130 = memref.load %arg1[%c130] : memref<135xf32, #tpu.memory_space<smem>>
    %c131 = arith.constant 131 : index
    %131 = memref.load %arg1[%c131] : memref<135xf32, #tpu.memory_space<smem>>
    %c132 = arith.constant 132 : index
    %132 = memref.load %arg1[%c132] : memref<135xf32, #tpu.memory_space<smem>>
    %c133 = arith.constant 133 : index
    %133 = memref.load %arg1[%c133] : memref<135xf32, #tpu.memory_space<smem>>
    %c134 = arith.constant 134 : index
    %134 = memref.load %arg1[%c134] : memref<135xf32, #tpu.memory_space<smem>>
    %c0_0 = arith.constant 0 : index
    %135 = memref.load %arg2[%c0_0] : memref<5xf32, #tpu.memory_space<smem>>
    %136 = vector.broadcast %135 : f32 to vector<14x14xf32>
    %c1_1 = arith.constant 1 : index
    %137 = memref.load %arg2[%c1_1] : memref<5xf32, #tpu.memory_space<smem>>
    %138 = vector.broadcast %137 : f32 to vector<14x14xf32>
    %c2_2 = arith.constant 2 : index
    %139 = memref.load %arg2[%c2_2] : memref<5xf32, #tpu.memory_space<smem>>
    %140 = vector.broadcast %139 : f32 to vector<14x14xf32>
    %c3_3 = arith.constant 3 : index
    %141 = memref.load %arg2[%c3_3] : memref<5xf32, #tpu.memory_space<smem>>
    %142 = vector.broadcast %141 : f32 to vector<14x14xf32>
    %c4_4 = arith.constant 4 : index
    %143 = memref.load %arg2[%c4_4] : memref<5xf32, #tpu.memory_space<smem>>
    %144 = vector.broadcast %143 : f32 to vector<14x14xf32>
    %c0_5 = arith.constant 0 : index
    %c0_6 = arith.constant 0 : index
    %c0_7 = arith.constant 0 : index
    %c0_8 = arith.constant 0 : index
    %145 = vector.load %arg3[%c0_5, %c0_6, %c0_7, %c0_8] : memref<1x3x16x16xf32, #tpu.memory_space<vmem>>, vector<1x1x16x16xf32>
    %146 = vector.shape_cast %145 : vector<1x1x16x16xf32> to vector<16x16xf32>
    %147 = vector.extract_strided_slice %146 {offsets = [0, 0], sizes = [14, 14], strides = [1, 1]} : vector<16x16xf32> to vector<14x14xf32>
    %148 = vector.broadcast %0 : f32 to vector<14x14xf32>
    %149 = arith.mulf %148, %147 : vector<14x14xf32>
    %150 = arith.addf %136, %149 : vector<14x14xf32>
    %151 = vector.broadcast %27 : f32 to vector<14x14xf32>
    %152 = arith.mulf %151, %147 : vector<14x14xf32>
    %153 = arith.addf %138, %152 : vector<14x14xf32>
    %154 = vector.broadcast %54 : f32 to vector<14x14xf32>
    %155 = arith.mulf %154, %147 : vector<14x14xf32>
    %156 = arith.addf %140, %155 : vector<14x14xf32>
    %157 = vector.broadcast %81 : f32 to vector<14x14xf32>
    %158 = arith.mulf %157, %147 : vector<14x14xf32>
    %159 = arith.addf %142, %158 : vector<14x14xf32>
    %160 = vector.broadcast %108 : f32 to vector<14x14xf32>
    %161 = arith.mulf %160, %147 : vector<14x14xf32>
    %162 = arith.addf %144, %161 : vector<14x14xf32>
    %163 = vector.extract_strided_slice %146 {offsets = [0, 1], sizes = [14, 14], strides = [1, 1]} : vector<16x16xf32> to vector<14x14xf32>
    %164 = vector.broadcast %1 : f32 to vector<14x14xf32>
    %165 = arith.mulf %164, %163 : vector<14x14xf32>
    %166 = arith.addf %150, %165 : vector<14x14xf32>
    %167 = vector.broadcast %28 : f32 to vector<14x14xf32>
    %168 = arith.mulf %167, %163 : vector<14x14xf32>
    %169 = arith.addf %153, %168 : vector<14x14xf32>
    %170 = vector.broadcast %55 : f32 to vector<14x14xf32>
    %171 = arith.mulf %170, %163 : vector<14x14xf32>
    %172 = arith.addf %156, %171 : vector<14x14xf32>
    %173 = vector.broadcast %82 : f32 to vector<14x14xf32>
    %174 = arith.mulf %173, %163 : vector<14x14xf32>
    %175 = arith.addf %159, %174 : vector<14x14xf32>
    %176 = vector.broadcast %109 : f32 to vector<14x14xf32>
    %177 = arith.mulf %176, %163 : vector<14x14xf32>
    %178 = arith.addf %162, %177 : vector<14x14xf32>
    %179 = vector.extract_strided_slice %146 {offsets = [0, 2], sizes = [14, 14], strides = [1, 1]} : vector<16x16xf32> to vector<14x14xf32>
    %180 = vector.broadcast %2 : f32 to vector<14x14xf32>
    %181 = arith.mulf %180, %179 : vector<14x14xf32>
    %182 = arith.addf %166, %181 : vector<14x14xf32>
    %183 = vector.broadcast %29 : f32 to vector<14x14xf32>
    %184 = arith.mulf %183, %179 : vector<14x14xf32>
    %185 = arith.addf %169, %184 : vector<14x14xf32>
    %186 = vector.broadcast %56 : f32 to vector<14x14xf32>
    %187 = arith.mulf %186, %179 : vector<14x14xf32>
    %188 = arith.addf %172, %187 : vector<14x14xf32>
    %189 = vector.broadcast %83 : f32 to vector<14x14xf32>
    %190 = arith.mulf %189, %179 : vector<14x14xf32>
    %191 = arith.addf %175, %190 : vector<14x14xf32>
    %192 = vector.broadcast %110 : f32 to vector<14x14xf32>
    %193 = arith.mulf %192, %179 : vector<14x14xf32>
    %194 = arith.addf %178, %193 : vector<14x14xf32>
    %195 = vector.extract_strided_slice %146 {offsets = [1, 0], sizes = [14, 14], strides = [1, 1]} : vector<16x16xf32> to vector<14x14xf32>
    %196 = vector.broadcast %3 : f32 to vector<14x14xf32>
    %197 = arith.mulf %196, %195 : vector<14x14xf32>
    %198 = arith.addf %182, %197 : vector<14x14xf32>
    %199 = vector.broadcast %30 : f32 to vector<14x14xf32>
    %200 = arith.mulf %199, %195 : vector<14x14xf32>
    %201 = arith.addf %185, %200 : vector<14x14xf32>
    %202 = vector.broadcast %57 : f32 to vector<14x14xf32>
    %203 = arith.mulf %202, %195 : vector<14x14xf32>
    %204 = arith.addf %188, %203 : vector<14x14xf32>
    %205 = vector.broadcast %84 : f32 to vector<14x14xf32>
    %206 = arith.mulf %205, %195 : vector<14x14xf32>
    %207 = arith.addf %191, %206 : vector<14x14xf32>
    %208 = vector.broadcast %111 : f32 to vector<14x14xf32>
    %209 = arith.mulf %208, %195 : vector<14x14xf32>
    %210 = arith.addf %194, %209 : vector<14x14xf32>
    %211 = vector.extract_strided_slice %146 {offsets = [1, 1], sizes = [14, 14], strides = [1, 1]} : vector<16x16xf32> to vector<14x14xf32>
    %212 = vector.broadcast %4 : f32 to vector<14x14xf32>
    %213 = arith.mulf %212, %211 : vector<14x14xf32>
    %214 = arith.addf %198, %213 : vector<14x14xf32>
    %215 = vector.broadcast %31 : f32 to vector<14x14xf32>
    %216 = arith.mulf %215, %211 : vector<14x14xf32>
    %217 = arith.addf %201, %216 : vector<14x14xf32>
    %218 = vector.broadcast %58 : f32 to vector<14x14xf32>
    %219 = arith.mulf %218, %211 : vector<14x14xf32>
    %220 = arith.addf %204, %219 : vector<14x14xf32>
    %221 = vector.broadcast %85 : f32 to vector<14x14xf32>
    %222 = arith.mulf %221, %211 : vector<14x14xf32>
    %223 = arith.addf %207, %222 : vector<14x14xf32>
    %224 = vector.broadcast %112 : f32 to vector<14x14xf32>
    %225 = arith.mulf %224, %211 : vector<14x14xf32>
    %226 = arith.addf %210, %225 : vector<14x14xf32>
    %227 = vector.extract_strided_slice %146 {offsets = [1, 2], sizes = [14, 14], strides = [1, 1]} : vector<16x16xf32> to vector<14x14xf32>
    %228 = vector.broadcast %5 : f32 to vector<14x14xf32>
    %229 = arith.mulf %228, %227 : vector<14x14xf32>
    %230 = arith.addf %214, %229 : vector<14x14xf32>
    %231 = vector.broadcast %32 : f32 to vector<14x14xf32>
    %232 = arith.mulf %231, %227 : vector<14x14xf32>
    %233 = arith.addf %217, %232 : vector<14x14xf32>
    %234 = vector.broadcast %59 : f32 to vector<14x14xf32>
    %235 = arith.mulf %234, %227 : vector<14x14xf32>
    %236 = arith.addf %220, %235 : vector<14x14xf32>
    %237 = vector.broadcast %86 : f32 to vector<14x14xf32>
    %238 = arith.mulf %237, %227 : vector<14x14xf32>
    %239 = arith.addf %223, %238 : vector<14x14xf32>
    %240 = vector.broadcast %113 : f32 to vector<14x14xf32>
    %241 = arith.mulf %240, %227 : vector<14x14xf32>
    %242 = arith.addf %226, %241 : vector<14x14xf32>
    %243 = vector.extract_strided_slice %146 {offsets = [2, 0], sizes = [14, 14], strides = [1, 1]} : vector<16x16xf32> to vector<14x14xf32>
    %244 = vector.broadcast %6 : f32 to vector<14x14xf32>
    %245 = arith.mulf %244, %243 : vector<14x14xf32>
    %246 = arith.addf %230, %245 : vector<14x14xf32>
    %247 = vector.broadcast %33 : f32 to vector<14x14xf32>
    %248 = arith.mulf %247, %243 : vector<14x14xf32>
    %249 = arith.addf %233, %248 : vector<14x14xf32>
    %250 = vector.broadcast %60 : f32 to vector<14x14xf32>
    %251 = arith.mulf %250, %243 : vector<14x14xf32>
    %252 = arith.addf %236, %251 : vector<14x14xf32>
    %253 = vector.broadcast %87 : f32 to vector<14x14xf32>
    %254 = arith.mulf %253, %243 : vector<14x14xf32>
    %255 = arith.addf %239, %254 : vector<14x14xf32>
    %256 = vector.broadcast %114 : f32 to vector<14x14xf32>
    %257 = arith.mulf %256, %243 : vector<14x14xf32>
    %258 = arith.addf %242, %257 : vector<14x14xf32>
    %259 = vector.extract_strided_slice %146 {offsets = [2, 1], sizes = [14, 14], strides = [1, 1]} : vector<16x16xf32> to vector<14x14xf32>
    %260 = vector.broadcast %7 : f32 to vector<14x14xf32>
    %261 = arith.mulf %260, %259 : vector<14x14xf32>
    %262 = arith.addf %246, %261 : vector<14x14xf32>
    %263 = vector.broadcast %34 : f32 to vector<14x14xf32>
    %264 = arith.mulf %263, %259 : vector<14x14xf32>
    %265 = arith.addf %249, %264 : vector<14x14xf32>
    %266 = vector.broadcast %61 : f32 to vector<14x14xf32>
    %267 = arith.mulf %266, %259 : vector<14x14xf32>
    %268 = arith.addf %252, %267 : vector<14x14xf32>
    %269 = vector.broadcast %88 : f32 to vector<14x14xf32>
    %270 = arith.mulf %269, %259 : vector<14x14xf32>
    %271 = arith.addf %255, %270 : vector<14x14xf32>
    %272 = vector.broadcast %115 : f32 to vector<14x14xf32>
    %273 = arith.mulf %272, %259 : vector<14x14xf32>
    %274 = arith.addf %258, %273 : vector<14x14xf32>
    %275 = vector.extract_strided_slice %146 {offsets = [2, 2], sizes = [14, 14], strides = [1, 1]} : vector<16x16xf32> to vector<14x14xf32>
    %276 = vector.broadcast %8 : f32 to vector<14x14xf32>
    %277 = arith.mulf %276, %275 : vector<14x14xf32>
    %278 = arith.addf %262, %277 : vector<14x14xf32>
    %279 = vector.broadcast %35 : f32 to vector<14x14xf32>
    %280 = arith.mulf %279, %275 : vector<14x14xf32>
    %281 = arith.addf %265, %280 : vector<14x14xf32>
    %282 = vector.broadcast %62 : f32 to vector<14x14xf32>
    %283 = arith.mulf %282, %275 : vector<14x14xf32>
    %284 = arith.addf %268, %283 : vector<14x14xf32>
    %285 = vector.broadcast %89 : f32 to vector<14x14xf32>
    %286 = arith.mulf %285, %275 : vector<14x14xf32>
    %287 = arith.addf %271, %286 : vector<14x14xf32>
    %288 = vector.broadcast %116 : f32 to vector<14x14xf32>
    %289 = arith.mulf %288, %275 : vector<14x14xf32>
    %290 = arith.addf %274, %289 : vector<14x14xf32>
    %c0_9 = arith.constant 0 : index
    %c1_10 = arith.constant 1 : index
    %c0_11 = arith.constant 0 : index
    %c0_12 = arith.constant 0 : index
    %291 = vector.load %arg3[%c0_9, %c1_10, %c0_11, %c0_12] : memref<1x3x16x16xf32, #tpu.memory_space<vmem>>, vector<1x1x16x16xf32>
    %292 = vector.shape_cast %291 : vector<1x1x16x16xf32> to vector<16x16xf32>
    %293 = vector.extract_strided_slice %292 {offsets = [0, 0], sizes = [14, 14], strides = [1, 1]} : vector<16x16xf32> to vector<14x14xf32>
    %294 = vector.broadcast %9 : f32 to vector<14x14xf32>
    %295 = arith.mulf %294, %293 : vector<14x14xf32>
    %296 = arith.addf %278, %295 : vector<14x14xf32>
    %297 = vector.broadcast %36 : f32 to vector<14x14xf32>
    %298 = arith.mulf %297, %293 : vector<14x14xf32>
    %299 = arith.addf %281, %298 : vector<14x14xf32>
    %300 = vector.broadcast %63 : f32 to vector<14x14xf32>
    %301 = arith.mulf %300, %293 : vector<14x14xf32>
    %302 = arith.addf %284, %301 : vector<14x14xf32>
    %303 = vector.broadcast %90 : f32 to vector<14x14xf32>
    %304 = arith.mulf %303, %293 : vector<14x14xf32>
    %305 = arith.addf %287, %304 : vector<14x14xf32>
    %306 = vector.broadcast %117 : f32 to vector<14x14xf32>
    %307 = arith.mulf %306, %293 : vector<14x14xf32>
    %308 = arith.addf %290, %307 : vector<14x14xf32>
    %309 = vector.extract_strided_slice %292 {offsets = [0, 1], sizes = [14, 14], strides = [1, 1]} : vector<16x16xf32> to vector<14x14xf32>
    %310 = vector.broadcast %10 : f32 to vector<14x14xf32>
    %311 = arith.mulf %310, %309 : vector<14x14xf32>
    %312 = arith.addf %296, %311 : vector<14x14xf32>
    %313 = vector.broadcast %37 : f32 to vector<14x14xf32>
    %314 = arith.mulf %313, %309 : vector<14x14xf32>
    %315 = arith.addf %299, %314 : vector<14x14xf32>
    %316 = vector.broadcast %64 : f32 to vector<14x14xf32>
    %317 = arith.mulf %316, %309 : vector<14x14xf32>
    %318 = arith.addf %302, %317 : vector<14x14xf32>
    %319 = vector.broadcast %91 : f32 to vector<14x14xf32>
    %320 = arith.mulf %319, %309 : vector<14x14xf32>
    %321 = arith.addf %305, %320 : vector<14x14xf32>
    %322 = vector.broadcast %118 : f32 to vector<14x14xf32>
    %323 = arith.mulf %322, %309 : vector<14x14xf32>
    %324 = arith.addf %308, %323 : vector<14x14xf32>
    %325 = vector.extract_strided_slice %292 {offsets = [0, 2], sizes = [14, 14], strides = [1, 1]} : vector<16x16xf32> to vector<14x14xf32>
    %326 = vector.broadcast %11 : f32 to vector<14x14xf32>
    %327 = arith.mulf %326, %325 : vector<14x14xf32>
    %328 = arith.addf %312, %327 : vector<14x14xf32>
    %329 = vector.broadcast %38 : f32 to vector<14x14xf32>
    %330 = arith.mulf %329, %325 : vector<14x14xf32>
    %331 = arith.addf %315, %330 : vector<14x14xf32>
    %332 = vector.broadcast %65 : f32 to vector<14x14xf32>
    %333 = arith.mulf %332, %325 : vector<14x14xf32>
    %334 = arith.addf %318, %333 : vector<14x14xf32>
    %335 = vector.broadcast %92 : f32 to vector<14x14xf32>
    %336 = arith.mulf %335, %325 : vector<14x14xf32>
    %337 = arith.addf %321, %336 : vector<14x14xf32>
    %338 = vector.broadcast %119 : f32 to vector<14x14xf32>
    %339 = arith.mulf %338, %325 : vector<14x14xf32>
    %340 = arith.addf %324, %339 : vector<14x14xf32>
    %341 = vector.extract_strided_slice %292 {offsets = [1, 0], sizes = [14, 14], strides = [1, 1]} : vector<16x16xf32> to vector<14x14xf32>
    %342 = vector.broadcast %12 : f32 to vector<14x14xf32>
    %343 = arith.mulf %342, %341 : vector<14x14xf32>
    %344 = arith.addf %328, %343 : vector<14x14xf32>
    %345 = vector.broadcast %39 : f32 to vector<14x14xf32>
    %346 = arith.mulf %345, %341 : vector<14x14xf32>
    %347 = arith.addf %331, %346 : vector<14x14xf32>
    %348 = vector.broadcast %66 : f32 to vector<14x14xf32>
    %349 = arith.mulf %348, %341 : vector<14x14xf32>
    %350 = arith.addf %334, %349 : vector<14x14xf32>
    %351 = vector.broadcast %93 : f32 to vector<14x14xf32>
    %352 = arith.mulf %351, %341 : vector<14x14xf32>
    %353 = arith.addf %337, %352 : vector<14x14xf32>
    %354 = vector.broadcast %120 : f32 to vector<14x14xf32>
    %355 = arith.mulf %354, %341 : vector<14x14xf32>
    %356 = arith.addf %340, %355 : vector<14x14xf32>
    %357 = vector.extract_strided_slice %292 {offsets = [1, 1], sizes = [14, 14], strides = [1, 1]} : vector<16x16xf32> to vector<14x14xf32>
    %358 = vector.broadcast %13 : f32 to vector<14x14xf32>
    %359 = arith.mulf %358, %357 : vector<14x14xf32>
    %360 = arith.addf %344, %359 : vector<14x14xf32>
    %361 = vector.broadcast %40 : f32 to vector<14x14xf32>
    %362 = arith.mulf %361, %357 : vector<14x14xf32>
    %363 = arith.addf %347, %362 : vector<14x14xf32>
    %364 = vector.broadcast %67 : f32 to vector<14x14xf32>
    %365 = arith.mulf %364, %357 : vector<14x14xf32>
    %366 = arith.addf %350, %365 : vector<14x14xf32>
    %367 = vector.broadcast %94 : f32 to vector<14x14xf32>
    %368 = arith.mulf %367, %357 : vector<14x14xf32>
    %369 = arith.addf %353, %368 : vector<14x14xf32>
    %370 = vector.broadcast %121 : f32 to vector<14x14xf32>
    %371 = arith.mulf %370, %357 : vector<14x14xf32>
    %372 = arith.addf %356, %371 : vector<14x14xf32>
    %373 = vector.extract_strided_slice %292 {offsets = [1, 2], sizes = [14, 14], strides = [1, 1]} : vector<16x16xf32> to vector<14x14xf32>
    %374 = vector.broadcast %14 : f32 to vector<14x14xf32>
    %375 = arith.mulf %374, %373 : vector<14x14xf32>
    %376 = arith.addf %360, %375 : vector<14x14xf32>
    %377 = vector.broadcast %41 : f32 to vector<14x14xf32>
    %378 = arith.mulf %377, %373 : vector<14x14xf32>
    %379 = arith.addf %363, %378 : vector<14x14xf32>
    %380 = vector.broadcast %68 : f32 to vector<14x14xf32>
    %381 = arith.mulf %380, %373 : vector<14x14xf32>
    %382 = arith.addf %366, %381 : vector<14x14xf32>
    %383 = vector.broadcast %95 : f32 to vector<14x14xf32>
    %384 = arith.mulf %383, %373 : vector<14x14xf32>
    %385 = arith.addf %369, %384 : vector<14x14xf32>
    %386 = vector.broadcast %122 : f32 to vector<14x14xf32>
    %387 = arith.mulf %386, %373 : vector<14x14xf32>
    %388 = arith.addf %372, %387 : vector<14x14xf32>
    %389 = vector.extract_strided_slice %292 {offsets = [2, 0], sizes = [14, 14], strides = [1, 1]} : vector<16x16xf32> to vector<14x14xf32>
    %390 = vector.broadcast %15 : f32 to vector<14x14xf32>
    %391 = arith.mulf %390, %389 : vector<14x14xf32>
    %392 = arith.addf %376, %391 : vector<14x14xf32>
    %393 = vector.broadcast %42 : f32 to vector<14x14xf32>
    %394 = arith.mulf %393, %389 : vector<14x14xf32>
    %395 = arith.addf %379, %394 : vector<14x14xf32>
    %396 = vector.broadcast %69 : f32 to vector<14x14xf32>
    %397 = arith.mulf %396, %389 : vector<14x14xf32>
    %398 = arith.addf %382, %397 : vector<14x14xf32>
    %399 = vector.broadcast %96 : f32 to vector<14x14xf32>
    %400 = arith.mulf %399, %389 : vector<14x14xf32>
    %401 = arith.addf %385, %400 : vector<14x14xf32>
    %402 = vector.broadcast %123 : f32 to vector<14x14xf32>
    %403 = arith.mulf %402, %389 : vector<14x14xf32>
    %404 = arith.addf %388, %403 : vector<14x14xf32>
    %405 = vector.extract_strided_slice %292 {offsets = [2, 1], sizes = [14, 14], strides = [1, 1]} : vector<16x16xf32> to vector<14x14xf32>
    %406 = vector.broadcast %16 : f32 to vector<14x14xf32>
    %407 = arith.mulf %406, %405 : vector<14x14xf32>
    %408 = arith.addf %392, %407 : vector<14x14xf32>
    %409 = vector.broadcast %43 : f32 to vector<14x14xf32>
    %410 = arith.mulf %409, %405 : vector<14x14xf32>
    %411 = arith.addf %395, %410 : vector<14x14xf32>
    %412 = vector.broadcast %70 : f32 to vector<14x14xf32>
    %413 = arith.mulf %412, %405 : vector<14x14xf32>
    %414 = arith.addf %398, %413 : vector<14x14xf32>
    %415 = vector.broadcast %97 : f32 to vector<14x14xf32>
    %416 = arith.mulf %415, %405 : vector<14x14xf32>
    %417 = arith.addf %401, %416 : vector<14x14xf32>
    %418 = vector.broadcast %124 : f32 to vector<14x14xf32>
    %419 = arith.mulf %418, %405 : vector<14x14xf32>
    %420 = arith.addf %404, %419 : vector<14x14xf32>
    %421 = vector.extract_strided_slice %292 {offsets = [2, 2], sizes = [14, 14], strides = [1, 1]} : vector<16x16xf32> to vector<14x14xf32>
    %422 = vector.broadcast %17 : f32 to vector<14x14xf32>
    %423 = arith.mulf %422, %421 : vector<14x14xf32>
    %424 = arith.addf %408, %423 : vector<14x14xf32>
    %425 = vector.broadcast %44 : f32 to vector<14x14xf32>
    %426 = arith.mulf %425, %421 : vector<14x14xf32>
    %427 = arith.addf %411, %426 : vector<14x14xf32>
    %428 = vector.broadcast %71 : f32 to vector<14x14xf32>
    %429 = arith.mulf %428, %421 : vector<14x14xf32>
    %430 = arith.addf %414, %429 : vector<14x14xf32>
    %431 = vector.broadcast %98 : f32 to vector<14x14xf32>
    %432 = arith.mulf %431, %421 : vector<14x14xf32>
    %433 = arith.addf %417, %432 : vector<14x14xf32>
    %434 = vector.broadcast %125 : f32 to vector<14x14xf32>
    %435 = arith.mulf %434, %421 : vector<14x14xf32>
    %436 = arith.addf %420, %435 : vector<14x14xf32>
    %c0_13 = arith.constant 0 : index
    %c2_14 = arith.constant 2 : index
    %c0_15 = arith.constant 0 : index
    %c0_16 = arith.constant 0 : index
    %437 = vector.load %arg3[%c0_13, %c2_14, %c0_15, %c0_16] : memref<1x3x16x16xf32, #tpu.memory_space<vmem>>, vector<1x1x16x16xf32>
    %438 = vector.shape_cast %437 : vector<1x1x16x16xf32> to vector<16x16xf32>
    %439 = vector.extract_strided_slice %438 {offsets = [0, 0], sizes = [14, 14], strides = [1, 1]} : vector<16x16xf32> to vector<14x14xf32>
    %440 = vector.broadcast %18 : f32 to vector<14x14xf32>
    %441 = arith.mulf %440, %439 : vector<14x14xf32>
    %442 = arith.addf %424, %441 : vector<14x14xf32>
    %443 = vector.broadcast %45 : f32 to vector<14x14xf32>
    %444 = arith.mulf %443, %439 : vector<14x14xf32>
    %445 = arith.addf %427, %444 : vector<14x14xf32>
    %446 = vector.broadcast %72 : f32 to vector<14x14xf32>
    %447 = arith.mulf %446, %439 : vector<14x14xf32>
    %448 = arith.addf %430, %447 : vector<14x14xf32>
    %449 = vector.broadcast %99 : f32 to vector<14x14xf32>
    %450 = arith.mulf %449, %439 : vector<14x14xf32>
    %451 = arith.addf %433, %450 : vector<14x14xf32>
    %452 = vector.broadcast %126 : f32 to vector<14x14xf32>
    %453 = arith.mulf %452, %439 : vector<14x14xf32>
    %454 = arith.addf %436, %453 : vector<14x14xf32>
    %455 = vector.extract_strided_slice %438 {offsets = [0, 1], sizes = [14, 14], strides = [1, 1]} : vector<16x16xf32> to vector<14x14xf32>
    %456 = vector.broadcast %19 : f32 to vector<14x14xf32>
    %457 = arith.mulf %456, %455 : vector<14x14xf32>
    %458 = arith.addf %442, %457 : vector<14x14xf32>
    %459 = vector.broadcast %46 : f32 to vector<14x14xf32>
    %460 = arith.mulf %459, %455 : vector<14x14xf32>
    %461 = arith.addf %445, %460 : vector<14x14xf32>
    %462 = vector.broadcast %73 : f32 to vector<14x14xf32>
    %463 = arith.mulf %462, %455 : vector<14x14xf32>
    %464 = arith.addf %448, %463 : vector<14x14xf32>
    %465 = vector.broadcast %100 : f32 to vector<14x14xf32>
    %466 = arith.mulf %465, %455 : vector<14x14xf32>
    %467 = arith.addf %451, %466 : vector<14x14xf32>
    %468 = vector.broadcast %127 : f32 to vector<14x14xf32>
    %469 = arith.mulf %468, %455 : vector<14x14xf32>
    %470 = arith.addf %454, %469 : vector<14x14xf32>
    %471 = vector.extract_strided_slice %438 {offsets = [0, 2], sizes = [14, 14], strides = [1, 1]} : vector<16x16xf32> to vector<14x14xf32>
    %472 = vector.broadcast %20 : f32 to vector<14x14xf32>
    %473 = arith.mulf %472, %471 : vector<14x14xf32>
    %474 = arith.addf %458, %473 : vector<14x14xf32>
    %475 = vector.broadcast %47 : f32 to vector<14x14xf32>
    %476 = arith.mulf %475, %471 : vector<14x14xf32>
    %477 = arith.addf %461, %476 : vector<14x14xf32>
    %478 = vector.broadcast %74 : f32 to vector<14x14xf32>
    %479 = arith.mulf %478, %471 : vector<14x14xf32>
    %480 = arith.addf %464, %479 : vector<14x14xf32>
    %481 = vector.broadcast %101 : f32 to vector<14x14xf32>
    %482 = arith.mulf %481, %471 : vector<14x14xf32>
    %483 = arith.addf %467, %482 : vector<14x14xf32>
    %484 = vector.broadcast %128 : f32 to vector<14x14xf32>
    %485 = arith.mulf %484, %471 : vector<14x14xf32>
    %486 = arith.addf %470, %485 : vector<14x14xf32>
    %487 = vector.extract_strided_slice %438 {offsets = [1, 0], sizes = [14, 14], strides = [1, 1]} : vector<16x16xf32> to vector<14x14xf32>
    %488 = vector.broadcast %21 : f32 to vector<14x14xf32>
    %489 = arith.mulf %488, %487 : vector<14x14xf32>
    %490 = arith.addf %474, %489 : vector<14x14xf32>
    %491 = vector.broadcast %48 : f32 to vector<14x14xf32>
    %492 = arith.mulf %491, %487 : vector<14x14xf32>
    %493 = arith.addf %477, %492 : vector<14x14xf32>
    %494 = vector.broadcast %75 : f32 to vector<14x14xf32>
    %495 = arith.mulf %494, %487 : vector<14x14xf32>
    %496 = arith.addf %480, %495 : vector<14x14xf32>
    %497 = vector.broadcast %102 : f32 to vector<14x14xf32>
    %498 = arith.mulf %497, %487 : vector<14x14xf32>
    %499 = arith.addf %483, %498 : vector<14x14xf32>
    %500 = vector.broadcast %129 : f32 to vector<14x14xf32>
    %501 = arith.mulf %500, %487 : vector<14x14xf32>
    %502 = arith.addf %486, %501 : vector<14x14xf32>
    %503 = vector.extract_strided_slice %438 {offsets = [1, 1], sizes = [14, 14], strides = [1, 1]} : vector<16x16xf32> to vector<14x14xf32>
    %504 = vector.broadcast %22 : f32 to vector<14x14xf32>
    %505 = arith.mulf %504, %503 : vector<14x14xf32>
    %506 = arith.addf %490, %505 : vector<14x14xf32>
    %507 = vector.broadcast %49 : f32 to vector<14x14xf32>
    %508 = arith.mulf %507, %503 : vector<14x14xf32>
    %509 = arith.addf %493, %508 : vector<14x14xf32>
    %510 = vector.broadcast %76 : f32 to vector<14x14xf32>
    %511 = arith.mulf %510, %503 : vector<14x14xf32>
    %512 = arith.addf %496, %511 : vector<14x14xf32>
    %513 = vector.broadcast %103 : f32 to vector<14x14xf32>
    %514 = arith.mulf %513, %503 : vector<14x14xf32>
    %515 = arith.addf %499, %514 : vector<14x14xf32>
    %516 = vector.broadcast %130 : f32 to vector<14x14xf32>
    %517 = arith.mulf %516, %503 : vector<14x14xf32>
    %518 = arith.addf %502, %517 : vector<14x14xf32>
    %519 = vector.extract_strided_slice %438 {offsets = [1, 2], sizes = [14, 14], strides = [1, 1]} : vector<16x16xf32> to vector<14x14xf32>
    %520 = vector.broadcast %23 : f32 to vector<14x14xf32>
    %521 = arith.mulf %520, %519 : vector<14x14xf32>
    %522 = arith.addf %506, %521 : vector<14x14xf32>
    %523 = vector.broadcast %50 : f32 to vector<14x14xf32>
    %524 = arith.mulf %523, %519 : vector<14x14xf32>
    %525 = arith.addf %509, %524 : vector<14x14xf32>
    %526 = vector.broadcast %77 : f32 to vector<14x14xf32>
    %527 = arith.mulf %526, %519 : vector<14x14xf32>
    %528 = arith.addf %512, %527 : vector<14x14xf32>
    %529 = vector.broadcast %104 : f32 to vector<14x14xf32>
    %530 = arith.mulf %529, %519 : vector<14x14xf32>
    %531 = arith.addf %515, %530 : vector<14x14xf32>
    %532 = vector.broadcast %131 : f32 to vector<14x14xf32>
    %533 = arith.mulf %532, %519 : vector<14x14xf32>
    %534 = arith.addf %518, %533 : vector<14x14xf32>
    %535 = vector.extract_strided_slice %438 {offsets = [2, 0], sizes = [14, 14], strides = [1, 1]} : vector<16x16xf32> to vector<14x14xf32>
    %536 = vector.broadcast %24 : f32 to vector<14x14xf32>
    %537 = arith.mulf %536, %535 : vector<14x14xf32>
    %538 = arith.addf %522, %537 : vector<14x14xf32>
    %539 = vector.broadcast %51 : f32 to vector<14x14xf32>
    %540 = arith.mulf %539, %535 : vector<14x14xf32>
    %541 = arith.addf %525, %540 : vector<14x14xf32>
    %542 = vector.broadcast %78 : f32 to vector<14x14xf32>
    %543 = arith.mulf %542, %535 : vector<14x14xf32>
    %544 = arith.addf %528, %543 : vector<14x14xf32>
    %545 = vector.broadcast %105 : f32 to vector<14x14xf32>
    %546 = arith.mulf %545, %535 : vector<14x14xf32>
    %547 = arith.addf %531, %546 : vector<14x14xf32>
    %548 = vector.broadcast %132 : f32 to vector<14x14xf32>
    %549 = arith.mulf %548, %535 : vector<14x14xf32>
    %550 = arith.addf %534, %549 : vector<14x14xf32>
    %551 = vector.extract_strided_slice %438 {offsets = [2, 1], sizes = [14, 14], strides = [1, 1]} : vector<16x16xf32> to vector<14x14xf32>
    %552 = vector.broadcast %25 : f32 to vector<14x14xf32>
    %553 = arith.mulf %552, %551 : vector<14x14xf32>
    %554 = arith.addf %538, %553 : vector<14x14xf32>
    %555 = vector.broadcast %52 : f32 to vector<14x14xf32>
    %556 = arith.mulf %555, %551 : vector<14x14xf32>
    %557 = arith.addf %541, %556 : vector<14x14xf32>
    %558 = vector.broadcast %79 : f32 to vector<14x14xf32>
    %559 = arith.mulf %558, %551 : vector<14x14xf32>
    %560 = arith.addf %544, %559 : vector<14x14xf32>
    %561 = vector.broadcast %106 : f32 to vector<14x14xf32>
    %562 = arith.mulf %561, %551 : vector<14x14xf32>
    %563 = arith.addf %547, %562 : vector<14x14xf32>
    %564 = vector.broadcast %133 : f32 to vector<14x14xf32>
    %565 = arith.mulf %564, %551 : vector<14x14xf32>
    %566 = arith.addf %550, %565 : vector<14x14xf32>
    %567 = vector.extract_strided_slice %438 {offsets = [2, 2], sizes = [14, 14], strides = [1, 1]} : vector<16x16xf32> to vector<14x14xf32>
    %568 = vector.broadcast %26 : f32 to vector<14x14xf32>
    %569 = arith.mulf %568, %567 : vector<14x14xf32>
    %570 = arith.addf %554, %569 : vector<14x14xf32>
    %571 = vector.broadcast %53 : f32 to vector<14x14xf32>
    %572 = arith.mulf %571, %567 : vector<14x14xf32>
    %573 = arith.addf %557, %572 : vector<14x14xf32>
    %574 = vector.broadcast %80 : f32 to vector<14x14xf32>
    %575 = arith.mulf %574, %567 : vector<14x14xf32>
    %576 = arith.addf %560, %575 : vector<14x14xf32>
    %577 = vector.broadcast %107 : f32 to vector<14x14xf32>
    %578 = arith.mulf %577, %567 : vector<14x14xf32>
    %579 = arith.addf %563, %578 : vector<14x14xf32>
    %580 = vector.broadcast %134 : f32 to vector<14x14xf32>
    %581 = arith.mulf %580, %567 : vector<14x14xf32>
    %582 = arith.addf %566, %581 : vector<14x14xf32>
    %583 = vector.shape_cast %570 : vector<14x14xf32> to vector<1x14x14xf32>
    %584 = vector.shape_cast %573 : vector<14x14xf32> to vector<1x14x14xf32>
    %585 = vector.shape_cast %576 : vector<14x14xf32> to vector<1x14x14xf32>
    %586 = vector.shape_cast %579 : vector<14x14xf32> to vector<1x14x14xf32>
    %587 = vector.shape_cast %582 : vector<14x14xf32> to vector<1x14x14xf32>
    %588 = tpu.concatenate %583, %584, %585, %586, %587 in 0 : vector<1x14x14xf32>, vector<1x14x14xf32>, vector<1x14x14xf32>, vector<1x14x14xf32>, vector<1x14x14xf32> -> vector<5x14x14xf32>
    %c0_17 = arith.constant 0 : index
    %c0_18 = arith.constant 0 : index
    %c0_19 = arith.constant 0 : index
    %c0_20 = arith.constant 0 : index
    %589 = vector.load %arg4[%c0_17, %c0_18, %c0_19, %c0_20] : memref<1x5x14x14xf32, #tpu.memory_space<vmem>>, vector<1x5x14x14xf32>
    %590 = vector.shape_cast %589 : vector<1x5x14x14xf32> to vector<5x14x14xf32>
    %591 = vector.shape_cast %588 : vector<5x14x14xf32> to vector<1x5x14x14xf32>
    tpu.vector_store %arg4[%c0_17, %c0_18, %c0_19, %c0_20], %591 {strides = array<i32>} : memref<1x5x14x14xf32, #tpu.memory_space<vmem>>, vector<1x5x14x14xf32>,
    return
  }
  func.func @transform_0(%arg0: i32) -> i32 {
    %c0_i32 = arith.constant 0 : i32
    %c0_i32_0 = arith.constant 0 : i32
    return %c0_i32 : i32
  }
  func.func @transform_1(%arg0: i32) -> i32 {
    %c0_i32 = arith.constant 0 : i32
    %c0_i32_0 = arith.constant 0 : i32
    return %c0_i32 : i32
  }
  func.func @transform_2(%arg0: i32) -> (i32, i32, i32, i32) {
    %c0_i32 = arith.constant 0 : i32
    %c0_i32_0 = arith.constant 0 : i32
    %c0_i32_1 = arith.constant 0 : i32
    %c0_i32_2 = arith.constant 0 : i32
    return %arg0, %c0_i32, %c0_i32_0, %c0_i32_1 : i32, i32, i32, i32
  }
  func.func @transform_3(%arg0: i32) -> (i32, i32, i32, i32) {
    %c0_i32 = arith.constant 0 : i32
    %c0_i32_0 = arith.constant 0 : i32
    %c0_i32_1 = arith.constant 0 : i32
    %c0_i32_2 = arith.constant 0 : i32
    return %arg0, %c0_i32, %c0_i32_0, %c0_i32_1 : i32, i32, i32, i32
  }
}

</mosaic_0001>

<bundles_post_ra>
// kernel: tpu_custom_call.1
= control target key start
LH: loop header
LB: loop body
LE: loop exit
PB: predicated region body
PF: predicated region fallthrough
CT: control target
= control target key end

     0   :  { %8 = vsyncpa [#allocation4], 0  ;;  %s4502_s0 = inlined_call_operand.hbm [shape: f32[135], index: 0, kind: input, shape index: {}]   ;;  %s4503_s1 = inlined_call_operand.vmem [shape: f32[5], index: 1, kind: input, shape index: {}]   ;;  %s4504_s2 = inlined_call_operand.hbm [shape: f32[2,3,16,16], index: 2, kind: input, shape index: {}]   ;;  %s4505_s3 = inlined_call_operand.vmem [shape: f32[2,5,14,14], index: 3, kind: output, shape index: {}]  }
   0x1   :  { %9 = vsyncpa [#allocation5], 0 }
   0x2   :  { %10 = vsyncpa [#allocation3], 0 }
   0x3   :  { %12 = vsyncpa [#allocation3 + $0x1], 0  ;;  %s2616_s12 = smov 0   ;;  %s2618_s13 = smov 0  }
   0x4   :  { %s2620_s14 = smov 0   ;;  %s2622_s15 = smov 0  }
   0x5 LB: > { %s2635_s16 = sadd.s32 4294967295, %s2587_s15   ;;  %s2638_s17 = sadd.s32 1, %s2587_s15   ;;  %s2587_s15 = sphi %s2622_s15, %s4740_s15   ;;  %s2583_s14 = sphi %s2620_s14, %s4739_s14   ;;  %s2579_s13 = sphi %s2618_s13, %s4738_s13   ;;  %s2575_s12 = sphi %s2616_s12, %s4737_s12  }
   0x6   : > { %s64_s18 = ssub.s32 %s2587_s15, %s2638_s17  ;;  %s67_s19 = sadd.s32 1, %s2583_s14 }
   0x7   : > { %p65_p0 = scmp.eq.s32.totalorder %s64_s18, 0  ;;  %p74_p1 = scmp.ne.s32.totalorder %s2583_s14, %s2579_s13 }
   0x8   : > { %p75_p2 = scmp.eq.s32.totalorder %s2587_s15, 0  ;;  %p80_p3 = scmp.ne.s32.totalorder %s2579_s13, %s2575_s12 }
   0x9   : > { %s2648_s20 = scalar_select %p65_p0, %s2583_s14, %s67_s19  }
   0xa   : > { %p76_p4 = por %p75_p2, %p74_p1  ;;  %p4506_p5 = scmp.eq.s32.totalorder %s2635_s16, 0 }
   0xb   : > { %p2260_p6 = scmp.ge.s32.totalorder %s2587_s15, 1  ;;  %p117_p7 = scmp.lt.s32.totalorder %s2587_s15, 3 }
   0xc   : > { %p2655_p8 = por %p4506_p5, %p80_p3  ;;  %p2440_p10 = scmp.lt.s32.totalorder %s2587_s15, 2 }
   0xd   : > { %p2659_p9 = pnand %p2260_p6, %p117_p7  ;;  %s139_s25 = sshll.u32 %s4503_s1, 4  ;;  %s140_s25 = int_to_ptr.vmem [resolvable:$true] %s139_s25 }
   0xe   : > { %s4516_s21 = scalar_select %p2655_p8, 1, 0 }
   0xf   : > { %p2427_p11 = pneg %p2659_p9  ;;  %p2669_p12 = pnand %p2440_p10, %p76_p4 }
  0x10   : > { %s150_s28 = sand.u32 1, %s2583_s14   ;;  %s2487_s4 = scalar_lea.hbm %s4502_s0, 32 }
  0x11   : > { %p2675_p13 = pnand %p2427_p11, %p4506_p5  ;;  %p2488_p0 = scmp.ne.s32.totalorder %s4502_s0, %s2487_s4 }
  0x12   : > { %p2494_p4 = scmp.lt.u32.totalorder %s2487_s4, %s4502_s0 }
  0x13   : > { %p2489_p1 = pneg %p2675_p13 }
  0x15   : > { %p2490_p2 = pnand %p2489_p1, %p2488_p0 }
  0x17   : > { %p2491_p3 = pneg %p2490_p2 }
  0x19   : > { %p2496_p6 = pnand %p2494_p4, %p2491_p3 }
  0x1b   : > { %2499 = shalt.err (!%p2496_p6)
}
  0x1c   : > { %s2589_s9 = smov [#allocation2]   ;;  %s2500_s12 = scalar_lea.vmem %s140_s25, 16 }
  0x1d   : > { %2430 = dma.hbm_to_smem (!%p2675_p13), %s4502_s0, 32, %s2589_s9, [#allocation4]  }
  0x1e   : > { %p2501_p7 = scmp.ne.s32.totalorder %s140_s25, %s2500_s12  ;;  %p2508_p5 = scmp.lt.s32.totalorder %s140_s25, %s140_s25 }
  0x1f   : > { %p2509_p0 = scmp.lt.s32.totalorder %s2500_s12, %s2500_s12 }
  0x20   : > { %p2503_p10 = pnand %p2501_p7, %p2489_p1 }
  0x21   : > { %p2510_p2 = por %p2509_p0, %p2508_p5 }
  0x22   : > { %p2504_p11 = pneg %p2503_p10 }
  0x24   : > { %p2511_p8 = pnand %p2510_p2, %p2504_p11 }
  0x26   : > { %2514 = shalt.err (!%p2511_p8)
}
  0x27   : > { %s2590_s18 = smov [#allocation6]   ;;  %s2413_s19 = smul.u32 48, %s150_s28 }
  0x28   : > { %2433 = dma.vmem_to_smem (!%p2675_p13), %s140_s25, 16, %s2590_s18, [#allocation5]  }
  0x29   : > { %s2414_s23 = smul.u32 768, %s2587_s15  ;;  %s154_s4 = scalar_lea.vmem [#allocation7], %s2413_s19 }
  0x2a   : > { %s161_s5 = sshll.u32 %s154_s4, 4  ;;  %s2706_s27 = scalar_lea.sflag [#allocation3], %s150_s28  ;;  %s2704_s5 = int_to_ptr.vmem [resolvable:$true] %s161_s5 }
  0x2b   : > { %s2702_s30 = scalar_lea.hbm %s4504_s2, %s2414_s23  ;;  %p2517_p8 = pneg %p2669_p12 }
  0x2c   : > { %s2515_s6 = scalar_lea.hbm %s2702_s30, 768  ;;  %s2520_s7 = scalar_lea.hbm %s4504_s2, 1536 }
  0x2d   : > { %p2516_p5 = scmp.ne.s32.totalorder %s2702_s30, %s2515_s6  ;;  %p2521_p3 = scmp.lt.u32.totalorder %s2702_s30, %s4504_s2 }
  0x2e   : > { %p2522_p4 = scmp.lt.u32.totalorder %s2520_s7, %s2515_s6  ;;  %p2524_p7 = scmp.lt.u32.totalorder %s2515_s6, %s2702_s30 }
  0x2f   : > { %p2518_p13 = pnand %p2517_p8, %p2516_p5 }
  0x30   : > { %p2523_p6 = por %p2522_p4, %p2521_p3 }
  0x31   : > { %p2519_p1 = pneg %p2518_p13 }
  0x32   : > { %p2525_p10 = por %p2524_p7, %p2523_p6 }
  0x34   : > { %p2526_p11 = pnand %p2525_p10, %p2519_p1 }
  0x36   : > { %2529 = shalt.err (!%p2526_p11)
}
  0x37   : > { %s2530_s28 = scalar_lea.vmem %s2704_s5, 768  ;;  %s2591_s10 = smov [#allocation7]  }
  0x38   : > { %p2531_p0 = scmp.ne.s32.totalorder %s2704_s5, %s2530_s28  ;;  %s2535_s11 = sshll.u32 %s2591_s10, 4  ;;  %s2536_s11 = int_to_ptr.vmem [resolvable:$false] %s2535_s11 }
  0x39   : > { %s2537_s12 = scalar_lea.vmem %s2536_s11, 1536  ;;  %p2538_p13 = scmp.lt.s32.totalorder %s2704_s5, %s2536_s11 }
  0x3a   : > { %p2533_p2 = pnand %p2531_p0, %p2517_p8  ;;  %p2539_p3 = scmp.lt.s32.totalorder %s2537_s12, %s2530_s28 }
  0x3c   : > { %p2534_p5 = pneg %p2533_p2  ;;  %p2540_p4 = por %p2539_p3, %p2538_p13 }
  0x3e   : > { %p2541_p6 = pnand %p2540_p4, %p2534_p5 }
  0x40   : > { %2544 = shalt.err (!%p2541_p6)
}
  0x41   : > { %s2592_s18 = smov 128   ;;  %s2593_s19 = smov 8  }
  0x42   : > { %2437 = dma.hbm_to_vmem [thread:$0]  (!%p2669_p12), %s2702_s30, 768, %s2704_s5, %s2706_s27, %s2592_s18, %s2592_s18, %s2593_s19  }
  0x43   : > { %173 = sbr.rel (%p2659_p9) target bundleno = 579 (0x243), region = 32 }
  0x4a   : > { %p4520_p8 = scmp.eq.s32.totalorder %s2635_s16, 0 }
  0x4c   : > { %2562 = dma.done.wait (%p4520_p8), [#allocation4], 32   ;;  %p4521_p1 = pmov %p4520_p8 }
  0x4e   : > { %2564 = vsyncadd (%p4521_p1), [#allocation4], 4294967264  ;;  %p4522_p7 = pmov %p4521_p1 }
  0x4f   : > { %p4523_p10 = pmov %p4521_p1 }
  0x50   : > { %2566 = dma.done.wait (%p4522_p7), [#allocation5], 16  }
  0x51   : > { %2568 = vsyncadd (%p4523_p10), [#allocation5], 4294967280  ;;  %s183_s23 = sand.u32 1, %s2579_s13   ;;  %p4524_p9 = scmp.ne.s32.totalorder %s4516_s21, 0 }
  0x52   : > { %s2415_s26 = smul.u32 48, %s183_s23  ;;  %s184_s24 = scalar_lea.sflag [#allocation3], %s183_s23 }
  0x54   : > { %s2745_s29 = scalar_lea.vmem [#allocation7], %s2415_s26 }
  0x55   : > { %2570 = dma.done.wait (%p4524_p9), %s184_s24, 768  }
  0x56   : > { %2572 = vsyncadd (%p4524_p9), %s184_s24, 4294966528 }
  0x57   : > { %192 = sfence }
  0x58   : > { %s2296_s22 = sld [smem:[#allocation2 + $0x1c]]  ;;  %s2269_s30 = sld [smem:[#allocation2 + $0x1]]  ;;  %v2752_v0 = vld [vmem:[%s2745_s29] sm:$0xff]  ;;  %v2755_v1 = vld [vmem:[%s2745_s29 + $0x8] sm:$0xff]  ;;  %vm523_vm0 = vcmask 1046528   ;;  %vm744_vm1 = vcmask 1045504  }
  0x59   : > { %s2323_s4 = sld [smem:[#allocation2 + $0x37]]  ;;  %s2350_s5 = sld [smem:[#allocation2 + $0x52]]  ;;  %vm2158_vm2 = vcmask 111616   ;;  %vm2156_vm3 = vcmask 113664  }
  0x5a   : > { %s2594_s21 = smov 127   ;;  %s2377_s27 = sld [smem:[#allocation2 + $0x6d]] }
  0x5b   : > { %s2270_s6 = sld [smem:[#allocation2 + $0x2]]  ;;  %s2297_s15 = sld [smem:[#allocation2 + $0x1d]] }
  0x5c   : > { %s2324_s25 = sld [smem:[#allocation2 + $0x38]]  ;;  %s2351_s7 = sld [smem:[#allocation2 + $0x53]] }
  0x5d   : > { %s2272_s8 = sld [smem:[#allocation2 + $0x4]]  ;;  %s2595_s9 = smov 126  }
  0x5e   : > { %v401_v2 = vstv %s2296_s22  ;;  %v388_v4 = vstv %s2269_s30  ;;  %s2378_s28 = sld [smem:[#allocation2 + $0x6e]]  ;;  %s2299_s10 = sld [smem:[#allocation2 + $0x1f]] }
  0x5f   : > { %v402_v3 = vmul.f32 %v401_v2, %v2752_v0  ;;  %v389_v5 = vmul.f32 %v388_v4, %v2752_v0  ;;  %v403_v6 = vmul.f32 %v401_v2, %v2755_v1  ;;  %v390_v7 = vmul.f32 %v388_v4, %v2755_v1  ;;  %s2326_s11 = sld [smem:[#allocation2 + $0x3a]]  ;;  %s2353_s12 = sld [smem:[#allocation2 + $0x55]] }
  0x60   : > { %v414_v8 = vstv %s2323_s4  ;;  %v427_v11 = vstv %s2350_s5  ;;  %v440_v14 = vstv %s2377_s27  ;;  %s2380_s18 = sld [smem:[#allocation2 + $0x70]]  ;;  %s2273_s19 = sld [smem:[#allocation2 + $0x5]] }
  0x61   : > { %406 = vrot.lane.b32.xlu1 %v402_v3, %s2594_s21  ;;  %393 = vrot.lane.b32.xlu0 %v389_v5, %s2594_s21  ;;  %v416_v9 = vmul.f32 %v414_v8, %v2755_v1  ;;  %v415_v10 = vmul.f32 %v414_v8, %v2752_v0  ;;  %v429_v12 = vmul.f32 %v427_v11, %v2755_v1  ;;  %v453_v17 = vstv %s2270_s6  ;;  %s2300_s23 = sld [smem:[#allocation2 + $0x20]]  ;;  %s2327_s26 = sld [smem:[#allocation2 + $0x3b]] }
  0x62   : > { %v428_v13 = vmul.f32 %v427_v11, %v2752_v0  ;;  %v442_v15 = vmul.f32 %v440_v14, %v2755_v1  ;;  %v441_v16 = vmul.f32 %v440_v14, %v2752_v0  ;;  %v455_v18 = vmul.f32 %v453_v17, %v2755_v1  ;;  %s2354_s24 = sld [smem:[#allocation2 + $0x56]]  ;;  %s2381_s22 = sld [smem:[#allocation2 + $0x71]] }
  0x63   : > { %v454_v19 = vmul.f32 %v453_v17, %v2752_v0  ;;  %v466_v20 = vstv %s2297_s15  ;;  %v479_v23 = vstv %s2324_s25  ;;  %v492_v26 = vstv %s2351_s7  ;;  %s2275_s30 = sld [smem:[#allocation2 + $0x7]]  ;;  %s2302_s4 = sld [smem:[#allocation2 + $0x22]] }
  0x64   : > { %v468_v21 = vmul.f32 %v466_v20, %v2755_v1  ;;  %v467_v22 = vmul.f32 %v466_v20, %v2752_v0  ;;  %v481_v24 = vmul.f32 %v479_v23, %v2755_v1  ;;  %v480_v25 = vmul.f32 %v479_v23, %v2752_v0  ;;  %s2329_s5 = sld [smem:[#allocation2 + $0x3d]]  ;;  %s2356_s27 = sld [smem:[#allocation2 + $0x58]] }
  0x65   : > { %408 = vrot.lane.b32.xlu1 %v403_v6, %s2594_s21  ;;  %395 = vrot.lane.b32.xlu0 %v390_v7, %s2594_s21  ;;  %v579_v27 = vstv %s2272_s8  ;;  %v494_v28 = vmul.f32 %v492_v26, %v2755_v1  ;;  %v493_v29 = vmul.f32 %v492_v26, %v2752_v0  ;;  %v505_v30 = vstv %s2378_s28  ;;  %s2848_s6 = sld [smem:[#allocation2 + $0x73]]  ;;  %s2276_s15 = sld [smem:[#allocation2 + $0x8]] }
  0x66   : > { %v580_v31 = vmul.f32 %v579_v27, %v2752_v0  ;;  %v581_v32 = vmul.f32 %v579_v27, %v2755_v1  ;;  %v595_v33 = vstv %s2299_s10  ;;  %v507_v34 = vmul.f32 %v505_v30, %v2755_v1  ;;  %s2303_s25 = sld [smem:[#allocation2 + $0x23]]  ;;  %s2330_s7 = sld [smem:[#allocation2 + $0x3e]] }
  0x67   : > { %v506_v35 = vmul.f32 %v505_v30, %v2752_v0  ;;  %v611_v36 = vstv %s2326_s11  ;;  %v596_v39 = vmul.f32 %v595_v33, %v2752_v0  ;;  %v597_v40 = vmul.f32 %v595_v33, %v2755_v1  ;;  %s2357_s8 = sld [smem:[#allocation2 + $0x59]]  ;;  %s2384_s28 = sld [smem:[#allocation2 + $0x74]] }
  0x68   : > { %v585_v37 = vrot.slane %v581_v32, 1  ;;  %v584_v38 = vrot.slane %v580_v31, 1  ;;  %v612_v41 = vmul.f32 %v611_v36, %v2752_v0  ;;  %v613_v42 = vmul.f32 %v611_v36, %v2755_v1  ;;  %s2278_s10 = sld [smem:[#allocation2 + $0xa]]  ;;  %s2305_s11 = sld [smem:[#allocation2 + $0x25]] }
  0x69   : > { %421 = vrot.lane.b32.xlu1 %v416_v9, %s2594_s21  ;;  %419 = vrot.lane.b32.xlu0 %v415_v10, %s2594_s21  ;;  %v601_v44 = vrot.slane %v597_v40, 1  ;;  %v600_v45 = vrot.slane %v596_v39, 1  ;;  %v627_v46 = vstv %s2353_s12  ;;  %v643_v52 = vstv %s2380_s18  ;;  %s2332_s12 = sld [smem:[#allocation2 + $0x40]]  ;;  %s2359_s18 = sld [smem:[#allocation2 + $0x5b]] }
  0x6a   : > { %v586_v43 = vsel %vm523_vm0, %v584_v38, %v585_v37  ;;  %v617_v47 = vrot.slane %v613_v42, 1  ;;  %v616_v48 = vrot.slane %v612_v41, 1  ;;  %v628_v50 = vmul.f32 %v627_v46, %v2752_v0  ;;  %p211_p12 = scmp.lt.s32.totalorder %s2635_s16, 1 }
  0x6b   : > { %v602_v49 = vsel %vm523_vm0, %v600_v45, %v601_v44  ;;  %v629_v51 = vmul.f32 %v627_v46, %v2755_v1  ;;  %v644_v54 = vmul.f32 %v643_v52, %v2752_v0  ;;  %v645_v57 = vmul.f32 %v643_v52, %v2755_v1 }
  0x6c   : > { %v618_v53 = vsel %vm523_vm0, %v616_v48, %v617_v47  ;;  %v632_v56 = vrot.slane %v628_v50, 1  ;;  %v659_v58 = vstv %s2273_s19  ;;  %v675_v2 = vstv %s2300_s23  ;;  %s2386_s19 = sld [smem:[#allocation2 + $0x76]]  ;;  %s2279_s23 = sld [smem:[#allocation2 + $0xb]] }
  0x6d   : > { %434 = vrot.lane.b32.xlu1 %v429_v12, %s2594_s21  ;;  %432 = vrot.lane.b32.xlu0 %v428_v13, %s2594_s21  ;;  %v633_v55 = vrot.slane %v629_v51, 1  ;;  %v660_v59 = vmul.f32 %v659_v58, %v2752_v0  ;;  %v649_v61 = vrot.slane %v645_v57, 1  ;;  %v648_v62 = vrot.slane %v644_v54, 1  ;;  %s4742_s16 = smov (!%p211_p12, %s2635_s16), 1 }
  0x6e   : > { %v661_v63 = vmul.f32 %v659_v58, %v2755_v1  ;;  %v691_v4 = vstv %s2327_s26  ;;  %v676_v7 = vmul.f32 %v675_v2, %v2752_v0  ;;  %v677_v8 = vmul.f32 %v675_v2, %v2755_v1  ;;  %s2306_s26 = sld [smem:[#allocation2 + $0x26]] }
  0x6f   : > { %v634_v60 = vsel %vm523_vm0, %v632_v56, %v633_v55  ;;  %v664_v3 = vrot.slane %v660_v59, 1  ;;  %v650_v5 = vsel %vm523_vm0, %v648_v62, %v649_v61  ;;  %v693_v9 = vmul.f32 %v691_v4, %v2755_v1 }
  0x70   : > { %v665_v6 = vrot.slane %v661_v63, 1  ;;  %v681_v11 = vrot.slane %v677_v8, 1  ;;  %v680_v12 = vrot.slane %v676_v7, 1  ;;  %v692_v13 = vmul.f32 %v691_v4, %v2752_v0 }
  0x71   : > { %447 = vrot.lane.b32.xlu1 %v442_v15, %s2594_s21  ;;  %445 = vrot.lane.b32.xlu0 %v441_v16, %s2594_s21  ;;  %v707_v14 = vstv %s2354_s24  ;;  %v697_v15 = vrot.slane %v693_v9, 1  ;;  %v723_v16 = vstv %s2381_s22  ;;  %s2333_s24 = sld [smem:[#allocation2 + $0x41]]  ;;  %s2360_s22 = sld [smem:[#allocation2 + $0x5c]] }
  0x72   : > { %v666_v10 = vsel %vm523_vm0, %v664_v3, %v665_v6  ;;  %v682_v17 = vsel %vm523_vm0, %v680_v12, %v681_v11  ;;  %v709_v20 = vmul.f32 %v707_v14, %v2755_v1  ;;  %v800_v26 = vstv %s2275_s30  ;;  %s2281_s30 = sld [smem:[#allocation2 + $0xd]] }
  0x73   : > { %v801_v31 = vmul.f32 %v800_v26, %v2752_v0  ;;  %v802_v32 = vmul.f32 %v800_v26, %v2755_v1  ;;  %v832_v38 = vstv %s2329_s5  ;;  %v864_v46 = vstv %s2848_s6  ;;  %s2308_s5 = sld [smem:[#allocation2 + $0x28]]  ;;  %s2984_s6 = sld [smem:[#allocation2 + $0x5e]] }
  0x74   : > { %v713_v23 = vrot.slane %v709_v20, 1  ;;  %v833_v39 = vmul.f32 %v832_v38, %v2752_v0  ;;  %v865_v51 = vmul.f32 %v864_v46, %v2752_v0  ;;  %v880_v52 = vstv %s2276_s15  ;;  %s2995_s15 = sld [smem:[#allocation2 + $0x79]] }
  0x75   : > { %460 = vrot.lane.b32.xlu1 %v455_v18, %s2595_s9  ;;  %458 = vrot.lane.b32.xlu0 %v454_v19, %s2595_s9  ;;  %v696_v18 = vrot.slane %v692_v13, 1  ;;  %v708_v19 = vmul.f32 %v707_v14, %v2752_v0  ;;  %v806_v36 = vrot.slane %v802_v32, 2  ;;  %v866_v56 = vmul.f32 %v864_v46, %v2755_v1 }
  0x76   : > { %v837_v45 = vrot.slane %v833_v39, 2  ;;  %v881_v57 = vmul.f32 %v880_v52, %v2752_v0  ;;  %v882_v58 = vmul.f32 %v880_v52, %v2755_v1  ;;  %v896_v62 = vstv %s2303_s25  ;;  %s3009_s25 = sld [smem:[#allocation2 + $0xe]] }
  0x77   : > { %v897_v4 = vmul.f32 %v896_v62, %v2752_v0  ;;  %v928_v12 = vstv %s2357_s8  ;;  %s3030_s8 = sld [smem:[#allocation2 + $0x44]] }
  0x78   : > { %v886_v63 = vrot.slane %v882_v58, 2  ;;  %v885_v2 = vrot.slane %v881_v57, 2 }
  0x79   : > { %473 = vrot.lane.b32.xlu1 %v468_v21, %s2595_s9  ;;  %471 = vrot.lane.b32.xlu0 %v467_v22, %s2595_s9  ;;  %v725_v21 = vmul.f32 %v723_v16, %v2755_v1  ;;  %v698_v22 = vsel %vm523_vm0, %v696_v18, %v697_v15  ;;  %v944_v18 = vstv %s2384_s28  ;;  %s3043_s28 = sld [smem:[#allocation2 + $0x5f]] }
  0x7a   : > { %v887_v9 = vsel %vm744_vm1, %v885_v2, %v886_v63 }
  0x7b   : > { %v729_v27 = vrot.slane %v725_v21, 1 }
  0x7d   : > { %486 = vrot.lane.b32.xlu1 %v481_v24, %s2595_s9  ;;  %484 = vrot.lane.b32.xlu0 %v480_v25, %s2595_s9  ;;  %v712_v24 = vrot.slane %v708_v19, 1  ;;  %v724_v25 = vmul.f32 %v723_v16, %v2752_v0  ;;  %v929_v16 = vmul.f32 %v928_v12, %v2752_v0 }
  0x7f   : > { %v728_v30 = vrot.slane %v724_v25, 1  ;;  %v933_v21 = vrot.slane %v929_v16, 2 }
  0x81   : > { %499 = vrot.lane.b32.xlu1 %v494_v28, %s2595_s9  ;;  %497 = vrot.lane.b32.xlu0 %v493_v29, %s2595_s9  ;;  %v816_v28 = vstv %s2302_s4  ;;  %v714_v29 = vsel %vm523_vm0, %v712_v24, %v713_v23  ;;  %s2387_s4 = sld [smem:[#allocation2 + $0x77]] }
  0x82   : > { %v817_v33 = vmul.f32 %v816_v28, %v2752_v0 }
  0x84   : > { %v821_v42 = vrot.slane %v817_v33, 2 }
  0x85   : > { %512 = vrot.lane.b32.xlu1 %v507_v34, %s2595_s9  ;;  %510 = vrot.lane.b32.xlu0 %v506_v35, %s2595_s9  ;;  %v818_v34 = vmul.f32 %v816_v28, %v2755_v1  ;;  %v730_v35 = vsel %vm523_vm0, %v728_v30, %v729_v27  ;;  %v988_v28 = vstv %s2278_s10  ;;  %s2390_s10 = sld [smem:[#allocation2 + $0x7a]] }
  0x87   : > { %v822_v41 = vrot.slane %v818_v34, 2 }
  0x89   : > { %589 = vrot.lane.b32.xlu1 %v585_v37, %s2594_s21  ;;  %587 = vrot.lane.b32.xlu0 %v586_v43, %s2594_s21  ;;  %v805_v37 = vrot.slane %v801_v31, 2  ;;  %v834_v43 = vmul.f32 %v832_v38, %v2755_v1  ;;  %v2904_v31 = vld [vmem:[%s2745_s29 + $0x10] sm:$0xff] }
  0x8a   : > { %v989_v34 = vmul.f32 %v2904_v31, %v988_v28 }
  0x8b   : > { %v807_v40 = vsel %vm744_vm1, %v805_v37, %v806_v36  ;;  %v838_v48 = vrot.slane %v834_v43, 2 }
  0x8d   : > { %605 = vrot.lane.b32.xlu1 %v601_v44, %s2594_s21  ;;  %603 = vrot.lane.b32.xlu0 %v602_v49, %s2594_s21  ;;  %v848_v44 = vstv %s2356_s27  ;;  %s2970_s27 = sld [smem:[#allocation2 + $0x43]] }
  0x8e   : > { %v849_v49 = vmul.f32 %v848_v44, %v2752_v0  ;;  %v850_v50 = vmul.f32 %v848_v44, %v2755_v1 }
  0x90   : > { %v854_v54 = vrot.slane %v850_v50, 2  ;;  %v1040_v50 = vstv %s2386_s19  ;;  %s3097_s19 = sld [smem:[#allocation2 + $0x61]] }
  0x91   : > { %621 = vrot.lane.b32.xlu1 %v617_v47, %s2594_s21  ;;  %619 = vrot.lane.b32.xlu0 %v618_v53, %s2594_s21  ;;  %v823_v47 = vsel %vm744_vm1, %v821_v42, %v822_v41  ;;  %v839_v53 = vsel %vm744_vm1, %v837_v45, %v838_v48  ;;  %v1027_v45 = vstv %s2359_s18  ;;  %s2338_s18 = sld [smem:[#allocation2 + $0x46]] }
  0x95   : > { %637 = vrot.lane.b32.xlu1 %v633_v55, %s2594_s21  ;;  %635 = vrot.lane.b32.xlu0 %v634_v60, %s2594_s21  ;;  %v853_v55 = vrot.slane %v849_v49, 2  ;;  %v870_v60 = vrot.slane %v866_v56, 2  ;;  %v1028_v49 = vmul.f32 %v2904_v31, %v1027_v45 }
  0x97   : > { %v855_v59 = vsel %vm744_vm1, %v853_v55, %v854_v54  ;;  %v1053_v55 = vstv %s2279_s23  ;;  %s3106_s23 = sld [smem:[#allocation2 + $0x7c]] }
  0x99   : > { %653 = vrot.lane.b32.xlu1 %v649_v61, %s2594_s21  ;;  %651 = vrot.lane.b32.xlu0 %v650_v5, %s2594_s21  ;;  %v869_v61 = vrot.slane %v865_v51, 2  ;;  %v898_v5 = vmul.f32 %v896_v62, %v2755_v1 }
  0x9b   : > { %v871_v3 = vsel %vm744_vm1, %v869_v61, %v870_v60 }
  0x9d   : > { %669 = vrot.lane.b32.xlu1 %v665_v6, %s2595_s9  ;;  %667 = vrot.lane.b32.xlu0 %v666_v10, %s2595_s9  ;;  %v912_v6 = vstv %s2330_s7  ;;  %v902_v10 = vrot.slane %v898_v5, 2  ;;  %s3014_s7 = sld [smem:[#allocation2 + $0x29]] }
  0x9e   : > { %v913_v7 = vmul.f32 %v912_v6, %v2752_v0  ;;  %v914_v8 = vmul.f32 %v912_v6, %v2755_v1 }
  0xa0   : > { %v918_v13 = vrot.slane %v914_v8, 2  ;;  %v917_v14 = vrot.slane %v913_v7, 2  ;;  %v1092_v8 = vstv %s2360_s22  ;;  %s3124_s22 = sld [smem:[#allocation2]] }
  0xa1   : > { %685 = vrot.lane.b32.xlu1 %v681_v11, %s2595_s9  ;;  %683 = vrot.lane.b32.xlu0 %v682_v17, %s2595_s9  ;;  %v901_v11 = vrot.slane %v897_v4, 2  ;;  %v930_v17 = vmul.f32 %v928_v12, %v2755_v1 }
  0xa2   : > { %v919_v19 = vsel %vm744_vm1, %v917_v14, %v918_v13  ;;  %v1105_v14 = vstv %s2387_s4  ;;  %s3129_s4 = sld [smem:[#allocation2 + $0x36]] }
  0xa3   : > { %v934_v20 = vrot.slane %v930_v17, 2 }
  0xa5   : > { %701 = vrot.lane.b32.xlu1 %v697_v15, %s2595_s9  ;;  %699 = vrot.lane.b32.xlu0 %v698_v22, %s2595_s9  ;;  %v903_v15 = vsel %vm744_vm1, %v901_v11, %v902_v10  ;;  %v945_v22 = vmul.f32 %v944_v18, %v2752_v0  ;;  %v935_v24 = vsel %vm744_vm1, %v933_v21, %v934_v20  ;;  %v1178_v11 = vstv %s2281_s30  ;;  %s3127_s30 = sld [smem:[#allocation6 + $0x1]] }
  0xa6   : > { %v1179_v16 = vmul.f32 %v2904_v31, %v1178_v11  ;;  %v1106_v21 = vmul.f32 %v2904_v31, %v1105_v14 }
  0xa7   : > { %v949_v26 = vrot.slane %v945_v22, 2 }
  0xa9   : > { %717 = vrot.lane.b32.xlu1 %v713_v23, %s2595_s9  ;;  %715 = vrot.lane.b32.xlu0 %v714_v29, %s2595_s9  ;;  %v946_v23 = vmul.f32 %v944_v18, %v2755_v1  ;;  %v1194_v18 = vstv %s2308_s5  ;;  %s3132_s5 = sld [smem:[#allocation2 + $0x51]] }
  0xaa   : > { %v1195_v22 = vmul.f32 %v2904_v31, %v1194_v18 }
  0xab   : > { %v950_v25 = vrot.slane %v946_v23, 2 }
  0xad   : > { %733 = vrot.lane.b32.xlu1 %v729_v27, %s2595_s9  ;;  %731 = vrot.lane.b32.xlu0 %v730_v35, %s2595_s9  ;;  %v2898_v27 = vld [vmem:[%s2745_s29 + $0x18] sm:$0xff]  ;;  %v951_v30 = vsel %vm744_vm1, %v949_v26, %v950_v25  ;;  %v1001_v35 = vstv %s2305_s11  ;;  %v1183_v26 = vrot.slane %v1179_v16, 1  ;;  %s3065_s11 = sld [smem:[#allocation2 + $0x10]] }
  0xae   : > { %v990_v33 = vmul.f32 %v2898_v27, %v988_v28  ;;  %v1003_v38 = vmul.f32 %v2898_v27, %v1001_v35  ;;  %v1002_v39 = vmul.f32 %v2904_v31, %v1001_v35  ;;  %v1055_v58 = vmul.f32 %v2898_v27, %v1053_v55 }
  0xaf   : > { %v1094_v12 = vmul.f32 %v2898_v27, %v1092_v8  ;;  %v1180_v17 = vmul.f32 %v2898_v27, %v1178_v11  ;;  %v1196_v23 = vmul.f32 %v2898_v27, %v1194_v18  ;;  %v1210_v28 = vstv %s2970_s27  ;;  %s3140_s27 = sld [smem:[#allocation6]] }
  0xb0   : > { %v1212_v35 = vmul.f32 %v2898_v27, %v1210_v28 }
  0xb1   : > { %810 = vrot.lane.b32.xlu1 %v806_v36, %s2594_s21  ;;  %808 = vrot.lane.b32.xlu0 %v807_v40, %s2594_s21  ;;  %v1014_v40 = vstv %s2332_s12  ;;  %s2311_s12 = sld [smem:[#allocation2 + $0x2b]] }
  0xb2   : > { %v1016_v43 = vmul.f32 %v2898_v27, %v1014_v40  ;;  %v1015_v44 = vmul.f32 %v2904_v31, %v1014_v40  ;;  %v1211_v40 = vmul.f32 %v2904_v31, %v1210_v28 }
  0xb5   : > { %826 = vrot.lane.b32.xlu1 %v822_v41, %s2594_s21  ;;  %824 = vrot.lane.b32.xlu0 %v823_v47, %s2594_s21 }
  0xb9   : > { %842 = vrot.lane.b32.xlu1 %v838_v48, %s2594_s21  ;;  %840 = vrot.lane.b32.xlu0 %v839_v53, %s2594_s21  ;;  %v1029_v48 = vmul.f32 %v2898_v27, %v1027_v45  ;;  %v1042_v53 = vmul.f32 %v2898_v27, %v1040_v50 }
  0xbd   : > { %858 = vrot.lane.b32.xlu1 %v854_v54, %s2594_s21  ;;  %856 = vrot.lane.b32.xlu0 %v855_v59, %s2594_s21  ;;  %v1041_v54 = vmul.f32 %v2904_v31, %v1040_v50  ;;  %v1054_v59 = vmul.f32 %v2904_v31, %v1053_v55  ;;  %v1215_v50 = vrot.slane %v1211_v40, 1  ;;  %v1242_v55 = vstv %s2995_s15  ;;  %s3148_s15 = sld [smem:[#allocation6 + $0x2]] }
  0xc1   : > { %874 = vrot.lane.b32.xlu1 %v870_v60, %s2594_s21  ;;  %872 = vrot.lane.b32.xlu0 %v871_v3, %s2594_s21  ;;  %v1066_v60 = vstv %s2306_s26  ;;  %v1079_v3 = vstv %s2333_s24  ;;  %s3111_s26 = sld [smem:[#allocation2 + $0x1b]]  ;;  %s3119_s24 = sld [smem:[#allocation2 + $0x11]] }
  0xc2   : > { %v1067_v2 = vmul.f32 %v2904_v31, %v1066_v60  ;;  %v1081_v6 = vmul.f32 %v2898_v27, %v1079_v3  ;;  %v1080_v7 = vmul.f32 %v2904_v31, %v1079_v3 }
  0xc5   : > { %890 = vrot.lane.b32.xlu1 %v886_v63, %s2595_s9  ;;  %888 = vrot.lane.b32.xlu0 %v887_v9, %s2595_s9  ;;  %v1068_v63 = vmul.f32 %v2898_v27, %v1066_v60 }
  0xc9   : > { %906 = vrot.lane.b32.xlu1 %v902_v10, %s2595_s9  ;;  %904 = vrot.lane.b32.xlu0 %v903_v15, %s2595_s9 }
  0xcd   : > { %922 = vrot.lane.b32.xlu1 %v918_v13, %s2595_s9  ;;  %920 = vrot.lane.b32.xlu0 %v919_v19, %s2595_s9  ;;  %v1093_v13 = vmul.f32 %v2904_v31, %v1092_v8  ;;  %v1258_v8 = vstv %s3009_s25  ;;  %s3159_s25 = sld [smem:[#allocation2 + $0x47]] }
  0xce   : > { %v1260_v18 = vmul.f32 %v2898_v27, %v1258_v8 }
  0xd1   : > { %938 = vrot.lane.b32.xlu1 %v934_v20, %s2595_s9  ;;  %936 = vrot.lane.b32.xlu0 %v935_v24, %s2595_s9  ;;  %v1107_v20 = vmul.f32 %v2898_v27, %v1105_v14 }
  0xd3   : > { %v2900_v29 = vpop.permute.xlu1 %406  ;;  %v2906_v32 = vpop.permute.xlu0 %393 }
  0xd5   : > { %954 = vrot.lane.b32.xlu1 %v950_v25, %s2595_s9  ;;  %952 = vrot.lane.b32.xlu0 %v951_v30, %s2595_s9  ;;  %v1184_v25 = vrot.slane %v1180_v17, 1  ;;  %v1259_v17 = vmul.f32 %v2904_v31, %v1258_v8 }
  0xd7   : > { %v2912_v36 = vpop.permute.xlu1 %408  ;;  %v2914_v37 = vpop.permute.xlu0 %395  ;;  %v1263_v28 = vrot.slane %v1259_v17, 1 }
  0xd9   : > { %995 = vrot.lane.b32.xlu1 %v990_v33, %s2594_s21  ;;  %993 = vrot.lane.b32.xlu0 %v989_v34, %s2594_s21  ;;  %v1200_v33 = vrot.slane %v1196_v23, 1  ;;  %v1199_v34 = vrot.slane %v1195_v22, 1 }
  0xdb   : > { %v2920_v41 = vpop.permute.xlu1 %421  ;;  %v2922_v42 = vpop.permute.xlu0 %419  ;;  %v1201_v45 = vsel %vm523_vm0, %v1199_v34, %v1200_v33 }
  0xdd   : > { %1008 = vrot.lane.b32.xlu1 %v1003_v38, %s2594_s21  ;;  %1006 = vrot.lane.b32.xlu0 %v1002_v39, %s2594_s21  ;;  %v1185_v39 = vsel %vm523_vm0, %v1183_v26, %v1184_v25  ;;  %v1264_v26 = vrot.slane %v1260_v18, 1 }
  0xdf   : > { %v2928_v46 = vpop.permute.xlu1 %434  ;;  %v2930_v47 = vpop.permute.xlu0 %432 }
  0xe1   : > { %1021 = vrot.lane.b32.xlu1 %v1016_v43, %s2594_s21  ;;  %1019 = vrot.lane.b32.xlu0 %v1015_v44, %s2594_s21  ;;  %v1226_v44 = vstv %s2984_s6  ;;  %s3144_s6 = sld [smem:[#allocation2 + $0x2c]] }
  0xe3   : > { %v2936_v51 = vpop.permute.xlu1 %447  ;;  %v2938_v52 = vpop.permute.xlu0 %445 }
  0xe5   : > { %1034 = vrot.lane.b32.xlu1 %v1029_v48, %s2594_s21  ;;  %1032 = vrot.lane.b32.xlu0 %v1028_v49, %s2594_s21  ;;  %v1216_v48 = vrot.slane %v1212_v35, 1 }
  0xe7   : > { %v2944_v56 = vpop.permute.xlu1 %460  ;;  %v2946_v57 = vpop.permute.xlu0 %458 }
  0xe9   : > { %1047 = vrot.lane.b32.xlu1 %v1042_v53, %s2594_s21  ;;  %1045 = vrot.lane.b32.xlu0 %v1041_v54, %s2594_s21  ;;  %v1227_v53 = vmul.f32 %v2904_v31, %v1226_v44  ;;  %v1228_v54 = vmul.f32 %v2898_v27, %v1226_v44  ;;  %v1265_v44 = vsel %vm523_vm0, %v1263_v28, %v1264_v26 }
  0xeb   : > { %v2952_v61 = vpop.permute.xlu1 %473  ;;  %v2954_v62 = vpop.permute.xlu0 %471  ;;  %v1231_v3 = vrot.slane %v1227_v53, 1 }
  0xed   : > { %1060 = vrot.lane.b32.xlu1 %v1055_v58, %s2595_s9  ;;  %1058 = vrot.lane.b32.xlu0 %v1054_v59, %s2595_s9  ;;  %v1244_v59 = vmul.f32 %v2898_v27, %v1242_v55 }
  0xef   : > { %v2960_v4 = vpop.permute.xlu1 %486  ;;  %v2962_v5 = vpop.permute.xlu0 %484  ;;  %v1248_v11 = vrot.slane %v1244_v59, 1 }
  0xf1   : > { %1073 = vrot.lane.b32.xlu1 %v1068_v63, %s2595_s9  ;;  %1071 = vrot.lane.b32.xlu0 %v1067_v2, %s2595_s9  ;;  %v1217_v63 = vsel %vm523_vm0, %v1215_v50, %v1216_v48  ;;  %v1232_v2 = vrot.slane %v1228_v54, 1  ;;  %v1306_v50 = vstv %s3043_s28  ;;  %s3170_s28 = sld [smem:[#allocation2 + $0x3]] }
  0xf3   : > { %v2968_v9 = vpop.permute.xlu1 %499  ;;  %v2972_v10 = vpop.permute.xlu0 %497  ;;  %v1233_v14 = vsel %vm523_vm0, %v1231_v3, %v1232_v2  ;;  %v1308_v3 = vmul.f32 %v2898_v27, %v1306_v50 }
  0xf4   : > { %4525 = vst [vmem:[#allocation11_spill] sm:$0xff] %v2972_v10 }
  0xf5   : > { %1086 = vrot.lane.b32.xlu1 %v1081_v6, %s2595_s9  ;;  %1084 = vrot.lane.b32.xlu0 %v1080_v7, %s2595_s9  ;;  %v1243_v6 = vmul.f32 %v2904_v31, %v1242_v55  ;;  %v1307_v55 = vmul.f32 %v2904_v31, %v1306_v50  ;;  %v1312_v17 = vrot.slane %v1308_v3, 1  ;;  %v1430_v3 = vstv %s2338_s18  ;;  %s3197_s18 = sld [smem:[#allocation2 + $0x62]] }
  0xf7   : > { %v2978_v15 = vpop.permute.xlu1 %512  ;;  %v2982_v19 = vpop.permute.xlu0 %510  ;;  %v1247_v16 = vrot.slane %v1243_v6, 1  ;;  %v1322_v6 = vstv %s2390_s10  ;;  %v1311_v18 = vrot.slane %v1307_v55, 1  ;;  %s3175_s10 = sld [smem:[#allocation2 + $0x6c]] }
  0xf8   : > { %4526 = vst [vmem:[#allocation12_spill] sm:$0xff] %v2978_v15  ;;  %4527 = vst [vmem:[#allocation13_spill] sm:$0xff] %v2982_v19 }
  0xf9   : > { %1099 = vrot.lane.b32.xlu1 %v1094_v12, %s2595_s9  ;;  %1097 = vrot.lane.b32.xlu0 %v1093_v13, %s2595_s9  ;;  %v1274_v12 = vstv %s3014_s7  ;;  %s3161_s7 = sld [smem:[#allocation6 + $0x3]] }
  0xfa   : > { %v1276_v22 = vmul.f32 %v2898_v27, %v1274_v12 }
  0xfb   : > { %v2992_v24 = vpop.permute.xlu1 %589  ;;  %v2997_v30 = vpop.permute.xlu0 %587 }
  0xfc   : > { %4528 = vst [vmem:[#allocation14_spill] sm:$0xff] %v2992_v24  ;;  %4529 = vst [vmem:[#allocation15_spill] sm:$0xff] %v2997_v30  ;;  %v1280_v35 = vrot.slane %v1276_v22, 1 }
  0xfd   : > { %1112 = vrot.lane.b32.xlu1 %v1107_v20, %s2595_s9  ;;  %1110 = vrot.lane.b32.xlu0 %v1106_v21, %s2595_s9  ;;  %v1275_v21 = vmul.f32 %v2904_v31, %v1274_v12  ;;  %v1323_v12 = vmul.f32 %v2904_v31, %v1322_v6 }
  0xff   : > { %v3002_v38 = vpop.permute.xlu1 %605  ;;  %v3006_v43 = vpop.permute.xlu0 %603 }
 0x100   : > { %4530 = vst [vmem:[#allocation16_spill] sm:$0xff] %v3002_v38  ;;  %4531 = vst [vmem:[#allocation17_spill] sm:$0xff] %v3006_v43 }
 0x101   : > { %1188 = vrot.lane.b32.xlu1 %v1184_v25, %s2594_s21  ;;  %1186 = vrot.lane.b32.xlu0 %v1185_v39, %s2594_s21  ;;  %v1249_v25 = vsel %vm523_vm0, %v1247_v16, %v1248_v11 }
 0x103   : > { %v3016_v49 = vpop.permute.xlu1 %621  ;;  %v3021_v58 = vpop.permute.xlu0 %619 }
 0x104   : > { %4532 = vst [vmem:[#allocation18_spill] sm:$0xff] %v3016_v49  ;;  %4533 = vst [vmem:[#allocation19_spill] sm:$0xff] %v3021_v58 }
 0x105   : > { %1204 = vrot.lane.b32.xlu1 %v1200_v33, %s2594_s21  ;;  %1202 = vrot.lane.b32.xlu0 %v1201_v45, %s2594_s21  ;;  %v1290_v33 = vstv %s3030_s8  ;;  %v1279_v45 = vrot.slane %v1275_v21, 1  ;;  %v1398_v21 = vstv %s3065_s11  ;;  %s3168_s8 = sld [smem:[#allocation6 + $0x4]]  ;;  %s3177_s11 = sld [smem:[#allocation2 + $0x1e]] }
 0x106   : > { %v1291_v39 = vmul.f32 %v2904_v31, %v1290_v33  ;;  %v1400_v28 = vmul.f32 %v2898_v27, %v1398_v21 }
 0x107   : > { %v3026_v60 = vpop.permute.xlu1 %637  ;;  %v3032_v7 = vpop.permute.xlu0 %635 }
 0x108   : > { %4534 = vst [vmem:[#allocation20_spill] sm:$0xff] %v3026_v60  ;;  %4535 = vst [vmem:[#allocation21_spill] sm:$0xff] %v3032_v7  ;;  %v1295_v54 = vrot.slane %v1291_v39, 1  ;;  %v1399_v39 = vmul.f32 %v2904_v31, %v1398_v21  ;;  %v1404_v50 = vrot.slane %v1400_v28, 2 }
 0x109   : > { %1220 = vrot.lane.b32.xlu1 %v1216_v48, %s2594_s21  ;;  %1218 = vrot.lane.b32.xlu0 %v1217_v63, %s2594_s21  ;;  %v1292_v48 = vmul.f32 %v2898_v27, %v1290_v33  ;;  %v1281_v63 = vsel %vm523_vm0, %v1279_v45, %v1280_v35  ;;  %v1414_v45 = vstv %s2311_s12  ;;  %s3192_s12 = sld [smem:[#allocation2 + $0x39]] }
 0x10a   : > { %v1403_v55 = vrot.slane %v1399_v39, 2 }
 0x10b   : > { %v3038_v13 = vpop.permute.xlu1 %653  ;;  %v3045_v20 = vpop.permute.xlu0 %651 }
 0x10c   : > { %4536 = vst [vmem:[#allocation22_spill] sm:$0xff] %v3038_v13  ;;  %4537 = vst [vmem:[#allocation23_spill] sm:$0xff] %v3045_v20  ;;  %v518_v20 = vstv %s3170_s28  ;;  %s3379_s28 = sld [smem:[#allocation2 + $0x5a]] }
 0x10d   : > { %1236 = vrot.lane.b32.xlu1 %v1232_v2, %s2594_s21  ;;  %1234 = vrot.lane.b32.xlu0 %v1233_v14, %s2594_s21  ;;  %v1296_v2 = vrot.slane %v1292_v48, 1 }
 0x10f   : > { %v3051_v23 = vpop.permute.xlu1 %669  ;;  %v3055_v34 = vpop.permute.xlu0 %667  ;;  %v1297_v16 = vsel %vm523_vm0, %v1295_v54, %v1296_v2 }
 0x110   : > { %4538 = vst [vmem:[#allocation24_spill] sm:$0xff] %v3051_v23  ;;  %4539 = vst [vmem:[#allocation25_spill] sm:$0xff] %v3055_v34  ;;  %v1510_v34 = vstv %s3159_s25  ;;  %s3368_s25 = sld [smem:[#allocation2 + $0x24]] }
 0x111   : > { %1252 = vrot.lane.b32.xlu1 %v1248_v11, %s2594_s21  ;;  %1250 = vrot.lane.b32.xlu0 %v1249_v25, %s2594_s21  ;;  %v1324_v11 = vmul.f32 %v2898_v27, %v1322_v6 }
 0x113   : > { %v3060_v40 = vpop.permute.xlu1 %685  ;;  %v3067_v53 = vpop.permute.xlu0 %683  ;;  %v1328_v25 = vrot.slane %v1324_v11, 1  ;;  %v1432_v11 = vmul.f32 %v2898_v27, %v1430_v3 }
 0x114   : > { %4540 = vst [vmem:[#allocation26_spill] sm:$0xff] %v3060_v40  ;;  %4541 = vst [vmem:[#allocation27_spill] sm:$0xff] %v3067_v53 }
 0x115   : > { %1268 = vrot.lane.b32.xlu1 %v1264_v26, %s2595_s9  ;;  %1266 = vrot.lane.b32.xlu0 %v1265_v44, %s2595_s9  ;;  %v1327_v26 = vrot.slane %v1323_v12, 1  ;;  %v1431_v12 = vmul.f32 %v2904_v31, %v1430_v3  ;;  %v1436_v28 = vrot.slane %v1432_v11, 2 }
 0x117   : > { %v3072_v59 = vpop.permute.xlu1 %701  ;;  %v3076_v8 = vpop.permute.xlu0 %699  ;;  %v1329_v48 = vsel %vm523_vm0, %v1327_v26, %v1328_v25 }
 0x118   : > { %4542 = vst [vmem:[#allocation28_spill] sm:$0xff] %v3072_v59  ;;  %4543 = vst [vmem:[#allocation29_spill] sm:$0xff] %v3076_v8  ;;  %v543_v8 = vstv %s3192_s12  ;;  %v1526_v59 = vstv %s3197_s18  ;;  %s3414_s12 = sld [smem:[#allocation2 + $0x27]]  ;;  %s3441_s18 = sld [smem:[#allocation2 + $0x64]] }
 0x119   : > { %1284 = vrot.lane.b32.xlu1 %v1280_v35, %s2595_s9  ;;  %1282 = vrot.lane.b32.xlu0 %v1281_v63, %s2595_s9  ;;  %v1313_v35 = vsel %vm523_vm0, %v1311_v18, %v1312_v17  ;;  %v1416_v63 = vmul.f32 %v2898_v27, %v1414_v45 }
 0x11b   : > { %v3082_v14 = vpop.permute.xlu1 %717  ;;  %v3086_v22 = vpop.permute.xlu0 %715  ;;  %v1420_v18 = vrot.slane %v1416_v63, 2 }
 0x11c   : > { %4544 = vst [vmem:[#allocation30_spill] sm:$0xff] %v3082_v14  ;;  %4545 = vst [vmem:[#allocation31_spill] sm:$0xff] %v3086_v22 }
 0x11d   : > { %1300 = vrot.lane.b32.xlu1 %v1296_v2, %s2595_s9  ;;  %1298 = vrot.lane.b32.xlu0 %v1297_v16, %s2595_s9  ;;  %v1415_v2 = vmul.f32 %v2904_v31, %v1414_v45 }
 0x11f   : > { %v3091_v33 = vpop.permute.xlu1 %733  ;;  %v3095_v44 = vpop.permute.xlu0 %731  ;;  %v1419_v21 = vrot.slane %v1415_v2, 2  ;;  %v368_v2 = vstv %s3111_s26  ;;  %s3240_s26 = sld [smem:[#allocation2 + $0x6f]] }
 0x120   : > { %4546 = vst [vmem:[#allocation32_spill] sm:$0xff] %v3091_v33  ;;  %4547 = vst [vmem:[#allocation33_spill] sm:$0xff] %v3095_v44  ;;  %v352_v44 = vstv %s3140_s27  ;;  %s3320_s27 = sld [smem:[#allocation2 + $0x13]] }
 0x121   : > { %1316 = vrot.lane.b32.xlu1 %v1312_v17, %s2595_s9  ;;  %1314 = vrot.lane.b32.xlu0 %v1313_v35, %s2595_s9  ;;  %v1405_v17 = vsel %vm744_vm1, %v1403_v55, %v1404_v50  ;;  %v1435_v35 = vrot.slane %v1431_v12, 2  ;;  %v1421_v45 = vsel %vm744_vm1, %v1419_v21, %v1420_v18  ;;  %v1462_v55 = vstv %s3106_s23  ;;  %s3232_s23 = sld [smem:[#allocation2 + $0x7d]] }
 0x122   : > { %v3153_v11 = vmul.f32 %v2898_v27, %v1462_v55 }
 0x123   : > { %v3102_v54 = vpop.permute.xlu1 %810  ;;  %v3108_v6 = vpop.permute.xlu0 %808  ;;  %v1437_v3 = vsel %vm744_vm1, %v1435_v35, %v1436_v28  ;;  %v369_v35 = vmul.f32 %v368_v2, %v2752_v0 }
 0x124   : > { %4548 = vst [vmem:[#allocation34_spill] sm:$0xff] %v3102_v54  ;;  %4549 = vst [vmem:[#allocation35_spill] sm:$0xff] %v3108_v6  ;;  %v1478_v6 = vstv %s3119_s24  ;;  %v370_v54 = vmul.f32 %v368_v2, %v2755_v1  ;;  %s3245_s24 = sld [smem:[#allocation2 + $0x6]] }
 0x125   : > { %1332 = vrot.lane.b32.xlu1 %v1328_v25, %s2595_s9  ;;  %1330 = vrot.lane.b32.xlu0 %v1329_v48, %s2595_s9  ;;  %v1446_v25 = vstv %s3097_s19  ;;  %v1479_v2 = vmul.f32 %v2904_v31, %v1478_v6  ;;  %s3211_s19 = sld [smem:[#allocation2 + $0x54]] }
 0x126   : > { %v1448_v48 = vmul.f32 %v2898_v27, %v1446_v25 }
 0x127   : > { %v3116_v16 = vpop.permute.xlu1 %826  ;;  %v3121_v26 = vpop.permute.xlu0 %824  ;;  %v1542_v7 = vstv %s3232_s23  ;;  %s3492_s23 = sld [smem:[#allocation2 + $0x7f]] }
 0x128   : > { %4550 = vst [vmem:[#allocation36_spill] sm:$0xff] %v3116_v16  ;;  %4551 = vst [vmem:[#allocation37_spill] sm:$0xff] %v3121_v26 }
 0x129   : > { %1408 = vrot.lane.b32.xlu1 %v1404_v50, %s2594_s21  ;;  %1406 = vrot.lane.b32.xlu0 %v1405_v17, %s2594_s21  ;;  %v1447_v50 = vmul.f32 %v2904_v31, %v1446_v25  ;;  %v1452_v17 = vrot.slane %v1448_v48, 2  ;;  %v1463_v25 = vmul.f32 %v2904_v31, %v1462_v55  ;;  %v354_v48 = vstv %s3127_s30  ;;  %s3276_s30 = sld [smem:[#allocation2 + $0x3c]] }
 0x12a   : > { %v3181_v55 = vmul.f32 %v2898_v27, %v1478_v6  ;;  %v1494_v6 = vstv %s3144_s6  ;;  %v3199_v14 = vadd.f32 %v369_v35, %v354_v48  ;;  %v739_v60 = vstv %s3245_s24  ;;  %s3348_s6 = sld [smem:[#allocation2 + $0x2e]]  ;;  %s3515_s24 = sld [smem:[#allocation2 + $0x14]] }
 0x12b   : > { %v3134_v39 = vpop.permute.xlu1 %842  ;;  %v3142_v63 = vpop.permute.xlu0 %840  ;;  %v1451_v21 = vrot.slane %v1447_v50, 2  ;;  %v373_v50 = vstv %s3129_s4  ;;  %s3278_s4 = sld [smem:[#allocation2 + $0x57]] }
 0x12c   : > { %4552 = vst [vmem:[#allocation38_spill] sm:$0xff] %v3134_v39  ;;  %4553 = vst [vmem:[#allocation39_spill] sm:$0xff] %v3142_v63  ;;  %v1468_v63 = vrot.slane %v3153_v11, 2  ;;  %v1467_v39 = vrot.slane %v1463_v25, 2  ;;  %v3204_v11 = vld [vmem:[%s2745_s29 + $0x8] sm:$0xff]  ;;  %v3208_v25 = vld [vmem:[%s2745_s29] sm:$0xff] }
 0x12d   : > { %1424 = vrot.lane.b32.xlu1 %v1420_v18, %s2594_s21  ;;  %1422 = vrot.lane.b32.xlu0 %v1421_v45, %s2594_s21  ;;  %v363_v45 = vstv %s3124_s22  ;;  %s3247_s22 = sld [smem:[#allocation2 + $0x21]]  ;;  %v3267_v13 = vmul.f32 %v3208_v25, %v518_v20 }
 0x12e   : > { %v364_v33 = vmul.f32 %v363_v45, %v2752_v0  ;;  %v374_v0 = vmul.f32 %v3208_v25, %v373_v50 }
 0x12f   : > { %v3155_v12 = vpop.permute.xlu1 %858  ;;  %v3163_v18 = vpop.permute.xlu0 %856 }
 0x130   : > { %4554 = vst [vmem:[#allocation40_spill] sm:$0xff] %v3155_v12  ;;  %4555 = vst [vmem:[#allocation41_spill] sm:$0xff] %v3163_v18  ;;  %v378_v18 = vstv %s3132_s5  ;;  %v3224_v26 = vadd.f32 %v364_v33, %v352_v44  ;;  %v383_v33 = vstv %s3175_s10  ;;  %s3287_s5 = sld [smem:[#allocation2 + $0x72]]  ;;  %s3396_s10 = sld [smem:[#allocation2 + $0x49]] }
 0x131   : > { %1440 = vrot.lane.b32.xlu1 %v1436_v28, %s2594_s21  ;;  %1438 = vrot.lane.b32.xlu0 %v1437_v3, %s2594_s21  ;;  %v1453_v28 = vsel %vm744_vm1, %v1451_v21, %v1452_v17  ;;  %v365_v3 = vmul.f32 %v363_v45, %v2755_v1  ;;  %v375_v21 = vmul.f32 %v3204_v11, %v373_v50  ;;  %v356_v1 = vstv %s3148_s15  ;;  %s3356_s15 = sld [smem:[#allocation2 + $0x9]] }
 0x132   : > { %v380_v35 = vmul.f32 %v3204_v11, %v378_v18  ;;  %v1483_v45 = vrot.slane %v1479_v2, 2  ;;  %v1496_v50 = vmul.f32 %v2898_v27, %v1494_v6 }
 0x133   : > { %v3185_v12 = vpop.permute.xlu1 %874  ;;  %v3194_v22 = vpop.permute.xlu0 %872  ;;  %v3226_v23 = vadd.f32 %v365_v3, %v352_v44  ;;  %v3234_v2 = vadd.f32 %v375_v21, %v356_v1  ;;  %v531_v44 = vstv %s3177_s11  ;;  %v1511_v3 = vmul.f32 %v2904_v31, %v1510_v34  ;;  %s3398_s11 = sld [smem:[#allocation2 + $0xc]] }
 0x134   : > { %4556 = vst [vmem:[#allocation42_spill] sm:$0xff] %v3185_v12  ;;  %4557 = vst [vmem:[#allocation43_spill] sm:$0xff] %v3194_v22  ;;  %v3201_v12 = vadd.f32 %v370_v54, %v354_v48  ;;  %v1484_v54 = vrot.slane %v3181_v55, 2  ;;  %v1469_v22 = vsel %vm744_vm1, %v1467_v39, %v1468_v63  ;;  %v379_v55 = vmul.f32 %v3208_v25, %v378_v18 }
 0x135   : > { %1456 = vrot.lane.b32.xlu1 %v1452_v17, %s2594_s21  ;;  %1454 = vrot.lane.b32.xlu0 %v1453_v28, %s2594_s21  ;;  %v1495_v17 = vmul.f32 %v2904_v31, %v1494_v6  ;;  %v358_v28 = vstv %s3161_s7  ;;  %v3236_v39 = vadd.f32 %v374_v0, %v356_v1  ;;  %v1512_v18 = vmul.f32 %v2898_v27, %v1510_v34  ;;  %s3377_s7 = sld [smem:[#allocation2 + $0x3f]] }
 0x136   : > { %v3252_v6 = vadd.f32 %v380_v35, %v358_v28  ;;  %v1500_v0 = vrot.slane %v1496_v50, 2  ;;  %v3270_v34 = vmul.f32 %v3204_v11, %v531_v44  ;;  %v3273_v35 = vmul.f32 %v3208_v25, %v531_v44 }
 0x137   : > { %v3218_v48 = vpop.permute.xlu1 %890  ;;  %v3230_v16 = vpop.permute.xlu0 %888  ;;  %v1499_v1 = vrot.slane %v1495_v17, 2  ;;  %v3282_v50 = vmul.f32 %v3204_v11, %v383_v33  ;;  %v1516_v17 = vrot.slane %v1512_v18, 2  ;;  %v752_v40 = vstv %s3247_s22  ;;  %s3553_s22 = sld [smem:[#allocation2 + $0x2f]] }
 0x138   : > { %4558 = vst [vmem:[#allocation44_spill] sm:$0xff] %v3218_v48  ;;  %4559 = vst [vmem:[#allocation45_spill] sm:$0xff] %v3230_v16  ;;  %v3257_v48 = vadd.f32 %v379_v55, %v358_v28  ;;  %v3260_v16 = vmul.f32 %v3204_v11, %v518_v20  ;;  %v3285_v20 = vmul.f32 %v3208_v25, %v383_v33  ;;  %v1515_v28 = vrot.slane %v1511_v3, 2 }
 0x139   : > { %1472 = vrot.lane.b32.xlu1 %v1468_v63, %s2594_s21  ;;  %1470 = vrot.lane.b32.xlu0 %v1469_v22, %s2594_s21  ;;  %v1485_v63 = vsel %vm744_vm1, %v1483_v45, %v1484_v54  ;;  %v555_v45 = vstv %s3211_s19  ;;  %v3291_v55 = vmul.f32 %v3204_v11, %v543_v8  ;;  %v1527_v33 = vmul.f32 %v2904_v31, %v1526_v59  ;;  %s3481_s19 = sld [smem:[#allocation2 + $0x42]] }
 0x13a   : > { %v3302_v18 = vmul.f32 %v3204_v11, %v555_v45  ;;  %v3305_v3 = vmul.f32 %v3208_v25, %v555_v45  ;;  %v1517_v45 = vsel %vm744_vm1, %v1515_v28, %v1516_v17  ;;  %v788_v49 = vstv %s3287_s5  ;;  %s3576_s5 = sld [smem:[#allocation2 + $0x16]] }
 0x13b   : > { %v3254_v21 = vpop.permute.xlu1 %906  ;;  %v3263_v22 = vpop.permute.xlu0 %904  ;;  %v3351_v53 = vmul.f32 %v3204_v11, %v752_v40  ;;  %v4575_v15 = vrot.slane %v3270_v34, 1 }
 0x13c   : > { %4560 = vst [vmem:[#allocation46_spill] sm:$0xff] %v3254_v21  ;;  %4561 = vst [vmem:[#allocation47_spill] sm:$0xff] %v3263_v22  ;;  %v1528_v22 = vmul.f32 %v2898_v27, %v1526_v59  ;;  %v3299_v21 = vmul.f32 %v3208_v25, %v543_v8  ;;  %v567_v8 = vstv %s3240_s26  ;;  %v1544_v59 = vmul.f32 %v2898_v27, %v1542_v7  ;;  %s3501_s26 = sld [smem:[#allocation2 + $0x5d]] }
 0x13d   : > { %1488 = vrot.lane.b32.xlu1 %v1484_v54, %s2595_s9  ;;  %1486 = vrot.lane.b32.xlu0 %v1485_v63, %s2595_s9  ;;  %v1501_v54 = vsel %vm744_vm1, %v1499_v1, %v1500_v0  ;;  %v3333_v43 = vmul.f32 %v3204_v11, %v567_v8 }
 0x13e   : > { %v1532_v1 = vrot.slane %v1528_v22, 2  ;;  %v548_v58 = vrot.slane %v3299_v21, 1  ;;  %v3336_v22 = vmul.f32 %v3208_v25, %v567_v8  ;;  %v3343_v21 = vmul.f32 %v3204_v11, %v739_v60 }
 0x13f   : > { %v3293_v44 = vpop.permute.xlu1 %922  ;;  %v3307_v63 = vpop.permute.xlu0 %920 }
 0x140   : > { %4562 = vst [vmem:[#allocation48_spill] sm:$0xff] %v3293_v44  ;;  %4563 = vst [vmem:[#allocation49_spill] sm:$0xff] %v3307_v63  ;;  %v1531_v63 = vrot.slane %v1527_v33, 2  ;;  %v764_v33 = vstv %s3276_s30  ;;  %s3567_s30 = sld [smem:[#allocation2 + $0x4a]] }
 0x141   : > { %1504 = vrot.lane.b32.xlu1 %v1500_v0, %s2595_s9  ;;  %1502 = vrot.lane.b32.xlu0 %v1501_v54, %s2595_s9  ;;  %v1543_v0 = vmul.f32 %v2904_v31, %v1542_v7  ;;  %v740_v7 = vmul.f32 %v3208_v25, %v739_v60  ;;  %v753_v54 = vmul.f32 %v3208_v25, %v752_v40 }
 0x142   : > { %v765_v38 = vmul.f32 %v3208_v25, %v764_v33  ;;  %v3360_v30 = vmul.f32 %v3204_v11, %v764_v33  ;;  %v3374_v33 = vmul.f32 %v3204_v11, %v788_v49 }
 0x143   : > { %v3322_v44 = vpop.permute.xlu1 %938  ;;  %v3330_v28 = vpop.permute.xlu0 %936  ;;  %v1547_v60 = vrot.slane %v1543_v0, 2  ;;  %v789_v0 = vmul.f32 %v3208_v25, %v788_v49  ;;  %v3393_v49 = vld [vmem:[%s2745_s29 + $0x28] sm:$0xff] }
 0x144   : > { %4564 = vst [vmem:[#allocation50_spill] sm:$0xff] %v3322_v44  ;;  %4565 = vst [vmem:[#allocation51_spill] sm:$0xff] %v3330_v28  ;;  %v776_v44 = vstv %s3278_s4  ;;  %v1533_v28 = vsel %vm744_vm1, %v1531_v63, %v1532_v1  ;;  %s3570_s4 = sld [smem:[#allocation2 + $0x78]] }
 0x145   : > { %1520 = vrot.lane.b32.xlu1 %v1516_v17, %s2595_s9  ;;  %1518 = vrot.lane.b32.xlu0 %v1517_v45, %s2595_s9  ;;  %v1548_v17 = vrot.slane %v1544_v59, 2  ;;  %v777_v45 = vmul.f32 %v3208_v25, %v776_v44  ;;  %v3364_v40 = vmul.f32 %v3204_v11, %v776_v44  ;;  %v572_v59 = vrot.slane %v3336_v22, 1  ;;  %4568 = vst [vmem:[#allocation54_spill] sm:$0xff] %v3374_v33 }
 0x146   : > { %v4569_v44 = vstv %s3168_s8  ;;  %v745_v22 = vrot.slane %v740_v7, 2  ;;  %v1586_v11 = vstv %s3320_s27  ;;  %s3408_s8 = sld [smem:[#allocation2 + $0x75]]  ;;  %v793_v25 = vrot.slane %v789_v0, 2 }
 0x147   : > { %v3353_v8 = vpop.permute.xlu1 %954  ;;  %v4570_v24 = vmov %v4569_v44  ;;  %v781_v19 = vrot.slane %v777_v45, 2  ;;  %v1588_v45 = vmul.f32 %v3393_v49, %v1586_v11  ;;  %v4576_v7 = vrot.slane %v3273_v35, 1  ;;  %s3592_s27 = sld [smem:[#allocation2 + $0x65]] }
 0x148   : > { %4566 = vst [vmem:[#allocation52_spill] sm:$0xff] %v3353_v8  ;;  %v3366_v8 = vpop.permute.xlu0 %952  ;;  %v3389_v63 = vadd.f32 %v3285_v20, %v4570_v24  ;;  %v1549_v24 = vsel %vm744_vm1, %v1547_v60, %v1548_v17  ;;  %v3406_v20 = vld [vmem:[%s2745_s29 + $0x20] sm:$0xff]  ;;  %v4574_v60 = vrot.slane %v3267_v13, 1  ;;  %v4577_v13 = vrot.slane %v3291_v55, 1 }
 0x149   : > { %4567 = vst [vmem:[#allocation53_spill] sm:$0xff] %v3366_v8  ;;  %1536 = vrot.lane.b32.xlu1 %v1532_v1, %s2595_s9  ;;  %v3384_v8 = vadd.f32 %v3282_v50, %v4569_v44  ;;  %1534 = vrot.lane.b32.xlu0 %v1533_v28, %s2595_s9  ;;  %v757_v1 = vrot.slane %v753_v54, 2  ;;  %v769_v28 = vrot.slane %v765_v38, 2  ;;  %v4573_v54 = vrot.slane %v3260_v16, 1 }
 0x14a   : > { %v1587_v0 = vmul.f32 %v3406_v20, %v1586_v11  ;;  %v4579_v35 = vrot.slane %v3305_v3, 1 }
 0x14b   : > { %v3402_v44 = vpop.permute.xlu1 %995  ;;  %v3421_v50 = vsel %vm523_vm0, %v4574_v60, %v4573_v54  ;;  %v3436_v54 = vsel %vm523_vm0, %v548_v58, %v4577_v13  ;;  %v4578_v60 = vrot.slane %v3302_v18, 1  ;;  %v963_v13 = vstv %s3356_s15  ;;  %s3640_s15 = sld [smem:[#allocation2 + $0x4c]] }
 0x14c   : > { %4571 = vst [vmem:[#allocation55_spill] sm:$0xff] %v3402_v44  ;;  %v3412_v10 = vpop.permute.xlu0 %993  ;;  %v4583_v44 = vrot.slane %v3351_v53, 2 }
 0x14d   : > { %4572 = vst [vmem:[#allocation56_spill] sm:$0xff] %v3412_v10  ;;  %1552 = vrot.lane.b32.xlu1 %v1548_v17, %s2595_s9  ;;  %v3431_v10 = vsel %vm523_vm0, %v4576_v7, %v4575_v15  ;;  %1550 = vrot.lane.b32.xlu0 %v1549_v24, %s2595_s9  ;;  %v1599_v17 = vstv %s3348_s6  ;;  %v3448_v15 = vsel %vm523_vm0, %v4579_v35, %v4578_v60  ;;  %v4580_v7 = vrot.slane %v3333_v43, 1  ;;  %s3626_s6 = sld [smem:[#allocation2 + $0x31]] }
 0x14e   : > { %v4581_v24 = vrot.slane %v3343_v21, 2  ;;  %v3466_v3 = vsel %vm744_vm1, %v757_v1, %v4583_v44  ;;  %v4584_v60 = vrot.slane %v3360_v30, 2  ;;  %v4585_v35 = vrot.slane %v3364_v40, 2 }
 0x14f   : > { %v3453_v58 = vsel %vm523_vm0, %v572_v59, %v4580_v7  ;;  %v3461_v38 = vpop.permute.xlu1 %1008  ;;  %v968_v7 = vstv %s3368_s25  ;;  %v973_v44 = vstv %s3377_s7  ;;  %s3646_s25 = sld [smem:[#allocation2 + $0x80]]  ;;  %s3654_s7 = sld [smem:[#allocation2 + $0x67]] }
 0x150   : > { %v3458_v11 = vsel %vm744_vm1, %v745_v22, %v4581_v24  ;;  %4582 = vst [vmem:[#allocation57_spill] sm:$0xff] %v3461_v38  ;;  %v3471_v59 = vsel %vm744_vm1, %v769_v28, %v4584_v60  ;;  %v3476_v22 = vsel %vm744_vm1, %v781_v19, %v4585_v35  ;;  %v3479_v24 = vpop.permute.xlu0 %1006  ;;  %v4588_v38 = vrot.slane %v3374_v33, 2 }
 0x151   : > { %4586 = vst [vmem:[#allocation58_spill] sm:$0xff] %v3476_v22  ;;  %4587 = vst [vmem:[#allocation59_spill] sm:$0xff] %v3479_v24  ;;  %1593 = vrot.lane.b32.xlu1 %v1588_v45, %s2594_s21  ;;  %v1601_v28 = vmul.f32 %v3393_v49, %v1599_v17  ;;  %v978_v60 = vstv %s3379_s28  ;;  %v3495_v19 = vmul.f32 %v2898_v27, %v963_v13  ;;  %1591 = vrot.lane.b32.xlu0 %v1587_v0, %s2594_s21  ;;  %s3692_s28 = sld [smem:[#allocation2 + $0x82]] }
 0x152   : > { %v3486_v1 = vsel %vm744_vm1, %v793_v25, %v4588_v38  ;;  %v1600_v35 = vmul.f32 %v3406_v20, %v1599_v17  ;;  %v1612_v24 = vstv %s3396_s10  ;;  %v1118_v25 = vstv %s3398_s11  ;;  %s3714_s10 = sld [smem:[#allocation2 + $0xf]] }
 0x153   : > { %4589 = vst [vmem:[#allocation60_spill] sm:$0xff] %v3486_v1  ;;  %4590 = vst [vmem:[#allocation61_spill] sm:$0xff] %v3495_v19  ;;  %v3504_v38 = vmul.f32 %v2904_v31, %v963_v13  ;;  %v3507_v45 = vmul.f32 %v2898_v27, %v968_v7  ;;  %v3510_v1 = vmul.f32 %v2904_v31, %v968_v7  ;;  %v3512_v33 = vpop.permute.xlu1 %1021  ;;  %v983_v19 = vstv %s3408_s8  ;;  %s3724_s11 = sld [smem:[#allocation2 + $0x17]]  ;;  %s3749_s8 = sld [smem:[#allocation2 + $0x32]] }
 0x154   : > { %4593 = vst [vmem:[#allocation64_spill] sm:$0xff] %v3512_v33  ;;  %v3518_v0 = vmul.f32 %v2898_v27, %v973_v44  ;;  %v3521_v17 = vmul.f32 %v2904_v31, %v973_v44  ;;  %v3523_v13 = vpop.permute.xlu0 %1019  ;;  %v1130_v22 = vstv %s3414_s12  ;;  %v3531_v7 = vmul.f32 %v2904_v31, %v978_v60  ;;  %s3770_s12 = sld [smem:[#allocation2 + $0x2a]] }
 0x155   : > { %4591 = vst [vmem:[#allocation62_spill] sm:$0xff] %v3504_v38  ;;  %4592 = vst [vmem:[#allocation63_spill] sm:$0xff] %v3510_v1  ;;  %v3526_v38 = vmul.f32 %v2898_v27, %v978_v60  ;;  %1606 = vrot.lane.b32.xlu1 %v1601_v28, %s2594_s21  ;;  %v1614_v33 = vmul.f32 %v3393_v49, %v1612_v24  ;;  %v1119_v1 = vmul.f32 %v2904_v31, %v1118_v25 }
 0x156   : > { %4594 = vst [vmem:[#allocation65_spill] sm:$0xff] %v3518_v0  ;;  %4595 = vst [vmem:[#allocation66_spill] sm:$0xff] %v3523_v13  ;;  %v3536_v0 = vmul.f32 %v2898_v27, %v1118_v25  ;;  %1604 = vrot.lane.b32.xlu0 %v1600_v35, %s2594_s21  ;;  %v1613_v44 = vmul.f32 %v3406_v20, %v1612_v24  ;;  %v3544_v28 = vmul.f32 %v2904_v31, %v983_v19 }
 0x157   : > { %4596 = vst [vmem:[#allocation67_spill] sm:$0xff] %v3526_v38  ;;  %4597 = vst [vmem:[#allocation68_spill] sm:$0xff] %v3531_v7  ;;  %v3541_v38 = vmul.f32 %v2898_v27, %v983_v19  ;;  %v1625_v60 = vstv %s3441_s18  ;;  %v412_v7 = vadd.f32 %v2900_v29, %v3199_v14  ;;  %v399_v25 = vadd.f32 %v2906_v32, %v3224_v26  ;;  %v3551_v13 = vpop.permute.xlu1 %1034  ;;  %s3800_s18 = sld [smem:[#allocation2 + $0x45]] }
 0x158   : > { %4598 = vst [vmem:[#allocation69_spill] sm:$0xff] %v3536_v0  ;;  %4600 = vst [vmem:[#allocation71_spill] sm:$0xff] %v3544_v28  ;;  %v1131_v24 = vmul.f32 %v2904_v31, %v1130_v22  ;;  %v3557_v35 = vmul.f32 %v2898_v27, %v1130_v22  ;;  %v413_v19 = vadd.f32 %v2912_v36, %v3201_v12  ;;  %v3565_v32 = vpop.permute.xlu0 %1032  ;;  %v1142_v14 = vstv %s3481_s19  ;;  %s3832_s19 = sld [smem:[#allocation2 + $0x4d]] }
 0x159   : > { %4599 = vst [vmem:[#allocation70_spill] sm:$0xff] %v3541_v38  ;;  %v400_v28 = vadd.f32 %v2914_v37, %v3226_v23  ;;  %v426_v29 = vadd.f32 %v2920_v41, %v3234_v2  ;;  %1619 = vrot.lane.b32.xlu1 %v1614_v33, %s2594_s21  ;;  %v1627_v26 = vmul.f32 %v3393_v49, %v1625_v60  ;;  %v1638_v36 = vstv %s3492_s23  ;;  %s3853_s23 = sld [smem:[#allocation2 + $0x68]] }
 0x15a   : > { %v1123_v12 = vrot.slane %v1119_v1, 1  ;;  %v3580_v41 = vadd.f32 %v2922_v42, %v3236_v39  ;;  %v3584_v23 = vadd.f32 %v2928_v46, %v3252_v6  ;;  %1617 = vrot.lane.b32.xlu0 %v1613_v44, %s2594_s21  ;;  %v1626_v2 = vmul.f32 %v3406_v20, %v1625_v60 }
 0x15b   : > { %v1154_v33 = vstv %s3501_s26  ;;  %v3589_v22 = vpop.permute.xlu1 %1047  ;;  %v1651_v1 = vstv %s3515_s24  ;;  %v1135_v37 = vrot.slane %v1131_v24, 1  ;;  %v1143_v42 = vmul.f32 %v2904_v31, %v1142_v14  ;;  %s3990_s26 = sld [smem:[#allocation2 + $0x83]]  ;;  %s4018_s24 = sld [smem:[#allocation2 + $0x60]] }
 0x15c   : > { %4601 = vst [vmem:[#allocation72_spill] sm:$0xff] %v3589_v22  ;;  %v3598_v39 = vadd.f32 %v2930_v47, %v3257_v48  ;;  %v3600_v46 = vpop.permute.xlu0 %1045  ;;  %v1640_v6 = vmul.f32 %v3393_v49, %v1638_v36  ;;  %v1639_v44 = vmul.f32 %v3406_v20, %v1638_v36  ;;  %v3605_v60 = vmul.f32 %v2898_v27, %v1142_v14 }
 0x15d   : > { %4602 = vst [vmem:[#allocation73_spill] sm:$0xff] %v3600_v46  ;;  %v3609_v24 = vadd.f32 %v2936_v51, %v3384_v8  ;;  %1632 = vrot.lane.b32.xlu1 %v1627_v26, %s2594_s21  ;;  %v4603_v38 = vrot.slane %v3536_v0, 1  ;;  %v1155_v48 = vmul.f32 %v2904_v31, %v1154_v33  ;;  %v3619_v46 = vmul.f32 %v2898_v27, %v1154_v33 }
 0x15e   : > { %v465_v14 = vadd.f32 %v2944_v56, %v400_v28  ;;  %v464_v36 = vadd.f32 %v2946_v57, %v399_v25  ;;  %1630 = vrot.lane.b32.xlu0 %v1626_v2, %s2594_s21  ;;  %v1653_v51 = vmul.f32 %v3393_v49, %v1651_v1  ;;  %v1652_v8 = vmul.f32 %v3406_v20, %v1651_v1  ;;  %v3671_v1 = vld [vmem:[%s2745_s29 + $0x10] sm:$0xff] }
 0x15f   : > { %v3615_v47 = vsel %vm523_vm0, %v1123_v12, %v4603_v38  ;;  %4605 = vst [vmem:[#allocation75_spill] sm:$0xff] %v3619_v46  ;;  %v3630_v31 = vadd.f32 %v2938_v52, %v3389_v63  ;;  %v3632_v27 = vpop.permute.xlu1 %1060  ;;  %v1664_v38 = vstv %s3553_s22  ;;  %v4607_v56 = vrot.slane %v3557_v35, 1  ;;  %s4030_s22 = sld [smem:[#allocation2 + $0x19]] }
 0x160   : > { %4604 = vst [vmem:[#allocation74_spill] sm:$0xff] %v3615_v47  ;;  %4606 = vst [vmem:[#allocation76_spill] sm:$0xff] %v3632_v27  ;;  %v1147_v28 = vrot.slane %v1143_v42, 1  ;;  %v478_v25 = vadd.f32 %v2952_v61, %v413_v19  ;;  %v3643_v26 = vpop.permute.xlu0 %1058  ;;  %v1677_v12 = vstv %s3567_s30  ;;  %v4510_v52 = vrot.slane %v3605_v60, 1  ;;  %s4046_s30 = sld [smem:[#allocation2 + $0x34]] }
 0x161   : > { %v3638_v57 = vsel %vm523_vm0, %v1135_v37, %v4607_v56  ;;  %4608 = vst [vmem:[#allocation77_spill] sm:$0xff] %v3643_v26  ;;  %v1166_v63 = vstv %s3570_s4  ;;  %v477_v2 = vadd.f32 %v2954_v62, %v412_v7  ;;  %1645 = vrot.lane.b32.xlu1 %v1640_v6, %s2594_s21  ;;  %v1776_v37 = vstv %s3576_s5  ;;  %s4086_s4 = sld [smem:[#allocation2 + $0x4f]]  ;;  %s4101_s5 = sld [smem:[#allocation2 + $0x7b]] }
 0x162   : > { %v1159_v33 = vrot.slane %v1155_v48, 1  ;;  %v4609_v61 = vrot.slane %v3260_v16, 1  ;;  %v3661_v42 = vadd.f32 %v3421_v50, %v464_v36  ;;  %1643 = vrot.lane.b32.xlu0 %v1639_v44, %s2594_s21  ;;  %v1666_v62 = vmul.f32 %v3393_v49, %v1664_v38 }
 0x163   : > { %v1665_v7 = vmul.f32 %v3406_v20, %v1664_v38  ;;  %v491_v6 = vadd.f32 %v2960_v4, %v426_v29  ;;  %v3667_v48 = vpop.permute.xlu1 %1073  ;;  %v1690_v56 = vstv %s3592_s27  ;;  %v1167_v16 = vmul.f32 %v3671_v1, %v1166_v63  ;;  %s4116_s27 = sld [smem:[#allocation2 + $0x6a]] }
 0x164   : > { %v3658_v19 = vadd.f32 %v4609_v61, %v465_v14  ;;  %v3675_v14 = vld [vmem:[%s2745_s29 + $0x18] sm:$0xff]  ;;  %v3680_v44 = vpop.permute.xlu0 %1071  ;;  %v1679_v36 = vmul.f32 %v3393_v49, %v1677_v12  ;;  %v1678_v38 = vmul.f32 %v3406_v20, %v1677_v12  ;;  %v3685_v4 = vmul.f32 %v3393_v49, %v1776_v37 }
 0x165   : > { %v3678_v50 = vmul.f32 %v3675_v14, %v1166_v63  ;;  %v3690_v29 = vsel %vm523_vm0, %v1147_v28, %v4510_v52  ;;  %v4612_v63 = vrot.slane %v3270_v34, 1  ;;  %v3699_v47 = vadd.f32 %v3431_v10, %v477_v2  ;;  %1658 = vrot.lane.b32.xlu1 %v1653_v51, %s2595_s9 }
 0x166   : > { %4611 = vst [vmem:[#allocation79_spill] sm:$0xff] %v3690_v29  ;;  %v1777_v12 = vmul.f32 %v3406_v20, %v1776_v37  ;;  %v4613_v0 = vrot.slane %v3619_v46, 1  ;;  %v490_v28 = vadd.f32 %v2962_v5, %v3580_v41  ;;  %1656 = vrot.lane.b32.xlu0 %v1652_v8, %s2595_s9  ;;  %v1692_v34 = vmul.f32 %v3393_v49, %v1690_v56  ;;  %v4616_v8 = vld [vmem:[#allocation11_spill] sm:$0xff]  ;;  %v4640_v29 = vld [vmem:[#allocation20_spill] sm:$0xff] }
 0x167   : > { %4610 = vst [vmem:[#allocation78_spill] sm:$0xff] %v3678_v50  ;;  %v3696_v61 = vadd.f32 %v4612_v63, %v478_v25  ;;  %v1691_v10 = vmul.f32 %v3406_v20, %v1690_v56  ;;  %v1792_v25 = vstv %s3626_s6  ;;  %v4615_v51 = vrot.slane %v3291_v55, 1  ;;  %s4134_s6 = sld [smem:[#allocation2 + $0x85]] }
 0x168   : > { %v3706_v26 = vsel %vm523_vm0, %v1159_v33, %v4613_v0  ;;  %v3720_v0 = vpop.permute.xlu1 %1086  ;;  %v1808_v37 = vstv %s3640_s15  ;;  %v1171_v33 = vrot.slane %v1167_v16, 1  ;;  %v504_v41 = vadd.f32 %v2968_v9, %v3584_v23  ;;  %v3730_v63 = vpop.permute.xlu0 %1084  ;;  %v4618_v23 = vld [vmem:[#allocation13_spill] sm:$0xff]  ;;  %s4150_s15 = sld [smem:[#allocation2 + $0x1a]] }
 0x169   : > { %4614 = vst [vmem:[#allocation80_spill] sm:$0xff] %v3706_v26  ;;  %v3718_v2 = vadd.f32 %v4615_v51, %v491_v6  ;;  %v503_v56 = vadd.f32 %v4616_v8, %v3598_v39  ;;  %v1703_v55 = vstv %s3646_s25  ;;  %1671 = vrot.lane.b32.xlu1 %v1666_v62, %s2595_s9  ;;  %v1781_v51 = vrot.slane %v1777_v12, 1  ;;  %v4617_v26 = vld [vmem:[#allocation12_spill] sm:$0xff]  ;;  %s4170_s25 = sld [smem:[#allocation2 + $0x35]] }
 0x16a   : > { %v3736_v16 = vmul.f32 %v3393_v49, %v1792_v25  ;;  %v1793_v52 = vmul.f32 %v3406_v20, %v1792_v25  ;;  %v1824_v5 = vstv %s3654_s7  ;;  %v517_v9 = vadd.f32 %v4617_v26, %v3609_v24  ;;  %1669 = vrot.lane.b32.xlu0 %v1665_v7, %s2595_s9  ;;  %s4182_s7 = sld [smem:[#allocation2 + $0x50]] }
 0x16b   : > { %v516_v39 = vadd.f32 %v4618_v23, %v3630_v31  ;;  %v553_v8 = vadd.f32 %v3436_v54, %v490_v28  ;;  %v3747_v62 = vmul.f32 %v3393_v49, %v1808_v37  ;;  %v1705_v25 = vmul.f32 %v3393_v49, %v1703_v55 }
 0x16c   : > { %v3751_v12 = vpop.permute.xlu1 %1099  ;;  %v1704_v6 = vmul.f32 %v3406_v20, %v1703_v55  ;;  %v1809_v24 = vmul.f32 %v3406_v20, %v1808_v37  ;;  %v4619_v26 = vrot.slane %v3678_v50, 1  ;;  %v4621_v54 = vrot.slane %v3302_v18, 1  ;;  %v3763_v28 = vpop.permute.xlu0 %1097 }
 0x16d   : > { %4622 = vst [vmem:[#allocation12_spill] sm:$0xff] %v3763_v28  ;;  %v3766_v23 = vmul.f32 %v3393_v49, %v1824_v5  ;;  %v1825_v46 = vmul.f32 %v3406_v20, %v1824_v5  ;;  %v1840_v27 = vstv %s3692_s28  ;;  %v565_v37 = vadd.f32 %v3448_v15, %v503_v56  ;;  %1684 = vrot.lane.b32.xlu1 %v1679_v36, %s2595_s9  ;;  %s4199_s28 = sld [smem:[#allocation2 + $0x6b]] }
 0x16e   : > { %v3759_v31 = vsel %vm523_vm0, %v1171_v33, %v4619_v26  ;;  %v566_v7 = vadd.f32 %v4621_v54, %v504_v41  ;;  %v4623_v33 = vrot.slane %v3685_v4, 1  ;;  %v1797_v55 = vrot.slane %v1793_v52, 1  ;;  %1682 = vrot.lane.b32.xlu0 %v1678_v38, %s2595_s9 }
 0x16f   : > { %4620 = vst [vmem:[#allocation11_spill] sm:$0xff] %v3759_v31  ;;  %v4624_v26 = vrot.slane %v3333_v43, 1  ;;  %v577_v5 = vadd.f32 %v3453_v58, %v516_v39  ;;  %v1338_v15 = vstv %s3714_s10  ;;  %v1813_v36 = vrot.slane %v1809_v24, 1  ;;  %v4626_v43 = vld [vmem:[#allocation14_spill] sm:$0xff]  ;;  %v4627_v58 = vld [vmem:[#allocation15_spill] sm:$0xff]  ;;  %v4629_v24 = vld [vmem:[#allocation16_spill] sm:$0xff] }
 0x170   : > { %v3777_v18 = vsel %vm523_vm0, %v1781_v51, %v4623_v33  ;;  %v3786_v56 = vpop.permute.xlu1 %1112  ;;  %v3789_v50 = vmul.f32 %v3393_v49, %v1840_v27  ;;  %v1841_v51 = vmul.f32 %v3406_v20, %v1840_v27  ;;  %v1856_v52 = vstv %s3724_s11  ;;  %v3797_v38 = vpop.permute.xlu0 %1110  ;;  %v4630_v27 = vld [vmem:[#allocation17_spill] sm:$0xff]  ;;  %s4216_s10 = sld [smem:[#allocation2 + $0x86]]  ;;  %s4245_s11 = sld [smem:[#allocation2 + $0x48]] }
 0x171   : > { %v578_v54 = vadd.f32 %v4624_v26, %v517_v9  ;;  %4625 = vst [vmem:[#allocation13_spill] sm:$0xff] %v3786_v56  ;;  %v594_v9 = vadd.f32 %v4626_v43, %v3658_v19  ;;  %v593_v39 = vadd.f32 %v4627_v58, %v3661_v42  ;;  %4628 = vst [vmem:[#allocation14_spill] sm:$0xff] %v3797_v38  ;;  %v1829_v26 = vrot.slane %v1825_v46, 1  ;;  %v4637_v56 = vld [vmem:[#allocation26_spill] sm:$0xff] }
 0x172   : > { %v610_v31 = vadd.f32 %v4629_v24, %v3696_v61  ;;  %v609_v41 = vadd.f32 %v4630_v27, %v3699_v47  ;;  %1697 = vrot.lane.b32.xlu1 %v1692_v34, %s2595_s9  ;;  %v4631_v19 = vrot.slane %v3736_v16, 1  ;;  %v1339_v42 = vmul.f32 %v3671_v1, %v1338_v15  ;;  %1695 = vrot.lane.b32.xlu0 %v1691_v10, %s2595_s9  ;;  %v4633_v34 = vld [vmem:[#allocation18_spill] sm:$0xff] }
 0x173   : > { %v3815_v46 = vmul.f32 %v3393_v49, %v1856_v52  ;;  %v1857_v61 = vmul.f32 %v3406_v20, %v1856_v52  ;;  %v1872_v58 = vstv %s3749_s8  ;;  %v3820_v47 = vmul.f32 %v3675_v14, %v1338_v15  ;;  %v4636_v52 = vld [vmem:[#allocation19_spill] sm:$0xff]  ;;  %s4255_s8 = sld [smem:[#allocation2 + $0x63]] }
 0x174   : > { %v3810_v43 = vsel %vm523_vm0, %v1797_v55, %v4631_v19  ;;  %v626_v24 = vadd.f32 %v4633_v34, %v3718_v2  ;;  %v3824_v27 = vpop.permute.xlu1 %1188  ;;  %v4635_v55 = vrot.slane %v3747_v62, 1  ;;  %v4513_v10 = vrot.slane %v3789_v50, 1  ;;  %v3836_v22 = vpop.permute.xlu0 %1186 }
 0x175   : > { %4632 = vst [vmem:[#allocation15_spill] sm:$0xff] %v3820_v47  ;;  %4634 = vst [vmem:[#allocation16_spill] sm:$0xff] %v3824_v27  ;;  %v1845_v33 = vrot.slane %v1841_v51, 1  ;;  %v625_v38 = vadd.f32 %v4636_v52, %v553_v8  ;;  %v690_v15 = vadd.f32 %v4637_v56, %v610_v31  ;;  %v4639_v2 = vrot.slane %v3766_v23, 1 }
 0x176   : > { %v3829_v19 = vsel %vm523_vm0, %v1813_v36, %v4635_v55  ;;  %4638 = vst [vmem:[#allocation17_spill] sm:$0xff] %v3836_v22  ;;  %v1350_v27 = vstv %s3770_s12  ;;  %v642_v36 = vadd.f32 %v4640_v29, %v566_v7  ;;  %v4641_v55 = vld [vmem:[#allocation27_spill] sm:$0xff]  ;;  %1710 = vrot.lane.b32.xlu1 %v1705_v25, %s2595_s9  ;;  %v3848_v51 = vmul.f32 %v3393_v49, %v1872_v58  ;;  %v4642_v7 = vld [vmem:[#allocation21_spill] sm:$0xff]  ;;  %s2394_s12 = sld [smem:[#allocation2 + $0x7e]] }
 0x177   : > { %v3841_v34 = vsel %vm523_vm0, %v1829_v26, %v4639_v2  ;;  %v689_v28 = vadd.f32 %v4641_v55, %v609_v41  ;;  %v1873_v8 = vmul.f32 %v3406_v20, %v1872_v58  ;;  %1708 = vrot.lane.b32.xlu0 %v1704_v6, %s2595_s9  ;;  %v1861_v56 = vrot.slane %v1857_v61, 1  ;;  %v4644_v61 = vld [vmem:[#allocation22_spill] sm:$0xff] }
 0x178   : > { %v1343_v26 = vrot.slane %v1339_v42, 2  ;;  %v641_v41 = vadd.f32 %v4642_v7, %v565_v37  ;;  %v3857_v52 = vpop.permute.xlu1 %1204  ;;  %v3862_v25 = vsel %vm523_vm0, %v1845_v33, %v4513_v10  ;;  %v3865_v58 = vmul.f32 %v3671_v1, %v1350_v27  ;;  %v4645_v42 = vld [vmem:[#allocation28_spill] sm:$0xff]  ;;  %v3874_v7 = vpop.permute.xlu0 %1202  ;;  %v4647_v33 = vld [vmem:[#allocation29_spill] sm:$0xff] }
 0x179   : > { %v3868_v6 = vmul.f32 %v3675_v14, %v1350_v27  ;;  %v658_v2 = vadd.f32 %v4644_v61, %v578_v54  ;;  %v706_v55 = vadd.f32 %v4645_v42, %v626_v24  ;;  %v4646_v29 = vrot.slane %v3351_v53, 2  ;;  %v4649_v24 = vld [vmem:[#allocation23_spill] sm:$0xff]  ;;  %v4650_v53 = vld [vmem:[#allocation36_spill] sm:$0xff] }
 0x17a   : > { %v4515_v31 = vstv %s3800_s18  ;;  %v705_v10 = vadd.f32 %v4647_v33, %v625_v38  ;;  %v762_v22 = vadd.f32 %v3466_v3, %v689_v28  ;;  %v4648_v27 = vrot.slane %v3685_v4, 1  ;;  %v4654_v28 = vld [vmem:[#allocation24_spill] sm:$0xff] }
 0x17b   : > { %4643 = vst [vmem:[#allocation18_spill] sm:$0xff] %v3868_v6  ;;  %v763_v37 = vadd.f32 %v4646_v29, %v690_v15  ;;  %v1877_v61 = vrot.slane %v1873_v8, 1  ;;  %v657_v42 = vadd.f32 %v4649_v24, %v577_v5  ;;  %1784 = vrot.lane.b32.xlu0 %v3777_v18, %s2594_s21  ;;  %v4651_v29 = vrot.slane %v3815_v46, 1  ;;  %v4655_v8 = vld [vmem:[#allocation37_spill] sm:$0xff] }
 0x17c   : > { %1786 = vrot.lane.b32.xlu1 %v4648_v27, %s2594_s21  ;;  %v4652_v3 = vrot.slane %v3820_v47, 2  ;;  %v674_v33 = vadd.f32 %v4654_v28, %v594_v9  ;;  %v830_v27 = vadd.f32 %v4655_v8, %v762_v22  ;;  %v3899_v5 = vpop.permute.xlu1 %1220  ;;  %v3905_v18 = vmul.f32 %v3671_v1, %v4515_v31  ;;  %v4656_v24 = vld [vmem:[#allocation25_spill] sm:$0xff]  ;;  %v3912_v9 = vpop.permute.xlu0 %1218  ;;  %v4660_v22 = vld [vmem:[#allocation31_spill] sm:$0xff] }
 0x17d   : > { %v831_v15 = vadd.f32 %v4650_v53, %v763_v37  ;;  %v3890_v38 = vsel %vm523_vm0, %v1861_v56, %v4651_v29  ;;  %v1888_v37 = vstv %s3832_s19  ;;  %v673_v56 = vadd.f32 %v4656_v24, %v593_v39  ;;  %v4657_v53 = vld [vmem:[#allocation30_spill] sm:$0xff]  ;;  %v4661_v47 = vld [vmem:[#allocation47_spill] sm:$0xff]  ;;  %s2343_s19 = sld [smem:[#allocation2 + $0x4b]] }
 0x17e   : > { %v3895_v4 = vsel %vm744_vm1, %v1343_v26, %v4652_v3  ;;  %v722_v29 = vadd.f32 %v4657_v53, %v642_v36  ;;  %v4658_v54 = vrot.slane %v3360_v30, 2  ;;  %v4659_v3 = vld [vmem:[#allocation46_spill] sm:$0xff]  ;;  %v721_v28 = vadd.f32 %v4660_v22, %v641_v41  ;;  %v4664_v30 = vld [vmem:[#allocation32_spill] sm:$0xff] }
 0x17f   : > { %4653 = vst [vmem:[#allocation19_spill] sm:$0xff] %v3895_v4  ;;  %v911_v4 = vadd.f32 %v4659_v3, %v831_v15  ;;  %v774_v8 = vadd.f32 %v3471_v59, %v705_v10  ;;  %v910_v6 = vadd.f32 %v4661_v47, %v830_v27  ;;  %v4662_v31 = vrot.slane %v3736_v16, 1  ;;  %v4666_v24 = vld [vmem:[#allocation38_spill] sm:$0xff]  ;;  %1800 = vrot.lane.b32.xlu0 %v3810_v43, %s2594_s21  ;;  %v4668_v16 = vld [vmem:[#allocation39_spill] sm:$0xff]  ;;  %v4670_v43 = vld [vmem:[#allocation48_spill] sm:$0xff] }
 0x180   : > { %v775_v26 = vadd.f32 %v4658_v54, %v706_v55  ;;  %v4663_v39 = vrot.slane %v3848_v51, 1  ;;  %v738_v55 = vadd.f32 %v4664_v30, %v658_v2  ;;  %v4665_v54 = vld [vmem:[#allocation33_spill] sm:$0xff]  ;;  %v1904_v59 = vstv %s3853_s23  ;;  %v3934_v41 = vpop.permute.xlu1 %1236  ;;  %v4671_v22 = vld [vmem:[#allocation58_spill] sm:$0xff]  ;;  %s2370_s23 = sld [smem:[#allocation2 + $0x66]] }
 0x181   : > { %1802 = vrot.lane.b32.xlu1 %v4662_v31, %s2594_s21  ;;  %v737_v15 = vadd.f32 %v4665_v54, %v657_v42  ;;  %v4667_v47 = vrot.slane %v3343_v21, 2  ;;  %v846_v31 = vadd.f32 %v4668_v16, %v774_v8  ;;  %v3940_v2 = vmul.f32 %v3406_v20, %v1888_v37  ;;  %v4673_v54 = vld [vmem:[#allocation63_spill] sm:$0xff]  ;;  %v4679_v16 = vld [vmem:[#allocation57_spill] sm:$0xff] }
 0x182   : > { %v3923_v36 = vsel %vm523_vm0, %v1877_v61, %v4663_v39  ;;  %v847_v53 = vadd.f32 %v4666_v24, %v775_v26  ;;  %v3937_v61 = vmul.f32 %v3393_v49, %v1888_v37  ;;  %v750_v42 = vadd.f32 %v3458_v11, %v673_v56  ;;  %v4672_v39 = vld [vmem:[#allocation49_spill] sm:$0xff] }
 0x183   : > { %v751_v10 = vadd.f32 %v4667_v47, %v674_v33  ;;  %v4669_v27 = vrot.slane %v3364_v40, 2  ;;  %v972_v21 = vadd.f32 %v3507_v45, %v911_v4  ;;  %v3947_v33 = vpop.permute.xlu0 %1234  ;;  %v786_v8 = vadd.f32 %v4671_v22, %v721_v28  ;;  %v4675_v40 = vld [vmem:[#allocation40_spill] sm:$0xff]  ;;  %1816 = vrot.lane.b32.xlu0 %v3829_v19, %s2594_s21  ;;  %v4687_v19 = vld [vmem:[#allocation43_spill] sm:$0xff] }
 0x184   : > { %v927_v3 = vadd.f32 %v4670_v43, %v847_v53  ;;  %v926_v30 = vadd.f32 %v4672_v39, %v846_v31  ;;  %v971_v24 = vadd.f32 %v4673_v54, %v910_v6  ;;  %v4674_v37 = vrot.slane %v3747_v62, 1  ;;  %v4678_v4 = vld [vmem:[#allocation60_spill] sm:$0xff]  ;;  %v4680_v6 = vld [vmem:[#allocation34_spill] sm:$0xff]  ;;  %v4682_v43 = vld [vmem:[#allocation41_spill] sm:$0xff] }
 0x185   : > { %v787_v26 = vadd.f32 %v4669_v27, %v722_v29  ;;  %v3956_v11 = vmul.f32 %v3393_v49, %v1904_v59  ;;  %v4676_v29 = vld [vmem:[#allocation54_spill] sm:$0xff]  ;;  %v798_v47 = vadd.f32 %v4678_v4, %v737_v15  ;;  %v1013_v28 = vadd.f32 %v4679_v16, %v972_v21  ;;  %v4681_v27 = vld [vmem:[#allocation35_spill] sm:$0xff]  ;;  %v4686_v15 = vld [vmem:[#allocation65_spill] sm:$0xff] }
 0x186   : > { %1818 = vrot.lane.b32.xlu1 %v4674_v37, %s2594_s21  ;;  %v4677_v53 = vrot.slane %v4676_v29, 2  ;;  %v815_v31 = vadd.f32 %v4680_v6, %v751_v10  ;;  %v814_v62 = vadd.f32 %v4681_v27, %v750_v42  ;;  %v862_v22 = vadd.f32 %v4682_v43, %v786_v8  ;;  %v4683_v39 = vld [vmem:[#allocation59_spill] sm:$0xff]  ;;  %v3969_v37 = vpop.permute.xlu1 %1252  ;;  %v4691_v27 = vld [vmem:[#allocation45_spill] sm:$0xff]  ;;  %v4692_v43 = vld [vmem:[#allocation64_spill] sm:$0xff] }
 0x187   : > { %v863_v56 = vadd.f32 %v4675_v40, %v787_v26  ;;  %v1012_v54 = vadd.f32 %v4683_v39, %v971_v24  ;;  %v4684_v26 = vld [vmem:[#allocation42_spill] sm:$0xff]  ;;  %v1078_v21 = vadd.f32 %v3667_v48, %v1013_v28  ;;  %v3975_v4 = vpop.permute.xlu0 %1250  ;;  %v878_v10 = vadd.f32 %v4687_v19, %v798_v47  ;;  %v4688_v16 = vld [vmem:[#allocation51_spill] sm:$0xff]  ;;  %1832 = vrot.lane.b32.xlu0 %v3841_v34, %s2594_s21 }
 0x188   : > { %v799_v45 = vadd.f32 %v4677_v53, %v738_v55  ;;  %v4685_v55 = vld [vmem:[#allocation50_spill] sm:$0xff]  ;;  %v977_v53 = vadd.f32 %v4686_v15, %v927_v3  ;;  %v942_v42 = vadd.f32 %v4688_v16, %v862_v22  ;;  %v976_v8 = vadd.f32 %v3521_v17, %v926_v30  ;;  %v4693_v17 = vld [vmem:[#allocation52_spill] sm:$0xff] }
 0x189   : > { %v943_v29 = vadd.f32 %v4685_v55, %v863_v56  ;;  %v1077_v24 = vadd.f32 %v3680_v44, %v1012_v54  ;;  %v4689_v6 = vrot.slane %v3766_v23, 1  ;;  %v894_v3 = vadd.f32 %v4691_v27, %v814_v62  ;;  %v4694_v44 = vld [vmem:[#allocation53_spill] sm:$0xff]  ;;  %v4695_v22 = vld [vmem:[#allocation66_spill] sm:$0xff]  ;;  %v4696_v62 = vld [vmem:[#allocation67_spill] sm:$0xff] }
 0x18a   : > { %v879_v40 = vadd.f32 %v4684_v26, %v799_v45  ;;  %v4690_v45 = vld [vmem:[#allocation44_spill] sm:$0xff]  ;;  %v1026_v48 = vadd.f32 %v4692_v43, %v977_v53  ;;  %v1894_v47 = vrot.slane %v3937_v61, 1  ;;  %v958_v28 = vadd.f32 %v4694_v44, %v878_v10  ;;  %v3995_v39 = vpop.permute.xlu1 %1268  ;;  %v4704_v43 = vld [vmem:[#allocation55_spill] sm:$0xff] }
 0x18b   : > { %1834 = vrot.lane.b32.xlu1 %v4689_v6, %s2594_s21  ;;  %v895_v56 = vadd.f32 %v4690_v45, %v815_v31  ;;  %v1025_v23 = vadd.f32 %v4695_v22, %v976_v8  ;;  %v1893_v31 = vrot.slane %v3940_v2, 1  ;;  %v982_v54 = vadd.f32 %v4696_v62, %v943_v29  ;;  %v4002_v15 = vpop.permute.xlu0 %1266  ;;  %1848 = vrot.lane.b32.xlu0 %v3862_v25, %s2594_s21  ;;  %v4707_v44 = vld [vmem:[#allocation12_spill] sm:$0xff]  ;;  %v4708_v22 = vld [vmem:[#allocation79_spill] sm:$0xff] }
 0x18c   : > { %v959_v30 = vadd.f32 %v4693_v17, %v879_v40  ;;  %v1091_v26 = vadd.f32 %v3720_v0, %v1026_v48  ;;  %v4697_v34 = vrot.slane %v3557_v35, 1  ;;  %v1905_v53 = vmul.f32 %v3406_v20, %v1904_v59  ;;  %v4698_v40 = vld [vmem:[#allocation68_spill] sm:$0xff]  ;;  %v4700_v0 = vld [vmem:[#allocation61_spill] sm:$0xff]  ;;  %v4701_v35 = vld [vmem:[#allocation62_spill] sm:$0xff] }
 0x18d   : > { %v981_v19 = vadd.f32 %v4698_v40, %v942_v42  ;;  %v1090_v10 = vadd.f32 %v3730_v63, %v1025_v23  ;;  %v1140_v16 = vadd.f32 %v3638_v57, %v1077_v24  ;;  %v4699_v8 = vrot.slane %v3789_v50, 1  ;;  %v4702_v63 = vld [vmem:[#allocation70_spill] sm:$0xff]  ;;  %v4703_v42 = vld [vmem:[#allocation71_spill] sm:$0xff]  ;;  %v4712_v40 = vld [vmem:[#allocation73_spill] sm:$0xff] }
 0x18e   : > { %v1141_v55 = vadd.f32 %v4697_v34, %v1078_v21  ;;  %v1910_v29 = vrot.slane %v3956_v11, 1  ;;  %v967_v6 = vadd.f32 %v4700_v0, %v895_v56  ;;  %v966_v21 = vadd.f32 %v4701_v35, %v894_v3  ;;  %v1285_v56 = vpop.permute.xlu1 %1284 }
 0x18f   : > { %1850 = vrot.lane.b32.xlu1 %v4699_v8, %s2594_s21  ;;  %v1039_v45 = vadd.f32 %v3551_v13, %v982_v54  ;;  %v1038_v57 = vadd.f32 %v3565_v32, %v981_v19  ;;  %v987_v50 = vadd.f32 %v4702_v63, %v959_v30  ;;  %v986_v24 = vadd.f32 %v4703_v42, %v958_v28  ;;  %v1283_v17 = vpop.permute.xlu0 %1282  ;;  %v4706_v32 = vld [vmem:[#allocation56_spill] sm:$0xff] }
 0x190   : > { %v1209_v59 = vadd.f32 %v3857_v52, %v1141_v55  ;;  %v1208_v27 = vadd.f32 %v3874_v7, %v1140_v16  ;;  %v1000_v3 = vadd.f32 %v4704_v43, %v967_v6  ;;  %v4705_v52 = vrot.slane %v3605_v60, 1  ;;  %v4711_v54 = vld [vmem:[#allocation76_spill] sm:$0xff]  ;;  %1864 = vrot.lane.b32.xlu0 %v3890_v38, %s2595_s9  ;;  %v4714_v6 = vld [vmem:[#allocation13_spill] sm:$0xff] }
 0x191   : > { %v1104_v13 = vadd.f32 %v3751_v12, %v1039_v45  ;;  %v999_v30 = vadd.f32 %v4706_v32, %v966_v21  ;;  %v1103_v28 = vadd.f32 %v4707_v44, %v1038_v57  ;;  %v1152_v7 = vadd.f32 %v4708_v22, %v1090_v10  ;;  %v4710_v12 = vld [vmem:[#allocation72_spill] sm:$0xff]  ;;  %v4713_v10 = vld [vmem:[#allocation77_spill] sm:$0xff]  ;;  %v4715_v21 = vld [vmem:[#allocation75_spill] sm:$0xff] }
 0x192   : > { %v1153_v48 = vadd.f32 %v4705_v52, %v1091_v26  ;;  %v4028_v25 = vadd.f32 %v1285_v56, %v1209_v59  ;;  %v4035_v23 = vadd.f32 %v1283_v17, %v1208_v27  ;;  %v4709_v62 = vrot.slane %v3815_v46, 1  ;;  %v1301_v8 = vpop.permute.xlu1 %1300  ;;  %v4721_v43 = vld [vmem:[#allocation69_spill] sm:$0xff]  ;;  %v4723_v32 = vld [vmem:[#allocation74_spill] sm:$0xff] }
 0x193   : > { %v1052_v60 = vadd.f32 %v4710_v12, %v987_v50  ;;  %v1065_v26 = vadd.f32 %v4711_v54, %v1000_v3  ;;  %v1920_v55 = vstv %s3990_s26  ;;  %v1051_v19 = vadd.f32 %v4712_v40, %v986_v24  ;;  %v1299_v38 = vpop.permute.xlu0 %1298  ;;  %v4718_v50 = vld [vmem:[#allocation14_spill] sm:$0xff]  ;;  %v4719_v24 = vld [vmem:[#allocation80_spill] sm:$0xff]  ;;  %s4330_s26 = sld [smem:[#allocation2 + $0x81]] }
 0x194   : > { %1866 = vrot.lane.b32.xlu1 %v4709_v62, %s2595_s9  ;;  %v1225_v34 = vadd.f32 %v3899_v5, %v1153_v48  ;;  %v1064_v16 = vadd.f32 %v4713_v10, %v999_v30  ;;  %v1224_v46 = vadd.f32 %v3912_v9, %v1152_v7  ;;  %v1909_v0 = vrot.slane %v1905_v53, 1  ;;  %1880 = vrot.lane.b32.xlu0 %v3923_v36, %s2595_s9  ;;  %v4724_v36 = vld [vmem:[#allocation16_spill] sm:$0xff]  ;;  %v4725_v7 = vld [vmem:[#allocation78_spill] sm:$0xff] }
 0x195   : > { %v1117_v35 = vadd.f32 %v4714_v6, %v1052_v60  ;;  %v4716_v45 = vrot.slane %v4715_v21, 1  ;;  %v4717_v57 = vstv %s3800_s18  ;;  %v1116_v42 = vadd.f32 %v4718_v50, %v1051_v19  ;;  %s2316_s18 = sld [smem:[#allocation2 + $0x30]] }
 0x196   : > { %v4054_v59 = vadd.f32 %v1301_v8, %v1225_v34  ;;  %v4059_v63 = vmul.f32 %v3675_v14, %v4717_v57  ;;  %v1164_v27 = vadd.f32 %v4719_v24, %v1103_v28  ;;  %v4063_v9 = vadd.f32 %v1299_v38, %v1224_v46  ;;  %v4728_v34 = vld [vmem:[#allocation11_spill] sm:$0xff] }
 0x197   : > { %v1165_v5 = vadd.f32 %v4716_v45, %v1104_v13  ;;  %v4720_v53 = vrot.slane %v3848_v51, 1  ;;  %v1922_v56 = vmul.f32 %v3393_v49, %v1920_v55  ;;  %v4722_v3 = vrot.slane %v4721_v43, 1  ;;  %v1317_v51 = vpop.permute.xlu1 %1316  ;;  %v1315_v60 = vpop.permute.xlu0 %1314  ;;  %v4729_v45 = vld [vmem:[#allocation18_spill] sm:$0xff] }
 0x198   : > { %v1921_v48 = vmul.f32 %v3406_v20, %v1920_v55  ;;  %v1374_v17 = vstv %s4018_s24  ;;  %v1128_v30 = vadd.f32 %v4723_v32, %v1064_v16  ;;  %v1240_v44 = vadd.f32 %v3947_v33, %v1164_v27  ;;  %s4334_s24 = sld [smem:[#allocation2 + $0x18]] }
 0x199   : > { %1882 = vrot.lane.b32.xlu1 %v4720_v53, %s2595_s9  ;;  %v1129_v13 = vadd.f32 %v4722_v3, %v1065_v26  ;;  %v1241_v52 = vadd.f32 %v3934_v41, %v1165_v5  ;;  %v1895_v28 = vsel %vm523_vm0, %v1893_v31, %v1894_v47  ;;  %v1911_v41 = vsel %vm523_vm0, %v1909_v0, %v1910_v29  ;;  %v4727_v26 = vld [vmem:[#allocation17_spill] sm:$0xff] }
 0x19a   : > { %v4726_v62 = vrot.slane %v4725_v7, 1  ;;  %v1996_v54 = vstv %s4030_s22  ;;  %v1192_v2 = vadd.f32 %v4727_v26, %v1128_v30  ;;  %v1176_v31 = vadd.f32 %v4728_v34, %v1116_v42  ;;  %1896 = vrot.lane.b32.xlu0 %v1895_v28, %s2595_s9  ;;  %s4338_s22 = sld [smem:[#allocation2 + $0x33]] }
 0x19b   : > { %v1193_v22 = vadd.f32 %v4724_v36, %v1129_v13  ;;  %v4091_v33 = vadd.f32 %v1317_v51, %v1241_v52  ;;  %v4096_v55 = vadd.f32 %v1315_v60, %v1240_v44  ;;  %v1926_v40 = vrot.slane %v1922_v56, 1  ;;  %v1333_v6 = vpop.permute.xlu1 %1332  ;;  %v1331_v21 = vpop.permute.xlu0 %1330 }
 0x19c   : > { %v1177_v12 = vadd.f32 %v4726_v62, %v1117_v35  ;;  %v1925_v16 = vrot.slane %v1921_v48, 1  ;;  %v2012_v46 = vstv %s4046_s30  ;;  %v1256_v8 = vadd.f32 %v3975_v4, %v1176_v31  ;;  %s4342_s30 = sld [smem:[#allocation2 + $0x4e]] }
 0x19d   : > { %1898 = vrot.lane.b32.xlu1 %v1894_v47, %s2595_s9  ;;  %v1273_v10 = vadd.f32 %v3995_v39, %v1193_v22  ;;  %v1272_v0 = vadd.f32 %v4002_v15, %v1192_v2  ;;  %v1998_v35 = vmul.f32 %v3393_v49, %v1996_v54  ;;  %v1997_v61 = vmul.f32 %v3406_v20, %v1996_v54 }
 0x19e   : > { %v1257_v19 = vadd.f32 %v3969_v37, %v1177_v12  ;;  %v1355_v37 = vrot.slane %v3865_v58, 2  ;;  %v1356_v39 = vrot.slane %v4729_v45, 2  ;;  %v1367_v5 = vrot.slane %v3905_v18, 2  ;;  %1912 = vrot.lane.b32.xlu0 %v1911_v41, %s2595_s9  ;;  %v4730_v58 = vld [vmem:[#allocation15_spill] sm:$0xff] }
 0x19f   : > { %v4118_v4 = vadd.f32 %v1331_v21, %v1256_v8  ;;  %v1368_v15 = vrot.slane %v4059_v63, 2  ;;  %v2014_v38 = vmul.f32 %v3393_v49, %v2012_v46  ;;  %v1375_v57 = vmul.f32 %v3671_v1, %v1374_v17  ;;  %v1409_v11 = vpop.permute.xlu1 %1408  ;;  %v1407_v13 = vpop.permute.xlu0 %1406 }
 0x1a0   : > { %v4111_v47 = vadd.f32 %v1333_v6, %v1257_v19  ;;  %v4731_v50 = vrot.slane %v4730_v58, 2  ;;  %v1927_v42 = vsel %vm523_vm0, %v1925_v16, %v1926_v40  ;;  %v2013_v24 = vmul.f32 %v3406_v20, %v2012_v46 }
 0x1a1   : > { %1914 = vrot.lane.b32.xlu1 %v1910_v29, %s2595_s9  ;;  %v1376_v27 = vmul.f32 %v3675_v14, %v1374_v17  ;;  %v4732_v29 = vld [vmem:[#allocation19_spill] sm:$0xff]  ;;  %v2002_v63 = vrot.slane %v1998_v35, 2  ;;  %v2001_v56 = vrot.slane %v1997_v61, 2  ;;  %v2028_v43 = vstv %s4086_s4  ;;  %s4351_s4 = sld [smem:[#allocation2 + $0x69]] }
 0x1a2   : > { %v1349_v18 = vadd.f32 %v4731_v50, %v1273_v10  ;;  %v1348_v53 = vadd.f32 %v4732_v29, %v1272_v0  ;;  %v1357_v52 = vsel %vm744_vm1, %v1355_v37, %v1356_v39  ;;  %v1369_v32 = vsel %vm744_vm1, %v1367_v5, %v1368_v15  ;;  %1928 = vrot.lane.b32.xlu0 %v1927_v42, %s2595_s9 }
 0x1a3   : > { %v2018_v17 = vrot.slane %v2014_v38, 2  ;;  %v1386_v30 = vstv %s4101_s5  ;;  %v1361_v44 = vadd.f32 %v1356_v39, %v4028_v25  ;;  %v2017_v51 = vrot.slane %v2013_v24, 2  ;;  %v1425_v36 = vpop.permute.xlu1 %1424  ;;  %v1423_v54 = vpop.permute.xlu0 %1422  ;;  %s4392_s5 = sld [smem:[#allocation2 + $0x84]] }
 0x1a4   : > { %v4136_v3 = vadd.f32 %v1409_v11, %v1349_v18  ;;  %v4139_v48 = vadd.f32 %v1407_v13, %v1348_v53  ;;  %v2030_v28 = vmul.f32 %v3393_v49, %v2028_v43  ;;  %v2029_v41 = vmul.f32 %v3406_v20, %v2028_v43 }
 0x1a5   : > { %1930 = vrot.lane.b32.xlu1 %v1926_v40, %s2595_s9  ;;  %v1360_v22 = vadd.f32 %v1357_v52, %v4035_v23  ;;  %v2003_v7 = vsel %vm744_vm1, %v2001_v56, %v2002_v63  ;;  %v1379_v62 = vrot.slane %v1375_v57, 2  ;;  %v1380_v12 = vrot.slane %v1376_v27, 2 }
 0x1a6   : > { %v4152_v60 = vadd.f32 %v1425_v36, %v1361_v44  ;;  %v1387_v25 = vmul.f32 %v3671_v1, %v1386_v30  ;;  %v1388_v26 = vmul.f32 %v3675_v14, %v1386_v30  ;;  %v2044_v2 = vstv %s4116_s27  ;;  %2004 = vrot.lane.b32.xlu0 %v2003_v7, %s2594_s21  ;;  %v4211_v30 = vld [vmem:[%s2745_s29 + $0x20] sm:$0xff]  ;;  %s2416_s27 = smul.u32 80, %s4742_s16 }
 0x1a7   : > { %v4157_v34 = vadd.f32 %v1423_v54, %v1360_v22  ;;  %v1373_v23 = vadd.f32 %v1368_v15, %v4054_v59  ;;  %v2019_v31 = vsel %vm744_vm1, %v2017_v51, %v2018_v17  ;;  %v2034_v40 = vrot.slane %v2030_v28, 2  ;;  %v1441_v10 = vpop.permute.xlu1 %1440  ;;  %v1439_v0 = vpop.permute.xlu0 %1438 }
 0x1a8   : > { %v2033_v19 = vrot.slane %v2029_v41, 2  ;;  %v1372_v16 = vadd.f32 %v1369_v32, %v4063_v9  ;;  %v2046_v1 = vmul.f32 %v3393_v49, %v2044_v2  ;;  %v2045_v14 = vmul.f32 %v3406_v20, %v2044_v2 }
 0x1a9   : > { %2006 = vrot.lane.b32.xlu1 %v2002_v63, %s2594_s21  ;;  %v2060_v46 = vstv %s4134_s6  ;;  %v4167_v8 = vadd.f32 %v1441_v10, %v1373_v23  ;;  %v1381_v6 = vsel %vm744_vm1, %v1379_v62, %v1380_v12  ;;  %v1391_v35 = vrot.slane %v1387_v25, 2 }
 0x1aa   : > { %v1392_v59 = vrot.slane %v1388_v26, 2  ;;  %v4172_v61 = vadd.f32 %v1439_v0, %v1372_v16  ;;  %2020 = vrot.lane.b32.xlu0 %v2019_v31, %s2594_s21  ;;  %v1385_v9 = vadd.f32 %v1380_v12, %v4091_v33  ;;  %v2035_v21 = vsel %vm744_vm1, %v2033_v19, %v2034_v40 }
 0x1ab   : > { %v2062_v37 = vmul.f32 %v3393_v49, %v2060_v46  ;;  %v2061_v45 = vmul.f32 %v3406_v20, %v2060_v46  ;;  %v1457_v39 = vpop.permute.xlu1 %1456  ;;  %v1384_v5 = vadd.f32 %v1381_v6, %v4096_v55  ;;  %v2050_v15 = vrot.slane %v2046_v1, 2  ;;  %v1455_v50 = vpop.permute.xlu0 %1454 }
 0x1ac   : > { %v2049_v38 = vrot.slane %v2045_v14, 2  ;;  %v2076_v57 = vstv %s4150_s15  ;;  %v4184_v58 = vadd.f32 %v1457_v39, %v1385_v9  ;;  %v1393_v33 = vsel %vm744_vm1, %v1391_v35, %v1392_v59  ;;  %s4441_s15 = scalar_lea.vmem %s4505_s3, %s2416_s27 }
 0x1ad   : > { %2022 = vrot.lane.b32.xlu1 %v2018_v17, %s2594_s21  ;;  %v4187_v18 = vadd.f32 %v1455_v50, %v1384_v5  ;;  %v1397_v42 = vadd.f32 %v1392_v59, %v4111_v47  ;;  %v2066_v55 = vrot.slane %v2062_v37, 2  ;;  %v2065_v24 = vrot.slane %v2061_v45, 2  ;;  %v4207_v17 = vld [vmem:[%s2745_s29 + $0x28] sm:$0xff]  ;;  %s4223_s29 = sld [smem:[#allocation2 + $0x12]] }
 0x1ae   : > { %2036 = vrot.lane.b32.xlu0 %v2035_v21, %s2594_s21  ;;  %v2078_v27 = vmul.f32 %v3393_v49, %v2076_v57  ;;  %v1396_v29 = vadd.f32 %v1393_v33, %v4118_v4  ;;  %v2051_v53 = vsel %vm744_vm1, %v2049_v38, %v2050_v15  ;;  %v2077_v63 = vmul.f32 %v3406_v20, %v2076_v57 }
 0x1af   : > { %v1473_v11 = vpop.permute.xlu1 %1472  ;;  %v1471_v43 = vpop.permute.xlu0 %1470  ;;  %v2092_v13 = vstv %s4170_s25  ;;  %v2067_v49 = vsel %vm744_vm1, %v2065_v24, %v2066_v55  ;;  %v2108_v51 = vstv %s4182_s7 }
 0x1b0   : > { %v4196_v56 = vadd.f32 %v1473_v11, %v1397_v42  ;;  %v4201_v47 = vadd.f32 %v1471_v43, %v1396_v29  ;;  %v2082_v4 = vrot.slane %v2078_v27, 2  ;;  %v2081_v32 = vrot.slane %v2077_v63, 2 }
 0x1b1   : > { %2038 = vrot.lane.b32.xlu1 %v2034_v40, %s2594_s21  ;;  %v2094_v20 = vmul.f32 %v4207_v17, %v2092_v13  ;;  %v2093_v44 = vmul.f32 %v4211_v30, %v2092_v13  ;;  %v2110_v22 = vmul.f32 %v4207_v17, %v2108_v51  ;;  %v2109_v7 = vmul.f32 %v4211_v30, %v2108_v51 }
 0x1b2   : > { %2052 = vrot.lane.b32.xlu0 %v2051_v53, %s2594_s21  ;;  %v2083_v12 = vsel %vm744_vm1, %v2081_v32, %v2082_v4  ;;  %v1571_v53 = vstv %s4245_s11  ;;  %v1576_v32 = vstv %s4255_s8 }
 0x1b3   : > { %v1489_v52 = vpop.permute.xlu1 %1488  ;;  %v1487_v41 = vpop.permute.xlu0 %1486  ;;  %v2098_v54 = vrot.slane %v2094_v20, 2  ;;  %v2114_v23 = vrot.slane %v2110_v22, 2  ;;  %v2113_v31 = vrot.slane %v2109_v7, 2  ;;  %v1561_v0 = vstv %s4223_s29 }
 0x1b4   : > { %v1493_v28 = vadd.f32 %v1489_v52, %v4136_v3  ;;  %v1492_v36 = vadd.f32 %v1487_v41, %v4139_v48  ;;  %v2097_v3 = vrot.slane %v2093_v44, 2  ;;  %v2124_v48 = vstv %s4199_s28 }
 0x1b5   : > { %2054 = vrot.lane.b32.xlu1 %v2050_v15, %s2594_s21  ;;  %v2126_v10 = vmul.f32 %v4207_v17, %v2124_v48  ;;  %v2125_v16 = vmul.f32 %v4211_v30, %v2124_v48  ;;  %v2115_v46 = vsel %vm744_vm1, %v2113_v31, %v2114_v23  ;;  %v1563_v45 = vmul.f32 %v4207_v17, %v1561_v0 }
 0x1b6   : > { %2068 = vrot.lane.b32.xlu0 %v2067_v49, %s2594_s21  ;;  %v2099_v19 = vsel %vm744_vm1, %v2097_v3, %v2098_v54  ;;  %v1562_v39 = vmul.f32 %v4211_v30, %v1561_v0  ;;  %v1572_v52 = vmul.f32 %v4211_v30, %v1571_v53  ;;  %v1578_v41 = vmul.f32 %v4207_v17, %v1576_v32 }
 0x1b7   : > { %v1505_v62 = vpop.permute.xlu1 %1504  ;;  %v1503_v26 = vpop.permute.xlu0 %1502  ;;  %v2130_v35 = vrot.slane %v2126_v10, 2  ;;  %v2129_v59 = vrot.slane %v2125_v16, 2  ;;  %v1565_v42 = vadd.f32 %v1563_v45, %v1493_v28  ;;  %v1577_v7 = vmul.f32 %v4211_v30, %v1576_v32 }
 0x1b8   : > { %v1509_v25 = vadd.f32 %v1505_v62, %v4152_v60  ;;  %v1508_v2 = vadd.f32 %v1503_v26, %v4157_v34  ;;  %v2140_v34 = vstv %s4216_s10  ;;  %v1564_v27 = vadd.f32 %v1562_v39, %v1492_v36 }
 0x1b9   : > { %2070 = vrot.lane.b32.xlu1 %v2066_v55, %s2594_s21  ;;  %s4234_s21 = sld [smem:[#allocation2 + $0x2d]]  ;;  %v2142_v9 = vmul.f32 %v4207_v17, %v2140_v34  ;;  %v2141_v21 = vmul.f32 %v4211_v30, %v2140_v34  ;;  %v2131_v15 = vsel %vm744_vm1, %v2129_v59, %v2130_v35  ;;  %v1581_v62 = vstv %s2394_s12 }
 0x1ba   : > { %2084 = vrot.lane.b32.xlu0 %v2083_v12, %s2595_s9  ;;  %v1583_v26 = vmul.f32 %v4207_v17, %v1581_v62 }
 0x1bb   : > { %v1521_v40 = vpop.permute.xlu1 %1520  ;;  %v1519_v1 = vpop.permute.xlu0 %1518  ;;  %v2146_v38 = vrot.slane %v2142_v9, 2  ;;  %v2145_v57 = vrot.slane %v2141_v21, 2 }
 0x1bc   : > { %v1525_v60 = vadd.f32 %v1521_v40, %v4167_v8  ;;  %v1524_v14 = vadd.f32 %v1519_v1, %v4172_v61 }
 0x1bd   : > { %2086 = vrot.lane.b32.xlu1 %v2082_v4, %s2595_s9  ;;  %v2147_v11 = vsel %vm744_vm1, %v2145_v57, %v2146_v38 }
 0x1be   : > { %2100 = vrot.lane.b32.xlu0 %v2099_v19, %s2595_s9  ;;  %v1574_v22 = vadd.f32 %v1572_v52, %v1524_v14 }
 0x1bf   : > { %v1537_v6 = vpop.permute.xlu1 %1536  ;;  %v1535_v61 = vpop.permute.xlu0 %1534  ;;  %v1566_v50 = vstv %s4234_s21 }
 0x1c0   : > { %v1541_v8 = vadd.f32 %v1537_v6, %v4184_v58  ;;  %v1540_v37 = vadd.f32 %v1535_v61, %v4187_v18  ;;  %v1568_v55 = vmul.f32 %v4207_v17, %v1566_v50  ;;  %v1567_v29 = vmul.f32 %v4211_v30, %v1566_v50 }
 0x1c1   : > { %2102 = vrot.lane.b32.xlu1 %v2098_v54, %s2595_s9 }
 0x1c2   : > { %2116 = vrot.lane.b32.xlu0 %v2115_v46, %s2595_s9  ;;  %v1570_v13 = vadd.f32 %v1568_v55, %v1509_v25  ;;  %v1569_v4 = vadd.f32 %v1567_v29, %v1508_v2  ;;  %v1580_v25 = vadd.f32 %v1578_v41, %v1541_v8  ;;  %v1579_v2 = vadd.f32 %v1577_v7, %v1540_v37 }
 0x1c3   : > { %v1553_v5 = vpop.permute.xlu1 %1552  ;;  %v1551_v33 = vpop.permute.xlu0 %1550 }
 0x1c4   : > { %v1557_v58 = vadd.f32 %v1553_v5, %v4196_v56  ;;  %v1556_v18 = vadd.f32 %v1551_v33, %v4201_v47  ;;  %v1573_v47 = vmul.f32 %v4207_v17, %v1571_v53 }
 0x1c5   : > { %2118 = vrot.lane.b32.xlu1 %v2114_v23, %s2595_s9  ;;  %v1582_v23 = vmul.f32 %v4211_v30, %v1581_v62 }
 0x1c6   : > { %2132 = vrot.lane.b32.xlu0 %v2131_v15, %s2595_s9  ;;  %v1575_v28 = vadd.f32 %v1573_v47, %v1525_v60  ;;  %v1585_v10 = vadd.f32 %v1583_v26, %v1557_v58 }
 0x1c7   : > { %v1594_v24 = vpop.permute.xlu1 %1593  ;;  %v1592_v56 = vpop.permute.xlu0 %1591  ;;  %v1584_v60 = vadd.f32 %v1582_v23, %v1556_v18 }
 0x1c8   : > { %v1598_v63 = vadd.f32 %v1594_v24, %v1565_v42  ;;  %v1597_v43 = vadd.f32 %v1592_v56, %v1564_v27 }
 0x1c9   : > { %2134 = vrot.lane.b32.xlu1 %v2130_v35, %s2595_s9 }
 0x1ca   : > { %2148 = vrot.lane.b32.xlu0 %v2147_v11, %s2595_s9 }
 0x1cb   : > { %v1607_v49 = vpop.permute.xlu1 %1606  ;;  %v1605_v44 = vpop.permute.xlu0 %1604 }
 0x1cc   : > { %v1611_v20 = vadd.f32 %v1607_v49, %v1570_v13  ;;  %v1610_v51 = vadd.f32 %v1605_v44, %v1569_v4 }
 0x1cd   : > { %2150 = vrot.lane.b32.xlu1 %v2146_v38, %s2595_s9  ;;  %s2289_s9 = sld [smem:[#allocation2 + $0x15]] }
 0x1cf   : > { %v1620_v36 = vpop.permute.xlu1 %1619  ;;  %v1618_v54 = vpop.permute.xlu0 %1617 }
 0x1d0   : > { %v1624_v12 = vadd.f32 %v1620_v36, %v1575_v28  ;;  %v1623_v3 = vadd.f32 %v1618_v54, %v1574_v22  ;;  %v1728_v28 = vstv %s2316_s18 }
 0x1d1   : > { %v1729_v62 = vmul.f32 %v4211_v30, %v1728_v28 }
 0x1d3   : > { %v1633_v48 = vpop.permute.xlu1 %1632  ;;  %v1631_v40 = vpop.permute.xlu0 %1630 }
 0x1d4   : > { %v1637_v31 = vadd.f32 %v1633_v48, %v1580_v25  ;;  %v1636_v19 = vadd.f32 %v1631_v40, %v1579_v2  ;;  %v1733_v2 = vrot.slane %v1729_v62, 1  ;;  %v1764_v40 = vstv %s4330_s26 }
 0x1d7   : > { %v1646_v16 = vpop.permute.xlu1 %1645  ;;  %v1644_v34 = vpop.permute.xlu0 %1643 }
 0x1d8   : > { %v1650_v1 = vadd.f32 %v1646_v16, %v1585_v10  ;;  %v1649_v14 = vadd.f32 %v1644_v34, %v1584_v60  ;;  %v1936_v10 = vstv %s4334_s24 }
 0x1db   : > { %v1659_v46 = vpop.permute.xlu1 %1658  ;;  %v1657_v6 = vpop.permute.xlu0 %1656 }
 0x1dc   : > { %v4274_v0 = vadd.f32 %v1659_v46, %v1598_v63  ;;  %v4276_v35 = vadd.f32 %v1657_v6, %v1597_v43  ;;  %v1765_v6 = vmul.f32 %v4211_v30, %v1764_v40 }
 0x1df   : > { %v1672_v59 = vpop.permute.xlu1 %1671  ;;  %v1670_v21 = vpop.permute.xlu0 %1669 }
 0x1e0   : > { %v4278_v9 = vadd.f32 %v1672_v59, %v1611_v20  ;;  %v4280_v8 = vadd.f32 %v1670_v21, %v1610_v51  ;;  %v1716_v51 = vstv %s2289_s9  ;;  %v1960_v59 = vstv %s4342_s30 }
 0x1e1   : > { %v1717_v22 = vmul.f32 %v4211_v30, %v1716_v51  ;;  %v1718_v7 = vmul.f32 %v4207_v17, %v1716_v51  ;;  %v1961_v62 = vmul.f32 %v4211_v30, %v1960_v59 }
 0x1e3   : > { %v1685_v61 = vpop.permute.xlu1 %1684  ;;  %v1683_v45 = vpop.permute.xlu0 %1682  ;;  %v1721_v26 = vrot.slane %v1717_v22, 1  ;;  %v1722_v48 = vrot.slane %v1718_v7, 1 }
 0x1e4   : > { %v4282_v37 = vadd.f32 %v1685_v61, %v1624_v12  ;;  %v4284_v39 = vadd.f32 %v1683_v45, %v1623_v3  ;;  %v1730_v12 = vmul.f32 %v4207_v17, %v1728_v28  ;;  %v1740_v3 = vstv %s2343_s19 }
 0x1e5   : > { %v1742_v60 = vmul.f32 %v4207_v17, %v1740_v3  ;;  %v1723_v21 = vsel %vm523_vm0, %v1721_v26, %v1722_v48  ;;  %v1937_v45 = vmul.f32 %v4211_v30, %v1936_v10  ;;  %v1727_v22 = vadd.f32 %v1722_v48, %v4274_v0 }
 0x1e6   : > { %v1734_v23 = vrot.slane %v1730_v12, 1  ;;  %v4384_v12 = vmul.f32 %v4207_v17, %v1960_v59  ;;  %v1726_v26 = vadd.f32 %v1723_v21, %v4276_v35  ;;  %v1972_v48 = vstv %s4351_s4 }
 0x1e7   : > { %v1698_v5 = vpop.permute.xlu1 %1697  ;;  %v1696_v38 = vpop.permute.xlu0 %1695  ;;  %v1746_v7 = vrot.slane %v1742_v60, 1 }
 0x1e8   : > { %v4286_v15 = vadd.f32 %v1698_v5, %v1637_v31  ;;  %v4288_v57 = vadd.f32 %v1696_v38, %v1636_v19  ;;  %v1752_v31 = vstv %s2370_s23  ;;  %v1741_v19 = vmul.f32 %v4211_v30, %v1740_v3 }
 0x1e9   : > { %v4363_v46 = vmul.f32 %v4207_v17, %v1752_v31  ;;  %v1735_v61 = vsel %vm523_vm0, %v1733_v2, %v1734_v23  ;;  %v1938_v5 = vmul.f32 %v4207_v17, %v1936_v10  ;;  %v1941_v10 = vrot.slane %v1937_v45, 2 }
 0x1ea   : > { %v1745_v38 = vrot.slane %v1741_v19, 1  ;;  %v1739_v35 = vadd.f32 %v1734_v23, %v4278_v9  ;;  %v1973_v45 = vmul.f32 %v4211_v30, %v1972_v48 }
 0x1eb   : > { %v1711_v50 = vpop.permute.xlu1 %1710  ;;  %v1709_v33 = vpop.permute.xlu0 %1708  ;;  %v1942_v0 = vrot.slane %v1938_v5, 2 }
 0x1ec   : > { %v4290_v58 = vadd.f32 %v1711_v50, %v1650_v1  ;;  %v4292_v18 = vadd.f32 %v1709_v33, %v1649_v14  ;;  %v1948_v1 = vstv %s4338_s22  ;;  %v1753_v14 = vmul.f32 %v4211_v30, %v1752_v31 }
 0x1ed   : > { %v4372_v50 = vmul.f32 %v4207_v17, %v1764_v40  ;;  %v1949_v33 = vmul.f32 %v4211_v30, %v1948_v1  ;;  %v4376_v51 = vmul.f32 %v4207_v17, %v1948_v1  ;;  %v1758_v31 = vrot.slane %v4363_v46, 1 }
 0x1ee   : > { %v1757_v2 = vrot.slane %v1753_v14, 1  ;;  %v1769_v40 = vrot.slane %v1765_v6, 1  ;;  %v1965_v14 = vrot.slane %v1961_v62, 2  ;;  %v1966_v46 = vrot.slane %v4384_v12, 2 }
 0x1ef   : > { %v4294_v42 = vpop.permute.xlu1 %1786  ;;  %v4296_v55 = vpop.permute.xlu0 %1784  ;;  %v1770_v1 = vrot.slane %v4372_v50, 1  ;;  %v1953_v59 = vrot.slane %v1949_v33, 2  ;;  %v1747_v50 = vsel %vm523_vm0, %v1745_v38, %v1746_v7  ;;  %v1943_v9 = vsel %vm744_vm1, %v1941_v10, %v1942_v0 }
 0x1f0   : > { %v1791_v19 = vadd.f32 %v4294_v42, %v1727_v22  ;;  %v1790_v60 = vadd.f32 %v4296_v55, %v1726_v26  ;;  %v1738_v55 = vadd.f32 %v1735_v61, %v4280_v8  ;;  %v1759_v33 = vsel %vm523_vm0, %v1757_v2, %v1758_v31 }
 0x1f1   : > { %v1967_v22 = vsel %vm744_vm1, %v1965_v14, %v1966_v46  ;;  %v1977_v2 = vrot.slane %v1973_v45, 2 }
 0x1f3   : > { %v4298_v24 = vpop.permute.xlu1 %1802  ;;  %v4300_v27 = vpop.permute.xlu0 %1800 }
 0x1f4   : > { %v1807_v5 = vadd.f32 %v4298_v24, %v1739_v35  ;;  %v1806_v23 = vadd.f32 %v4300_v27, %v1738_v55  ;;  %v1751_v24 = vadd.f32 %v1746_v7, %v4282_v37  ;;  %v1750_v27 = vadd.f32 %v1747_v50, %v4284_v39 }
 0x1f5   : > { %v1984_v37 = vstv %s4392_s5  ;;  %v1763_v39 = vadd.f32 %v1758_v31, %v4286_v15 }
 0x1f6   : > { %v1985_v14 = vmul.f32 %v4211_v30, %v1984_v37  ;;  %v1986_v15 = vmul.f32 %v4207_v17, %v1984_v37 }
 0x1f7   : > { %v4304_v29 = vpop.permute.xlu0 %1816 }
 0x1f8   : > { %v4302_v11 = vpop.permute.xlu1 %1818  ;;  %v1989_v50 = vrot.slane %v1985_v14, 2 }
 0x1fb   : > { %v4308_v63 = vpop.permute.xlu0 %1832 }
 0x1fd   : > { %v4306_v53 = vpop.permute.xlu1 %1834 }
 0x1fe   : > { %v1839_v35 = vadd.f32 %v4306_v53, %v1763_v39  ;;  %v1775_v53 = vadd.f32 %v1770_v1, %v4290_v58 }
 0x1ff   : > { %v4312_v43 = vpop.permute.xlu0 %1848 }
 0x201   : > { %v4310_v56 = vpop.permute.xlu1 %1850 }
 0x202   : > { %v1855_v45 = vadd.f32 %v4310_v56, %v1775_v53 }
 0x203   : > { %v4316_v47 = vpop.permute.xlu0 %1864 }
 0x204   : > { %v1870_v21 = vadd.f32 %v4316_v47, %v1790_v60 }
 0x206   : > { %v4314_v13 = vpop.permute.xlu1 %1866  ;;  %v1946_v26 = vadd.f32 %v1943_v9, %v1870_v21  ;;  %v1990_v9 = vrot.slane %v1986_v15, 2 }
 0x207   : > { %v4320_v4 = vpop.permute.xlu0 %1880  ;;  %v1871_v42 = vadd.f32 %v4314_v13, %v1791_v19  ;;  %v4416_v13 = vmul.f32 %v4207_v17, %v1972_v48 }
 0x208   : > { %v1886_v12 = vadd.f32 %v4320_v4, %v1806_v23 }
 0x209   : > { %v1947_v38 = vadd.f32 %v1942_v0, %v1871_v42  ;;  %v1978_v10 = vrot.slane %v4416_v13, 2 }
 0x20b   : > { %v4318_v49 = vpop.permute.xlu1 %1882 }
 0x20c   : > { %v4324_v32 = vpop.permute.xlu0 %1896  ;;  %v1887_v61 = vadd.f32 %v4318_v49, %v1807_v5  ;;  %v1822_v49 = vadd.f32 %v4304_v29, %v1750_v27  ;;  %v1762_v29 = vadd.f32 %v1759_v33, %v4288_v57  ;;  %v1979_v57 = vsel %vm744_vm1, %v1977_v2, %v1978_v10 }
 0x20f   : > { %v4322_v52 = vpop.permute.xlu1 %1898 }
 0x210   : > { %v4328_v44 = vpop.permute.xlu0 %1912 }
 0x213   : > { %v4326_v20 = vpop.permute.xlu1 %1914 }
 0x214   : > { %v4336_v36 = vpop.permute.xlu0 %1928 }
 0x215   : > { %4734 = vst [vmem:[#allocation20_spill] sm:$0xff] %v4336_v36  ;;  %v1954_v36 = vrot.slane %v4376_v51, 2  ;;  %v1771_v51 = vsel %vm523_vm0, %v1769_v40, %v1770_v1  ;;  %v1823_v40 = vadd.f32 %v4302_v11, %v1751_v24 }
 0x216   : > { %v1774_v55 = vadd.f32 %v1771_v51, %v4292_v18 }
 0x217   : > { %v4332_v41 = vpop.permute.xlu1 %1930  ;;  %v1955_v8 = vsel %vm744_vm1, %v1953_v59, %v1954_v36  ;;  %v1903_v11 = vadd.f32 %v4322_v52, %v1823_v40  ;;  %v1959_v4 = vadd.f32 %v1954_v36, %v1887_v61  ;;  %v1838_v52 = vadd.f32 %v4308_v63, %v1762_v29 }
 0x218   : > { %4733 = vst [vmem:[#allocation26_spill] sm:$0xff] %v4332_v41  ;;  %v4348_v25 = vpop.permute.xlu0 %2004  ;;  %v1958_v60 = vadd.f32 %v1955_v8, %v1886_v12  ;;  %v1854_v58 = vadd.f32 %v4312_v43, %v1774_v55  ;;  %v1991_v43 = vsel %vm744_vm1, %v1989_v50, %v1990_v9 }
 0x219   : > { %v2010_v7 = vadd.f32 %v4348_v25, %v1946_v26  ;;  %v1902_v25 = vadd.f32 %v4324_v32, %v1822_v49  ;;  %v1971_v30 = vadd.f32 %v1966_v46, %v1903_v11  ;;  %v1918_v63 = vadd.f32 %v4328_v44, %v1838_v52 }
 0x21b   : > { %v4346_v54 = vpop.permute.xlu1 %2006  ;;  %v1970_v21 = vadd.f32 %v1967_v22, %v1902_v25  ;;  %v1982_v33 = vadd.f32 %v1979_v57, %v1918_v63 }
 0x21c   : > { %v4359_v34 = vpop.permute.xlu0 %2020  ;;  %v2011_v19 = vadd.f32 %v4346_v54, %v1947_v38  ;;  %v4736_v23 = vld [vmem:[#allocation20_spill] sm:$0xff] }
 0x21d   : > { %v2026_v36 = vadd.f32 %v4359_v34, %v1958_v60 }
 0x21f   : > { %v4355_v16 = vpop.permute.xlu1 %2022  ;;  %v4735_v44 = vld [vmem:[#allocation26_spill] sm:$0xff] }
 0x220   : > { %v4386_v3 = vpop.permute.xlu0 %2036  ;;  %v2027_v42 = vadd.f32 %v4355_v16, %v1959_v4  ;;  %v1919_v16 = vadd.f32 %v4326_v20, %v1839_v35  ;;  %v1935_v1 = vadd.f32 %v4735_v44, %v1855_v45 }
 0x221   : > { %v2042_v20 = vadd.f32 %v4386_v3, %v1970_v21 }
 0x222   : > { %v1983_v46 = vadd.f32 %v1978_v10, %v1919_v16  ;;  %v1995_v61 = vadd.f32 %v1990_v9, %v1935_v1 }
 0x223   : > { %v4378_v28 = vpop.permute.xlu1 %2038 }
 0x224   : > { %v4407_v6 = vpop.permute.xlu0 %2052  ;;  %v2043_v5 = vadd.f32 %v4378_v28, %v1971_v30  ;;  %v1934_v28 = vadd.f32 %v4736_v23, %v1854_v58 }
 0x225   : > { %v2058_v3 = vadd.f32 %v4407_v6, %v1982_v33 }
 0x226   : > { %v1994_v27 = vadd.f32 %v1991_v43, %v1934_v28 }
 0x227   : > { %v4397_v41 = vpop.permute.xlu1 %2054 }
 0x228   : > { %v4428_v62 = vpop.permute.xlu0 %2068  ;;  %v2059_v8 = vadd.f32 %v4397_v41, %v1983_v46 }
 0x229   : > { %v2074_v41 = vadd.f32 %v4428_v62, %v1994_v27 }
 0x22b   : > { %v4422_v47 = vpop.permute.xlu1 %2070 }
 0x22c   : > { %v2085_v48 = vpop.permute.xlu0 %2084  ;;  %v2075_v26 = vadd.f32 %v4422_v47, %v1995_v61 }
 0x22d   : > { %v2090_v59 = vadd.f32 %v2085_v48, %v2010_v7 }
 0x22f   : > { %v2087_v0 = vpop.permute.xlu1 %2086  ;;  %2157 = vst.msk [vmem:[%s4441_s15] sm:$0xff] %vm2156_vm3, %v2090_v59 }
 0x230   : > { %v2091_v54 = vadd.f32 %v2087_v0, %v2011_v19  ;;  %v2101_v17 = vpop.permute.xlu0 %2100 }
 0x231   : > { %v2106_v34 = vadd.f32 %v2101_v17, %v2026_v36 }
 0x232   : > { %2159 = vst.msk [vmem:[%s4441_s15 + $0x8] sm:$0x3f] %vm2158_vm2, %v2091_v54 }
 0x233   : > { %v2103_v32 = vpop.permute.xlu1 %2102  ;;  %2160 = vst.msk [vmem:[%s4441_s15 + $0x10] sm:$0xff] %vm2156_vm3, %v2106_v34 }
 0x234   : > { %v2107_v31 = vadd.f32 %v2103_v32, %v2027_v42  ;;  %v2117_v56 = vpop.permute.xlu0 %2116 }
 0x235   : > { %v2122_v51 = vadd.f32 %v2117_v56, %v2042_v20 }
 0x236   : > { %2161 = vst.msk [vmem:[%s4441_s15 + $0x18] sm:$0x3f] %vm2158_vm2, %v2107_v31 }
 0x237   : > { %v2119_v18 = vpop.permute.xlu1 %2118  ;;  %2162 = vst.msk [vmem:[%s4441_s15 + $0x20] sm:$0xff] %vm2156_vm3, %v2122_v51 }
 0x238   : > { %v2123_v13 = vadd.f32 %v2119_v18, %v2043_v5  ;;  %v2133_v22 = vpop.permute.xlu0 %2132 }
 0x239   : > { %v2138_v12 = vadd.f32 %v2133_v22, %v2058_v3 }
 0x23a   : > { %2163 = vst.msk [vmem:[%s4441_s15 + $0x28] sm:$0x3f] %vm2158_vm2, %v2123_v13 }
 0x23b   : > { %v2135_v24 = vpop.permute.xlu1 %2134  ;;  %2164 = vst.msk [vmem:[%s4441_s15 + $0x30] sm:$0xff] %vm2156_vm3, %v2138_v12 }
 0x23c   : > { %v2139_v38 = vadd.f32 %v2135_v24, %v2059_v8  ;;  %v2149_v40 = vpop.permute.xlu0 %2148 }
 0x23d   : > { %v2154_v19 = vadd.f32 %v2149_v40, %v2074_v41 }
 0x23e   : > { %2165 = vst.msk [vmem:[%s4441_s15 + $0x38] sm:$0x3f] %vm2158_vm2, %v2139_v38 }
 0x23f   : > { %v2151_v2 = vpop.permute.xlu1 %2150  ;;  %2166 = vst.msk [vmem:[%s4441_s15 + $0x40] sm:$0xff] %vm2156_vm3, %v2154_v19 }
 0x240   : > { %v2155_v6 = vadd.f32 %v2151_v2, %v2075_v26 }
 0x242   : > { %2167 = vst.msk [vmem:[%s4441_s15 + $0x48] sm:$0x3f] %vm2158_vm2, %v2155_v6 }
 0x243 PF: > { %p15_p11 = scmp.ge.s32.totalorder %s2638_s17, 4   ;;  %s4737_s12 = smov %s2579_s13 }
 0x244   : > { %s4738_s13 = smov %s2583_s14  ;;  %s4739_s14 = smov %s2648_s20 }
 0x245   : > { %s4740_s15 = smov %s2638_s17  ;;  %17 = sbr.rel (!%p15_p11) target bundleno = 5 (0x5), region = 84 }
 0x24c   :  { %2189 = vsyncpa [#allocation3], 1 }
 0x24d   :  { %2191 = vsyncpa [#allocation3 + $0x1], 1 }
 0x24e   :  { %2192 = vsyncpa [#allocation4], 1 }
 0x24f   :  { %2194 = vsyncpa [#allocation4 + $0x1], 1 }
 0x250   :  { %2195 = vsyncpa [#allocation5], 1 }
 0x251   :  { %2197 = vsyncpa [#allocation5 + $0x1], 1 }

</bundles_post_ra>
